<compile_context>
chip_gen: v6e
topology: v6e:2x2x1
jax: 0.10.0
libtpu: 0.0.40
codegen_flags: <defaults>
</compile_context>

<pallas_src>
import functools
import math

import jax
import jax.numpy as jnp
from jax.experimental import pallas as pl
from jax.experimental.pallas import tpu as pltpu


def _round_up(x, m):
    return ((x + m - 1) // m) * m


# ----------------------------------------------------------------------------
# Generic Pallas matmul: (M,K) @ (K,N) + bias, fused activation.
# ----------------------------------------------------------------------------

def _mm_bias_kernel(a_ref, b_ref, bias_ref, o_ref, *, activation):
    acc = jnp.dot(a_ref[...], b_ref[...],
                  preferred_element_type=jnp.float32) + bias_ref[...]
    if activation == "relu":
        acc = jnp.maximum(acc, 0.0)
    elif activation == "swish":
        acc = acc * jax.nn.sigmoid(acc)
    o_ref[...] = acc.astype(o_ref.dtype)


def matmul_bias(a, b, bias, activation=None):
    """(M,K) @ (K,N) + bias on the MXU.

    A/B are stored bf16 (f32 accumulation), M tiled with up to 512 rows,
    N zero-padded to a multiple of 128 lanes (unmasked stores).
    """
    M, K = a.shape
    K2, N = b.shape
    assert K == K2
    Np = _round_up(N, 128)
    Mp = _round_up(M, 16)
    if Mp <= 512:
        TM = Mp
    else:
        TM = 512
        Mp = _round_up(M, 512)

    a_p = a.astype(jnp.bfloat16)
    if Mp != M:
        a_p = jnp.pad(a_p, ((0, Mp - M), (0, 0)))
    b_p = b.astype(jnp.bfloat16)
    if Np != N:
        b_p = jnp.pad(b_p, ((0, 0), (0, Np - N)))
    bias_p = bias.astype(jnp.float32)
    if Np != N:
        bias_p = jnp.pad(bias_p, (0, Np - N))
    bias_p = bias_p.reshape(1, Np)

    out = pl.pallas_call(
        functools.partial(_mm_bias_kernel, activation=activation),
        out_shape=jax.ShapeDtypeStruct((Mp, Np), jnp.float32),
        grid=(Mp // TM,),
        in_specs=[
            pl.BlockSpec((TM, K), lambda i: (i, 0)),
            pl.BlockSpec((K, Np), lambda i: (0, 0)),
            pl.BlockSpec((1, Np), lambda i: (0, 0)),
        ],
        out_specs=pl.BlockSpec((TM, Np), lambda i: (i, 0)),
        compiler_params=pltpu.CompilerParams(dimension_semantics=("parallel",)),
    )(a_p, b_p, bias_p)
    if Mp != M or Np != N:
        out = out[:M, :N]
    return out


# ----------------------------------------------------------------------------
# Fully fused Conformer block kernel (one grid program per batch element).
# ----------------------------------------------------------------------------

def _conformer_block_kernel(
        x_ref, ln_g_ref, ln_b_ref,
        ffn1_w1_ref, ffn1_b1_ref, ffn1_w2_ref, ffn1_b2_ref,
        wq_ref, bq_ref, wk_ref, bk_ref, wvo_ref, attn_b_ref,
        pw1_w_ref, pw1_b_ref, dw_w_ref, conv_b_ref, pw2_w_ref, pw2_b_ref,
        ffn2_w1_ref, ffn2_b1_ref, ffn2_w2_ref, ffn2_b2_ref,
        o_ref, *, num_heads, res_factor, dw_taps, eps):
    x = x_ref[...].astype(jnp.float32)          # (T, D) — one batch element
    T, D = x.shape
    H = num_heads
    dh = D // H
    scale = 1.0 / math.sqrt(dh)

    def mxu(a, w):                               # bf16 weight, f32 accumulate
        return jnp.dot(a.astype(jnp.bfloat16), w,
                       preferred_element_type=jnp.float32)

    def layer_norm(v, i):
        mu = jnp.mean(v, axis=-1, keepdims=True)
        var = jnp.mean((v - mu) ** 2, axis=-1, keepdims=True)
        vn = (v - mu) * jax.lax.rsqrt(var + eps)
        return vn * ln_g_ref[i:i + 1, :] + ln_b_ref[i:i + 1, :]

    def swish(v):
        return v * jax.nn.sigmoid(v)

    # --- FFN 1 (half residual) ---
    y = layer_norm(x, 0)
    y = swish(mxu(y, ffn1_w1_ref[...]) + ffn1_b1_ref[...])
    y = mxu(y, ffn1_w2_ref[...]) + ffn1_b2_ref[...]
    x = x + res_factor * y

    # --- MHSA: all heads batched; Wo folded into V projection (wrapper) ---
    # TODO(synk): reference Efficient Conformer uses relative-positional MHSA;
    #             standard absolute-position MHSA used here.
    y = layer_norm(x, 1)
    yb = jnp.broadcast_to(y.astype(jnp.bfloat16), (H, T, D))
    q = jnp.einsum('htd,hde->hte', yb, wq_ref[...],
                   preferred_element_type=jnp.float32) + bq_ref[...]   # (H,T,dh)
    k = jnp.einsum('htd,hde->hte', yb, wk_ref[...],
                   preferred_element_type=jnp.float32) + bk_ref[...]   # (H,T,dh)
    v = jnp.einsum('htd,hde->hte', yb, wvo_ref[...],
                   preferred_element_type=jnp.float32)                  # (H,T,D)
    s = jnp.einsum('hte,hse->hts', q.astype(jnp.bfloat16),
                   k.astype(jnp.bfloat16),
                   preferred_element_type=jnp.float32) * scale          # (H,T,T)
    s = s - jnp.max(s, axis=-1, keepdims=True)
    p = jnp.exp(s)
    p = p * pl.reciprocal(jnp.sum(p, axis=-1, keepdims=True), approx=True)
    o = jnp.einsum('hts,hsd->htd', p.astype(jnp.bfloat16),
                   v.astype(jnp.bfloat16),
                   preferred_element_type=jnp.float32)                  # (H,T,D)
    attn = jnp.sum(o, axis=0) + attn_b_ref[...]
    x = x + attn

    # --- Conv module: pw1 -> GLU -> depthwise (roll+FMA) -> BN(folded) -> swish -> pw2
    y = layer_norm(x, 2)
    y = mxu(y, pw1_w_ref[...]) + pw1_b_ref[...]            # (T, 2D)
    y = y[:, :D] * jax.nn.sigmoid(y[:, D:])                # GLU
    pad_l = (dw_taps - 1) // 2
    row = jax.lax.broadcasted_iota(jnp.int32, (T, D), 0)
    acc = jnp.zeros((T, D), jnp.float32)
    for t in range(dw_taps):                               # XLU roll + VPU FMA
        off = t - pad_l
        shifted = y if off == 0 else pltpu.roll(y, (-off) % T, axis=0)
        valid = jnp.logical_and(row + off >= 0, row + off < T)
        acc = acc + jnp.where(valid, shifted, 0.0) * dw_w_ref[t:t + 1, :]
    y = acc + conv_b_ref[...]                              # dw bias + BN folded
    y = swish(y)
    y = mxu(y, pw2_w_ref[...]) + pw2_b_ref[...]
    x = x + y

    # --- FFN 2 (half residual) ---
    y = layer_norm(x, 3)
    y = swish(mxu(y, ffn2_w1_ref[...]) + ffn2_b1_ref[...])
    y = mxu(y, ffn2_w2_ref[...]) + ffn2_b2_ref[...]
    x = x + res_factor * y

    # --- output LayerNorm ---
    o_ref[...] = layer_norm(x, 4).astype(o_ref.dtype)


def conformer_block(bp, cfg, x):
    B, T, D = x.shape
    assert T % 8 == 0, "sequence length must be a multiple of 8 for the fused block"
    H = cfg["num_heads"]
    dh = D // H
    eps = 1e-5

    bf = lambda a: a.astype(jnp.bfloat16)
    row = lambda v: v.reshape(1, -1).astype(jnp.float32)

    # Eval-mode BatchNorm1d folded into the depthwise tap weights / one bias.
    bn = bp["conv_bn"]
    bn_s = bn["g"] / jnp.sqrt(bn["v"] + eps)
    dw_w = (bp["conv_dw_w"] * bn_s[None, :]).astype(jnp.float32)     # (K, D)
    conv_b = bp["conv_dw_b"] * bn_s + bn["b"] - bn["m"] * bn_s       # (D,)

    # Attention weights: split QKV, stack per head, fold Wo into V, fold biases.
    wq = bp["attn_wqkv"][:, :D]
    wk = bp["attn_wqkv"][:, D:2 * D]
    wv = bp["attn_wqkv"][:, 2 * D:]
    bq = bp["attn_bqkv"][:D]
    bk = bp["attn_bqkv"][D:2 * D]
    bv = bp["attn_bqkv"][2 * D:]
    wo = bp["attn_wo"]
    wq3 = wq.reshape(D, H, dh).transpose(1, 0, 2)                    # (H, D, dh)
    wk3 = wk.reshape(D, H, dh).transpose(1, 0, 2)                    # (H, D, dh)
    wv3 = wv.reshape(D, H, dh).transpose(1, 0, 2)                    # (H, D, dh)
    wo3 = wo.reshape(H, dh, D)                                       # (H, dh, D)
    wvo3 = jnp.einsum('hde,hef->hdf', wv3, wo3)                      # (H, D, D)
    bq3 = bq.reshape(H, 1, dh).astype(jnp.float32)
    bk3 = bk.reshape(H, 1, dh).astype(jnp.float32)
    attn_b = bp["attn_bo"] + jnp.einsum('he,hed->d', bv.reshape(H, dh), wo3)

    ln_g = jnp.stack([bp["ffn1_ln_g"], bp["attn_ln_g"], bp["conv_ln_g"],
                      bp["ffn2_ln_g"], bp["out_ln_g"]]).astype(jnp.float32)
    ln_b = jnp.stack([bp["ffn1_ln_b"], bp["attn_ln_b"], bp["conv_ln_b"],
                      bp["ffn2_ln_b"], bp["out_ln_b"]]).astype(jnp.float32)

    operands = [
        x.reshape(B * T, D),
        ln_g, ln_b,
        bf(bp["ffn1_w1"]), row(bp["ffn1_b1"]), bf(bp["ffn1_w2"]), row(bp["ffn1_b2"]),
        bf(wq3), bq3, bf(wk3), bk3, bf(wvo3), row(attn_b),
        bf(bp["conv_pw1_w"]), row(bp["conv_pw1_b"]),
        dw_w, row(conv_b),
        bf(bp["conv_pw2_w"]), row(bp["conv_pw2_b"]),
        bf(bp["ffn2_w1"]), row(bp["ffn2_b1"]), bf(bp["ffn2_w2"]), row(bp["ffn2_b2"]),
    ]

    def bcast_spec(arr):
        nd = arr.ndim
        return pl.BlockSpec(arr.shape, lambda b, _nd=nd: (0,) * _nd)

    in_specs = ([pl.BlockSpec((T, D), lambda b: (b, 0))]
                + [bcast_spec(a) for a in operands[1:]])

    out = pl.pallas_call(
        functools.partial(_conformer_block_kernel,
                          num_heads=H,
                          res_factor=cfg["ff_residual_factor"],
                          dw_taps=cfg["kernel_size"], eps=eps),
        out_shape=jax.ShapeDtypeStruct((B * T, D), jnp.float32),
        grid=(B,),
        in_specs=in_specs,
        out_specs=pl.BlockSpec((T, D), lambda b: (b, 0)),
        compiler_params=pltpu.CompilerParams(dimension_semantics=("parallel",)),
    )(*operands)
    return out.reshape(B, T, D)


# ----------------------------------------------------------------------------
# JAX glue: BN folding, im2col (front-end convs), param init
# ----------------------------------------------------------------------------

def fold_bn(w, b, bn, eps=1e-5):
    s = bn["g"] / jnp.sqrt(bn["v"] + eps)
    w_f = w * s.reshape((-1,) + (1,) * (w.ndim - 1))
    b_f = s * (b - bn["m"]) + bn["b"]
    return w_f, b_f


# TODO(synk): im2col window extraction stays in XLA glue; for large inputs this
#             should become an in-kernel DMA gather (memory_space=pl.ANY) or
#             lax.conv_general_dilated to avoid the kt*kh*kw-fold replication.
def im2col3d(xp, kt, kh, kw, st, sh, sw):
    N, C, Tp, Hp, Wp = xp.shape
    To = (Tp - kt) // st + 1
    Ho = (Hp - kh) // sh + 1
    Wo = (Wp - kw) // sw + 1
    cols = []
    for dt in range(kt):
        for dh in range(kh):
            for dw in range(kw):
                cols.append(xp[:, :,
                               dt:dt + st * (To - 1) + 1:st,
                               dh:dh + sh * (Ho - 1) + 1:sh,
                               dw:dw + sw * (Wo - 1) + 1:sw])
    p = jnp.stack(cols, axis=2)                    # (N, C, kt*kh*kw, To, Ho, Wo)
    p = p.transpose(0, 3, 4, 5, 1, 2).reshape(N * To * Ho * Wo, C * kt * kh * kw)
    return p, To, Ho, Wo


def im2col2d(x, kh, kw, sh, sw, ph, pw):
    xp = jnp.pad(x, ((0, 0), (0, 0), (ph, ph), (pw, pw)))
    N, C, Hp, Wp = xp.shape
    Ho = (Hp - kh) // sh + 1
    Wo = (Wp - kw) // sw + 1
    cols = []
    for dh in range(kh):
        for dw in range(kw):
            cols.append(xp[:, :,
                           dh:dh + sh * (Ho - 1) + 1:sh,
                           dw:dw + sw * (Wo - 1) + 1:sw])
    p = jnp.stack(cols, axis=2)                    # (N, C, kh*kw, Ho, Wo)
    p = p.transpose(0, 3, 4, 1, 2).reshape(N * Ho * Wo, C * kh * kw)
    return p, Ho, Wo


def conv2d_bias_act(x, w, b, stride, padding, activation):
    Cout, Cin, kh, kw = w.shape
    cols, Ho, Wo = im2col2d(x, kh, kw, stride, stride, padding, padding)
    out = matmul_bias(cols, w.reshape(Cout, -1).T, b, activation=activation)
    N = x.shape[0]
    return out.reshape(N, Ho, Wo, Cout).transpose(0, 3, 1, 2)


class ParamInit:
    def __init__(self, key):
        self.key = key
        self.count = 0

    def __call__(self, shape, scale=0.05):
        self.count += 1
        k = jax.random.fold_in(self.key, self.count)
        return scale * jax.random.normal(k, shape, dtype=jnp.float32)


def bn_params(init, C):
    return dict(
        g=jnp.ones((C,), jnp.float32) + init((C,), scale=0.05),
        b=init((C,), scale=0.05),
        m=init((C,), scale=0.05),
        v=jnp.ones((C,), jnp.float32),
    )


def init_block(init, D, FF, K):
    return dict(
        ffn1_ln_g=jnp.ones((D,)), ffn1_ln_b=jnp.zeros((D,)),
        ffn1_w1=init((D, FF * D)), ffn1_b1=init((FF * D,)),
        ffn1_w2=init((FF * D, D)), ffn1_b2=init((D,)),
        attn_ln_g=jnp.ones((D,)), attn_ln_b=jnp.zeros((D,)),
        attn_wqkv=init((D, 3 * D)), attn_bqkv=init((3 * D,)),
        attn_wo=init((D, D)), attn_bo=init((D,)),
        conv_ln_g=jnp.ones((D,)), conv_ln_b=jnp.zeros((D,)),
        conv_pw1_w=init((D, 2 * D)), conv_pw1_b=init((2 * D,)),
        conv_dw_w=init((K, D)), conv_dw_b=init((D,)),
        conv_bn=bn_params(init, D),
        conv_pw2_w=init((D, D)), conv_pw2_b=init((D,)),
        ffn2_ln_g=jnp.ones((D,)), ffn2_ln_b=jnp.zeros((D,)),
        ffn2_w1=init((D, FF * D)), ffn2_b1=init((FF * D,)),
        ffn2_w2=init((FF * D, D)), ffn2_b2=init((D,)),
        out_ln_g=jnp.ones((D,)), out_ln_b=jnp.zeros((D,)),
    )


def init_params(key, cfg):
    init = ParamInit(key)
    D = cfg["dim_model"][-1]
    V = cfg["vocab_size"]
    FF = cfg["ff_expansion_factor"]
    K = cfg["kernel_size"]
    Cin = cfg["video_processing_in_channels"]
    Cvp = cfg["video_processing_out_channels"]
    kt, kh, kw = cfg["video_processing_kernel_size"]
    c_stem, c_blk, c_out = cfg["resnet_layers"]

    return dict(
        vp_conv_w=init((Cvp, Cin, kt, kh, kw), scale=0.1),
        vp_conv_b=init((Cvp,), scale=0.1),
        vp_bn=bn_params(init, Cvp),
        rn_stem_w=init((c_stem, Cvp, 3, 3), scale=0.1), rn_stem_b=init((c_stem,), scale=0.1),
        rn_stem_bn=bn_params(init, c_stem),
        rn_b1c1_w=init((c_blk, c_stem, 3, 3), scale=0.1), rn_b1c1_b=init((c_blk,), scale=0.1),
        rn_b1c1_bn=bn_params(init, c_blk),
        rn_b1c2_w=init((c_blk, c_blk, 3, 3), scale=0.1), rn_b1c2_b=init((c_blk,), scale=0.1),
        rn_b1c2_bn=bn_params(init, c_blk),
        rn_down_w=init((c_out, c_blk, 3, 3), scale=0.1), rn_down_b=init((c_out,), scale=0.1),
        rn_down_bn=bn_params(init, c_out),
        pos_emb=init((cfg["max_seq_len"], D)),
        blocks=[init_block(init, D, FF, K) for _ in range(cfg["num_blocks"])],
        interctc_w=init((D, V)), interctc_b=init((V,)),
        head_w=init((D, V)), head_b=init((V,)),
    )


# ----------------------------------------------------------------------------
# Model forward
# ----------------------------------------------------------------------------

def resnet_forward(params, x):
    # TODO(synk): ResNetFrontEnd layer config is simplified to
    #             stem(s2) -> basic residual block -> downsample(s2) -> GAP.
    w, b = fold_bn(params["rn_stem_w"], params["rn_stem_b"], params["rn_stem_bn"])
    y = conv2d_bias_act(x, w, b, stride=2, padding=1, activation="relu")

    w1, b1 = fold_bn(params["rn_b1c1_w"], params["rn_b1c1_b"], params["rn_b1c1_bn"])
    z = conv2d_bias_act(y, w1, b1, stride=1, padding=1, activation="relu")
    w2, b2 = fold_bn(params["rn_b1c2_w"], params["rn_b1c2_b"], params["rn_b1c2_bn"])
    z = conv2d_bias_act(z, w2, b2, stride=1, padding=1, activation=None)
    y = jnp.maximum(y + z, 0.0)

    w3, b3 = fold_bn(params["rn_down_w"], params["rn_down_b"], params["rn_down_bn"])
    y = conv2d_bias_act(y, w3, b3, stride=2, padding=1, activation="relu")
    return jnp.mean(y, axis=(2, 3))                 # global average pool -> (N, C)


def conformer_forward(params, cfg, x):
    B, T, D = x.shape
    x = x + params["pos_emb"][:T][None]
    interctc = {}
    for blk_idx in range(cfg["num_blocks"]):
        x = conformer_block(params["blocks"][blk_idx], cfg, x)
        if (blk_idx + 1) == cfg["interctc_block"]:
            logits = matmul_bias(x.reshape(B * T, D),
                                 params["interctc_w"], params["interctc_b"])
            interctc[blk_idx + 1] = logits.reshape(B, T, -1)
    return x, interctc


def vec_forward(params, cfg, inp):
    """inp: (B, Cin, T, H, W) float32 video (NCDHW, matching PyTorch)."""
    B = inp.shape[0]
    video_frames = inp.shape[2]
    kt, kh, kw = cfg["video_processing_kernel_size"]
    st, sh, sw = cfg["video_processing_stride"]

    # pre_padding (ConstantPad3d, asymmetric "same" padding)
    xp = jnp.pad(inp, ((0, 0), (0, 0),
                       ((kt - 1) // 2, kt // 2),
                       ((kh - 1) // 2, kh // 2),
                       ((kw - 1) // 2, kw // 2)))

    # video_preprocessor: Conv3d + BN3d + ReLU (BN folded) via im2col + Pallas matmul
    w, b = fold_bn(params["vp_conv_w"], params["vp_conv_b"], params["vp_bn"])
    Cvp = w.shape[0]
    cols, To, Ho, Wo = im2col3d(xp, kt, kh, kw, st, sh, sw)
    y = matmul_bias(cols, w.reshape(Cvp, -1).T, b, activation="relu")
    y = y.reshape(B, To, Ho, Wo, Cvp).transpose(0, 4, 1, 2, 3)   # (B, C, T, H, W)
    assert To == video_frames, "temporal stride must preserve frame count here"

    # video_to_image: (B, C, T, H, W) -> (B*T, C, H, W)
    y = y.transpose(0, 2, 1, 3, 4).reshape(B * To, Cvp, Ho, Wo)

    # ResNet front-end -> per-frame feature vector (B*T, D)
    feat = resnet_forward(params, y)

    # unsqueeze + image_to_video + squeeze + transpose == (B*T, D) -> (B, T, D)
    seq = feat.reshape(B, video_frames, feat.shape[-1])

    # Conformer + head
    seq, interctc = conformer_forward(params, cfg, seq)
    Bt, T, D = seq.shape
    logits = matmul_bias(seq.reshape(Bt * T, D), params["head_w"], params["head_b"])
    logits = logits.reshape(Bt, T, -1)
    return logits, interctc


# ----------------------------------------------------------------------------
# Main
# ----------------------------------------------------------------------------

if __name__ == "__main__":
    CFG = dict(
        video_processing_in_channels=1,
        video_processing_out_channels=8,
        video_processing_kernel_size=(3, 3, 3),
        video_processing_stride=(1, 2, 2),
        resnet_layers=(16, 16, 32),
        vocab_size=16,
        dim_model=(32,),
        num_blocks=2,
        interctc_block=1,
        max_seq_len=64,
        ff_expansion_factor=4,
        ff_residual_factor=0.5,
        num_heads=4,
        kernel_size=7,
        conv_expansion_factor=2,
        ff_dropout=0.0, attn_dropout=0.0, conv_dropout=0.0,  # eval: dropout = identity
    )

    key = jax.random.PRNGKey(0)
    params = init_params(key, CFG)

    # input video: (B=2, Cin=1, frames=8, H=16, W=16)
    x = jax.random.normal(jax.random.fold_in(key, 12345),
                          (2, 1, 8, 16, 16), dtype=jnp.float32)

    fwd = jax.jit(lambda p, inp: vec_forward(p, CFG, inp))
    logits, interctc = fwd(params, x)
    jax.block_until_ready(logits)
    for v in interctc.values():
        jax.block_until_ready(v)

    assert logits.shape == (2, 8, CFG["vocab_size"]), logits.shape
    assert interctc[CFG["interctc_block"]].shape == (2, 8, CFG["vocab_size"])
    print("KERNEL_OK")
</pallas_src>

<mosaic_0001>
module attributes {stable_mosaic.version = 11 : i64} {
  func.func @_mm_bias_kernel(%arg0: i32, %arg1: memref<512x27xbf16, #tpu.memory_space<vmem>>, %arg2: memref<27x128xbf16, #tpu.memory_space<vmem>>, %arg3: memref<1x128xf32, #tpu.memory_space<vmem>>, %arg4: memref<512x128xf32, #tpu.memory_space<vmem>>) attributes {dimension_semantics = [#tpu.dimension_semantics<parallel>], iteration_bounds = array<i64: 2>, scalar_prefetch = 0 : i64, scratch_operands = 0 : i64, tpu.core_type = #tpu.core_type<tc>, window_params = [{transform_indices = @transform_0, window_bounds = array<i64: 512, 27>}, {pipeline_mode = #tpu.pipeline_mode<synchronous>, transform_indices = @transform_1, window_bounds = array<i64: 27, 128>}, {pipeline_mode = #tpu.pipeline_mode<synchronous>, transform_indices = @transform_2, window_bounds = array<i64: 1, 128>}, {transform_indices = @transform_3, window_bounds = array<i64: 512, 128>}]} {
    %c0 = arith.constant 0 : index
    %c0_0 = arith.constant 0 : index
    %0 = vector.load %arg1[%c0, %c0_0] : memref<512x27xbf16, #tpu.memory_space<vmem>>, vector<512x27xbf16>
    %c0_1 = arith.constant 0 : index
    %c0_2 = arith.constant 0 : index
    %1 = vector.load %arg2[%c0_1, %c0_2] : memref<27x128xbf16, #tpu.memory_space<vmem>>, vector<27x128xbf16>
    %cst = arith.constant dense<0.000000e+00> : vector<512x128xf32>
    %2 = tpu.matmul %0, %1, %cst {dimension_numbers = #tpu.dot_dimension_numbers<[1], [0], [0], [1], [0, 0, 1, 1], [], []>} : vector<512x27xbf16>, vector<27x128xbf16>, vector<512x128xf32> -> vector<512x128xf32>
    %c0_3 = arith.constant 0 : index
    %c0_4 = arith.constant 0 : index
    %3 = vector.load %arg3[%c0_3, %c0_4] : memref<1x128xf32, #tpu.memory_space<vmem>>, vector<1x128xf32>
    %4 = vector.broadcast %3 : vector<1x128xf32> to vector<512x128xf32>
    %5 = arith.addf %2, %4 : vector<512x128xf32>
    %cst_5 = arith.constant 0.000000e+00 : f32
    %6 = vector.broadcast %cst_5 : f32 to vector<512x128xf32>
    %7 = arith.maximumf %5, %6 : vector<512x128xf32>
    %c0_6 = arith.constant 0 : index
    %c0_7 = arith.constant 0 : index
    %8 = vector.load %arg4[%c0_6, %c0_7] : memref<512x128xf32, #tpu.memory_space<vmem>>, vector<512x128xf32>
    tpu.vector_store %arg4[%c0_6, %c0_7], %7 {strides = array<i32>} : memref<512x128xf32, #tpu.memory_space<vmem>>, vector<512x128xf32>,
    return
  }
  func.func @transform_0(%arg0: i32) -> (i32, i32) {
    %c0_i32 = arith.constant 0 : i32
    %c0_i32_0 = arith.constant 0 : i32
    return %arg0, %c0_i32 : i32, i32
  }
  func.func @transform_1(%arg0: i32) -> (i32, i32) {
    %c0_i32 = arith.constant 0 : i32
    %c0_i32_0 = arith.constant 0 : i32
    %c0_i32_1 = arith.constant 0 : i32
    return %c0_i32, %c0_i32_0 : i32, i32
  }
  func.func @transform_2(%arg0: i32) -> (i32, i32) {
    %c0_i32 = arith.constant 0 : i32
    %c0_i32_0 = arith.constant 0 : i32
    %c0_i32_1 = arith.constant 0 : i32
    return %c0_i32, %c0_i32_0 : i32, i32
  }
  func.func @transform_3(%arg0: i32) -> (i32, i32) {
    %c0_i32 = arith.constant 0 : i32
    %c0_i32_0 = arith.constant 0 : i32
    return %arg0, %c0_i32 : i32, i32
  }
}

module attributes {stable_mosaic.version = 11 : i64} {
  func.func @_mm_bias_kernel(%arg0: i32, %arg1: memref<256x72xbf16, #tpu.memory_space<vmem>>, %arg2: memref<72x128xbf16, #tpu.memory_space<vmem>>, %arg3: memref<1x128xf32, #tpu.memory_space<vmem>>, %arg4: memref<256x128xf32, #tpu.memory_space<vmem>>) attributes {dimension_semantics = [#tpu.dimension_semantics<parallel>], iteration_bounds = array<i64: 1>, scalar_prefetch = 0 : i64, scratch_operands = 0 : i64, tpu.core_type = #tpu.core_type<tc>, window_params = [{transform_indices = @transform_0, window_bounds = array<i64: 256, 72>}, {pipeline_mode = #tpu.pipeline_mode<synchronous>, transform_indices = @transform_1, window_bounds = array<i64: 72, 128>}, {pipeline_mode = #tpu.pipeline_mode<synchronous>, transform_indices = @transform_2, window_bounds = array<i64: 1, 128>}, {transform_indices = @transform_3, window_bounds = array<i64: 256, 128>}]} {
    %c0 = arith.constant 0 : index
    %c0_0 = arith.constant 0 : index
    %0 = vector.load %arg1[%c0, %c0_0] : memref<256x72xbf16, #tpu.memory_space<vmem>>, vector<256x72xbf16>
    %c0_1 = arith.constant 0 : index
    %c0_2 = arith.constant 0 : index
    %1 = vector.load %arg2[%c0_1, %c0_2] : memref<72x128xbf16, #tpu.memory_space<vmem>>, vector<72x128xbf16>
    %cst = arith.constant dense<0.000000e+00> : vector<256x128xf32>
    %2 = tpu.matmul %0, %1, %cst {dimension_numbers = #tpu.dot_dimension_numbers<[1], [0], [0], [1], [0, 0, 1, 1], [], []>} : vector<256x72xbf16>, vector<72x128xbf16>, vector<256x128xf32> -> vector<256x128xf32>
    %c0_3 = arith.constant 0 : index
    %c0_4 = arith.constant 0 : index
    %3 = vector.load %arg3[%c0_3, %c0_4] : memref<1x128xf32, #tpu.memory_space<vmem>>, vector<1x128xf32>
    %4 = vector.broadcast %3 : vector<1x128xf32> to vector<256x128xf32>
    %5 = arith.addf %2, %4 : vector<256x128xf32>
    %cst_5 = arith.constant 0.000000e+00 : f32
    %6 = vector.broadcast %cst_5 : f32 to vector<256x128xf32>
    %7 = arith.maximumf %5, %6 : vector<256x128xf32>
    %c0_6 = arith.constant 0 : index
    %c0_7 = arith.constant 0 : index
    %8 = vector.load %arg4[%c0_6, %c0_7] : memref<256x128xf32, #tpu.memory_space<vmem>>, vector<256x128xf32>
    tpu.vector_store %arg4[%c0_6, %c0_7], %7 {strides = array<i32>} : memref<256x128xf32, #tpu.memory_space<vmem>>, vector<256x128xf32>,
    return
  }
  func.func @transform_0(%arg0: i32) -> (i32, i32) {
    %c0_i32 = arith.constant 0 : i32
    %c0_i32_0 = arith.constant 0 : i32
    return %arg0, %c0_i32 : i32, i32
  }
  func.func @transform_1(%arg0: i32) -> (i32, i32) {
    %c0_i32 = arith.constant 0 : i32
    %c0_i32_0 = arith.constant 0 : i32
    %c0_i32_1 = arith.constant 0 : i32
    return %c0_i32, %c0_i32_0 : i32, i32
  }
  func.func @transform_2(%arg0: i32) -> (i32, i32) {
    %c0_i32 = arith.constant 0 : i32
    %c0_i32_0 = arith.constant 0 : i32
    %c0_i32_1 = arith.constant 0 : i32
    return %c0_i32, %c0_i32_0 : i32, i32
  }
  func.func @transform_3(%arg0: i32) -> (i32, i32) {
    %c0_i32 = arith.constant 0 : i32
    %c0_i32_0 = arith.constant 0 : i32
    return %arg0, %c0_i32 : i32, i32
  }
}

module attributes {stable_mosaic.version = 11 : i64} {
  func.func @_mm_bias_kernel(%arg0: i32, %arg1: memref<256x144xbf16, #tpu.memory_space<vmem>>, %arg2: memref<144x128xbf16, #tpu.memory_space<vmem>>, %arg3: memref<1x128xf32, #tpu.memory_space<vmem>>, %arg4: memref<256x128xf32, #tpu.memory_space<vmem>>) attributes {dimension_semantics = [#tpu.dimension_semantics<parallel>], iteration_bounds = array<i64: 1>, scalar_prefetch = 0 : i64, scratch_operands = 0 : i64, tpu.core_type = #tpu.core_type<tc>, window_params = [{transform_indices = @transform_0, window_bounds = array<i64: 256, 144>}, {pipeline_mode = #tpu.pipeline_mode<synchronous>, transform_indices = @transform_1, window_bounds = array<i64: 144, 128>}, {pipeline_mode = #tpu.pipeline_mode<synchronous>, transform_indices = @transform_2, window_bounds = array<i64: 1, 128>}, {transform_indices = @transform_3, window_bounds = array<i64: 256, 128>}]} {
    %c0 = arith.constant 0 : index
    %c0_0 = arith.constant 0 : index
    %0 = vector.load %arg1[%c0, %c0_0] : memref<256x144xbf16, #tpu.memory_space<vmem>>, vector<256x144xbf16>
    %c0_1 = arith.constant 0 : index
    %c0_2 = arith.constant 0 : index
    %1 = vector.load %arg2[%c0_1, %c0_2] : memref<144x128xbf16, #tpu.memory_space<vmem>>, vector<144x128xbf16>
    %cst = arith.constant dense<0.000000e+00> : vector<256x128xf32>
    %2 = tpu.matmul %0, %1, %cst {dimension_numbers = #tpu.dot_dimension_numbers<[1], [0], [0], [1], [0, 0, 1, 1], [], []>} : vector<256x144xbf16>, vector<144x128xbf16>, vector<256x128xf32> -> vector<256x128xf32>
    %c0_3 = arith.constant 0 : index
    %c0_4 = arith.constant 0 : index
    %3 = vector.load %arg3[%c0_3, %c0_4] : memref<1x128xf32, #tpu.memory_space<vmem>>, vector<1x128xf32>
    %4 = vector.broadcast %3 : vector<1x128xf32> to vector<256x128xf32>
    %5 = arith.addf %2, %4 : vector<256x128xf32>
    %cst_5 = arith.constant 0.000000e+00 : f32
    %6 = vector.broadcast %cst_5 : f32 to vector<256x128xf32>
    %7 = arith.maximumf %5, %6 : vector<256x128xf32>
    %c0_6 = arith.constant 0 : index
    %c0_7 = arith.constant 0 : index
    %8 = vector.load %arg4[%c0_6, %c0_7] : memref<256x128xf32, #tpu.memory_space<vmem>>, vector<256x128xf32>
    tpu.vector_store %arg4[%c0_6, %c0_7], %7 {strides = array<i32>} : memref<256x128xf32, #tpu.memory_space<vmem>>, vector<256x128xf32>,
    return
  }
  func.func @transform_0(%arg0: i32) -> (i32, i32) {
    %c0_i32 = arith.constant 0 : i32
    %c0_i32_0 = arith.constant 0 : i32
    return %arg0, %c0_i32 : i32, i32
  }
  func.func @transform_1(%arg0: i32) -> (i32, i32) {
    %c0_i32 = arith.constant 0 : i32
    %c0_i32_0 = arith.constant 0 : i32
    %c0_i32_1 = arith.constant 0 : i32
    return %c0_i32, %c0_i32_0 : i32, i32
  }
  func.func @transform_2(%arg0: i32) -> (i32, i32) {
    %c0_i32 = arith.constant 0 : i32
    %c0_i32_0 = arith.constant 0 : i32
    %c0_i32_1 = arith.constant 0 : i32
    return %c0_i32, %c0_i32_0 : i32, i32
  }
  func.func @transform_3(%arg0: i32) -> (i32, i32) {
    %c0_i32 = arith.constant 0 : i32
    %c0_i32_0 = arith.constant 0 : i32
    return %arg0, %c0_i32 : i32, i32
  }
}

module attributes {stable_mosaic.version = 11 : i64} {
  func.func @_mm_bias_kernel(%arg0: i32, %arg1: memref<256x144xbf16, #tpu.memory_space<vmem>>, %arg2: memref<144x128xbf16, #tpu.memory_space<vmem>>, %arg3: memref<1x128xf32, #tpu.memory_space<vmem>>, %arg4: memref<256x128xf32, #tpu.memory_space<vmem>>) attributes {dimension_semantics = [#tpu.dimension_semantics<parallel>], iteration_bounds = array<i64: 1>, scalar_prefetch = 0 : i64, scratch_operands = 0 : i64, tpu.core_type = #tpu.core_type<tc>, window_params = [{transform_indices = @transform_0, window_bounds = array<i64: 256, 144>}, {pipeline_mode = #tpu.pipeline_mode<synchronous>, transform_indices = @transform_1, window_bounds = array<i64: 144, 128>}, {pipeline_mode = #tpu.pipeline_mode<synchronous>, transform_indices = @transform_2, window_bounds = array<i64: 1, 128>}, {transform_indices = @transform_3, window_bounds = array<i64: 256, 128>}]} {
    %c0 = arith.constant 0 : index
    %c0_0 = arith.constant 0 : index
    %0 = vector.load %arg1[%c0, %c0_0] : memref<256x144xbf16, #tpu.memory_space<vmem>>, vector<256x144xbf16>
    %c0_1 = arith.constant 0 : index
    %c0_2 = arith.constant 0 : index
    %1 = vector.load %arg2[%c0_1, %c0_2] : memref<144x128xbf16, #tpu.memory_space<vmem>>, vector<144x128xbf16>
    %cst = arith.constant dense<0.000000e+00> : vector<256x128xf32>
    %2 = tpu.matmul %0, %1, %cst {dimension_numbers = #tpu.dot_dimension_numbers<[1], [0], [0], [1], [0, 0, 1, 1], [], []>} : vector<256x144xbf16>, vector<144x128xbf16>, vector<256x128xf32> -> vector<256x128xf32>
    %c0_3 = arith.constant 0 : index
    %c0_4 = arith.constant 0 : index
    %3 = vector.load %arg3[%c0_3, %c0_4] : memref<1x128xf32, #tpu.memory_space<vmem>>, vector<1x128xf32>
    %4 = vector.broadcast %3 : vector<1x128xf32> to vector<256x128xf32>
    %5 = arith.addf %2, %4 : vector<256x128xf32>
    %c0_5 = arith.constant 0 : index
    %c0_6 = arith.constant 0 : index
    %6 = vector.load %arg4[%c0_5, %c0_6] : memref<256x128xf32, #tpu.memory_space<vmem>>, vector<256x128xf32>
    tpu.vector_store %arg4[%c0_5, %c0_6], %5 {strides = array<i32>} : memref<256x128xf32, #tpu.memory_space<vmem>>, vector<256x128xf32>,
    return
  }
  func.func @transform_0(%arg0: i32) -> (i32, i32) {
    %c0_i32 = arith.constant 0 : i32
    %c0_i32_0 = arith.constant 0 : i32
    return %arg0, %c0_i32 : i32, i32
  }
  func.func @transform_1(%arg0: i32) -> (i32, i32) {
    %c0_i32 = arith.constant 0 : i32
    %c0_i32_0 = arith.constant 0 : i32
    %c0_i32_1 = arith.constant 0 : i32
    return %c0_i32, %c0_i32_0 : i32, i32
  }
  func.func @transform_2(%arg0: i32) -> (i32, i32) {
    %c0_i32 = arith.constant 0 : i32
    %c0_i32_0 = arith.constant 0 : i32
    %c0_i32_1 = arith.constant 0 : i32
    return %c0_i32, %c0_i32_0 : i32, i32
  }
  func.func @transform_3(%arg0: i32) -> (i32, i32) {
    %c0_i32 = arith.constant 0 : i32
    %c0_i32_0 = arith.constant 0 : i32
    return %arg0, %c0_i32 : i32, i32
  }
}

module attributes {stable_mosaic.version = 11 : i64} {
  func.func @_mm_bias_kernel(%arg0: i32, %arg1: memref<64x144xbf16, #tpu.memory_space<vmem>>, %arg2: memref<144x128xbf16, #tpu.memory_space<vmem>>, %arg3: memref<1x128xf32, #tpu.memory_space<vmem>>, %arg4: memref<64x128xf32, #tpu.memory_space<vmem>>) attributes {dimension_semantics = [#tpu.dimension_semantics<parallel>], iteration_bounds = array<i64: 1>, scalar_prefetch = 0 : i64, scratch_operands = 0 : i64, tpu.core_type = #tpu.core_type<tc>, window_params = [{transform_indices = @transform_0, window_bounds = array<i64: 64, 144>}, {pipeline_mode = #tpu.pipeline_mode<synchronous>, transform_indices = @transform_1, window_bounds = array<i64: 144, 128>}, {pipeline_mode = #tpu.pipeline_mode<synchronous>, transform_indices = @transform_2, window_bounds = array<i64: 1, 128>}, {transform_indices = @transform_3, window_bounds = array<i64: 64, 128>}]} {
    %c0 = arith.constant 0 : index
    %c0_0 = arith.constant 0 : index
    %0 = vector.load %arg1[%c0, %c0_0] : memref<64x144xbf16, #tpu.memory_space<vmem>>, vector<64x144xbf16>
    %c0_1 = arith.constant 0 : index
    %c0_2 = arith.constant 0 : index
    %1 = vector.load %arg2[%c0_1, %c0_2] : memref<144x128xbf16, #tpu.memory_space<vmem>>, vector<144x128xbf16>
    %cst = arith.constant dense<0.000000e+00> : vector<64x128xf32>
    %2 = tpu.matmul %0, %1, %cst {dimension_numbers = #tpu.dot_dimension_numbers<[1], [0], [0], [1], [0, 0, 1, 1], [], []>} : vector<64x144xbf16>, vector<144x128xbf16>, vector<64x128xf32> -> vector<64x128xf32>
    %c0_3 = arith.constant 0 : index
    %c0_4 = arith.constant 0 : index
    %3 = vector.load %arg3[%c0_3, %c0_4] : memref<1x128xf32, #tpu.memory_space<vmem>>, vector<1x128xf32>
    %4 = vector.broadcast %3 : vector<1x128xf32> to vector<64x128xf32>
    %5 = arith.addf %2, %4 : vector<64x128xf32>
    %cst_5 = arith.constant 0.000000e+00 : f32
    %6 = vector.broadcast %cst_5 : f32 to vector<64x128xf32>
    %7 = arith.maximumf %5, %6 : vector<64x128xf32>
    %c0_6 = arith.constant 0 : index
    %c0_7 = arith.constant 0 : index
    %8 = vector.load %arg4[%c0_6, %c0_7] : memref<64x128xf32, #tpu.memory_space<vmem>>, vector<64x128xf32>
    tpu.vector_store %arg4[%c0_6, %c0_7], %7 {strides = array<i32>} : memref<64x128xf32, #tpu.memory_space<vmem>>, vector<64x128xf32>,
    return
  }
  func.func @transform_0(%arg0: i32) -> (i32, i32) {
    %c0_i32 = arith.constant 0 : i32
    %c0_i32_0 = arith.constant 0 : i32
    return %arg0, %c0_i32 : i32, i32
  }
  func.func @transform_1(%arg0: i32) -> (i32, i32) {
    %c0_i32 = arith.constant 0 : i32
    %c0_i32_0 = arith.constant 0 : i32
    %c0_i32_1 = arith.constant 0 : i32
    return %c0_i32, %c0_i32_0 : i32, i32
  }
  func.func @transform_2(%arg0: i32) -> (i32, i32) {
    %c0_i32 = arith.constant 0 : i32
    %c0_i32_0 = arith.constant 0 : i32
    %c0_i32_1 = arith.constant 0 : i32
    return %c0_i32, %c0_i32_0 : i32, i32
  }
  func.func @transform_3(%arg0: i32) -> (i32, i32) {
    %c0_i32 = arith.constant 0 : i32
    %c0_i32_0 = arith.constant 0 : i32
    return %arg0, %c0_i32 : i32, i32
  }
}

module attributes {stable_mosaic.version = 11 : i64} {
  func.func @_mm_bias_kernel(%arg0: i32, %arg1: memref<16x32xbf16, #tpu.memory_space<vmem>>, %arg2: memref<32x128xbf16, #tpu.memory_space<vmem>>, %arg3: memref<1x128xf32, #tpu.memory_space<vmem>>, %arg4: memref<16x128xf32, #tpu.memory_space<vmem>>) attributes {dimension_semantics = [#tpu.dimension_semantics<parallel>], iteration_bounds = array<i64: 1>, scalar_prefetch = 0 : i64, scratch_operands = 0 : i64, tpu.core_type = #tpu.core_type<tc>, window_params = [{transform_indices = @transform_0, window_bounds = array<i64: 16, 32>}, {pipeline_mode = #tpu.pipeline_mode<synchronous>, transform_indices = @transform_1, window_bounds = array<i64: 32, 128>}, {pipeline_mode = #tpu.pipeline_mode<synchronous>, transform_indices = @transform_2, window_bounds = array<i64: 1, 128>}, {transform_indices = @transform_3, window_bounds = array<i64: 16, 128>}]} {
    %c0 = arith.constant 0 : index
    %c0_0 = arith.constant 0 : index
    %0 = vector.load %arg1[%c0, %c0_0] : memref<16x32xbf16, #tpu.memory_space<vmem>>, vector<16x32xbf16>
    %c0_1 = arith.constant 0 : index
    %c0_2 = arith.constant 0 : index
    %1 = vector.load %arg2[%c0_1, %c0_2] : memref<32x128xbf16, #tpu.memory_space<vmem>>, vector<32x128xbf16>
    %cst = arith.constant dense<0.000000e+00> : vector<16x128xf32>
    %2 = tpu.matmul %0, %1, %cst {dimension_numbers = #tpu.dot_dimension_numbers<[1], [0], [0], [1], [0, 0, 1, 1], [], []>} : vector<16x32xbf16>, vector<32x128xbf16>, vector<16x128xf32> -> vector<16x128xf32>
    %c0_3 = arith.constant 0 : index
    %c0_4 = arith.constant 0 : index
    %3 = vector.load %arg3[%c0_3, %c0_4] : memref<1x128xf32, #tpu.memory_space<vmem>>, vector<1x128xf32>
    %4 = vector.broadcast %3 : vector<1x128xf32> to vector<16x128xf32>
    %5 = arith.addf %2, %4 : vector<16x128xf32>
    %c0_5 = arith.constant 0 : index
    %c0_6 = arith.constant 0 : index
    %6 = vector.load %arg4[%c0_5, %c0_6] : memref<16x128xf32, #tpu.memory_space<vmem>>, vector<16x128xf32>
    tpu.vector_store %arg4[%c0_5, %c0_6], %5 {strides = array<i32>} : memref<16x128xf32, #tpu.memory_space<vmem>>, vector<16x128xf32>,
    return
  }
  func.func @transform_0(%arg0: i32) -> (i32, i32) {
    %c0_i32 = arith.constant 0 : i32
    %c0_i32_0 = arith.constant 0 : i32
    return %arg0, %c0_i32 : i32, i32
  }
  func.func @transform_1(%arg0: i32) -> (i32, i32) {
    %c0_i32 = arith.constant 0 : i32
    %c0_i32_0 = arith.constant 0 : i32
    %c0_i32_1 = arith.constant 0 : i32
    return %c0_i32, %c0_i32_0 : i32, i32
  }
  func.func @transform_2(%arg0: i32) -> (i32, i32) {
    %c0_i32 = arith.constant 0 : i32
    %c0_i32_0 = arith.constant 0 : i32
    %c0_i32_1 = arith.constant 0 : i32
    return %c0_i32, %c0_i32_0 : i32, i32
  }
  func.func @transform_3(%arg0: i32) -> (i32, i32) {
    %c0_i32 = arith.constant 0 : i32
    %c0_i32_0 = arith.constant 0 : i32
    return %arg0, %c0_i32 : i32, i32
  }
}

module attributes {stable_mosaic.version = 11 : i64} {
  func.func @_conformer_block_kernel(%arg0: i32, %arg1: memref<8x32xf32, #tpu.memory_space<vmem>>, %arg2: memref<5x32xf32, #tpu.memory_space<vmem>>, %arg3: memref<5x32xf32, #tpu.memory_space<vmem>>, %arg4: memref<32x128xbf16, #tpu.memory_space<vmem>>, %arg5: memref<1x128xf32, #tpu.memory_space<vmem>>, %arg6: memref<128x32xbf16, #tpu.memory_space<vmem>>, %arg7: memref<1x32xf32, #tpu.memory_space<vmem>>, %arg8: memref<4x32x8xbf16, #tpu.memory_space<vmem>>, %arg9: memref<4x1x8xf32, #tpu.memory_space<vmem>>, %arg10: memref<4x32x8xbf16, #tpu.memory_space<vmem>>, %arg11: memref<4x1x8xf32, #tpu.memory_space<vmem>>, %arg12: memref<4x32x32xbf16, #tpu.memory_space<vmem>>, %arg13: memref<1x32xf32, #tpu.memory_space<vmem>>, %arg14: memref<32x64xbf16, #tpu.memory_space<vmem>>, %arg15: memref<1x64xf32, #tpu.memory_space<vmem>>, %arg16: memref<7x32xf32, #tpu.memory_space<vmem>>, %arg17: memref<1x32xf32, #tpu.memory_space<vmem>>, %arg18: memref<32x32xbf16, #tpu.memory_space<vmem>>, %arg19: memref<1x32xf32, #tpu.memory_space<vmem>>, %arg20: memref<32x128xbf16, #tpu.memory_space<vmem>>, %arg21: memref<1x128xf32, #tpu.memory_space<vmem>>, %arg22: memref<128x32xbf16, #tpu.memory_space<vmem>>, %arg23: memref<1x32xf32, #tpu.memory_space<vmem>>, %arg24: memref<8x32xf32, #tpu.memory_space<vmem>>) attributes {dimension_semantics = [#tpu.dimension_semantics<parallel>], iteration_bounds = array<i64: 2>, scalar_prefetch = 0 : i64, scratch_operands = 0 : i64, tpu.core_type = #tpu.core_type<tc>, window_params = [{transform_indices = @transform_0, window_bounds = array<i64: 8, 32>}, {pipeline_mode = #tpu.pipeline_mode<synchronous>, transform_indices = @transform_1, window_bounds = array<i64: 5, 32>}, {pipeline_mode = #tpu.pipeline_mode<synchronous>, transform_indices = @transform_2, window_bounds = array<i64: 5, 32>}, {pipeline_mode = #tpu.pipeline_mode<synchronous>, transform_indices = @transform_3, window_bounds = array<i64: 32, 128>}, {pipeline_mode = #tpu.pipeline_mode<synchronous>, transform_indices = @transform_4, window_bounds = array<i64: 1, 128>}, {pipeline_mode = #tpu.pipeline_mode<synchronous>, transform_indices = @transform_5, window_bounds = array<i64: 128, 32>}, {pipeline_mode = #tpu.pipeline_mode<synchronous>, transform_indices = @transform_6, window_bounds = array<i64: 1, 32>}, {pipeline_mode = #tpu.pipeline_mode<synchronous>, transform_indices = @transform_7, window_bounds = array<i64: 4, 32, 8>}, {pipeline_mode = #tpu.pipeline_mode<synchronous>, transform_indices = @transform_8, window_bounds = array<i64: 4, 1, 8>}, {pipeline_mode = #tpu.pipeline_mode<synchronous>, transform_indices = @transform_9, window_bounds = array<i64: 4, 32, 8>}, {pipeline_mode = #tpu.pipeline_mode<synchronous>, transform_indices = @transform_10, window_bounds = array<i64: 4, 1, 8>}, {pipeline_mode = #tpu.pipeline_mode<synchronous>, transform_indices = @transform_11, window_bounds = array<i64: 4, 32, 32>}, {pipeline_mode = #tpu.pipeline_mode<synchronous>, transform_indices = @transform_12, window_bounds = array<i64: 1, 32>}, {pipeline_mode = #tpu.pipeline_mode<synchronous>, transform_indices = @transform_13, window_bounds = array<i64: 32, 64>}, {pipeline_mode = #tpu.pipeline_mode<synchronous>, transform_indices = @transform_14, window_bounds = array<i64: 1, 64>}, {pipeline_mode = #tpu.pipeline_mode<synchronous>, transform_indices = @transform_15, window_bounds = array<i64: 7, 32>}, {pipeline_mode = #tpu.pipeline_mode<synchronous>, transform_indices = @transform_16, window_bounds = array<i64: 1, 32>}, {pipeline_mode = #tpu.pipeline_mode<synchronous>, transform_indices = @transform_17, window_bounds = array<i64: 32, 32>}, {pipeline_mode = #tpu.pipeline_mode<synchronous>, transform_indices = @transform_18, window_bounds = array<i64: 1, 32>}, {pipeline_mode = #tpu.pipeline_mode<synchronous>, transform_indices = @transform_19, window_bounds = array<i64: 32, 128>}, {pipeline_mode = #tpu.pipeline_mode<synchronous>, transform_indices = @transform_20, window_bounds = array<i64: 1, 128>}, {pipeline_mode = #tpu.pipeline_mode<synchronous>, transform_indices = @transform_21, window_bounds = array<i64: 128, 32>}, {pipeline_mode = #tpu.pipeline_mode<synchronous>, transform_indices = @transform_22, window_bounds = array<i64: 1, 32>}, {transform_indices = @transform_23, window_bounds = array<i64: 8, 32>}]} {
    %c0 = arith.constant 0 : index
    %c0_0 = arith.constant 0 : index
    %0 = vector.load %arg1[%c0, %c0_0] : memref<8x32xf32, #tpu.memory_space<vmem>>, vector<8x32xf32>
    %cst = arith.constant dense<0.000000e+00> : vector<8xf32>
    %1 = vector.multi_reduction <add>, %0, %cst [1] : vector<8x32xf32> to vector<8xf32>
    %2 = vector.shape_cast %1 : vector<8xf32> to vector<8x1xf32>
    %cst_1 = arith.constant 3.200000e+01 : f32
    %3 = vector.broadcast %cst_1 : f32 to vector<8x1xf32>
    %4 = arith.divf %2, %3 : vector<8x1xf32>
    %5 = vector.broadcast %4 : vector<8x1xf32> to vector<8x32xf32>
    %6 = arith.subf %0, %5 : vector<8x32xf32>
    %7 = arith.mulf %6, %6 : vector<8x32xf32>
    %cst_2 = arith.constant dense<0.000000e+00> : vector<8xf32>
    %8 = vector.multi_reduction <add>, %7, %cst_2 [1] : vector<8x32xf32> to vector<8xf32>
    %9 = vector.shape_cast %8 : vector<8xf32> to vector<8x1xf32>
    %cst_3 = arith.constant 3.200000e+01 : f32
    %10 = vector.broadcast %cst_3 : f32 to vector<8x1xf32>
    %11 = arith.divf %9, %10 : vector<8x1xf32>
    %12 = vector.broadcast %4 : vector<8x1xf32> to vector<8x32xf32>
    %13 = arith.subf %0, %12 : vector<8x32xf32>
    %cst_4 = arith.constant 9.99999974E-6 : f32
    %14 = vector.broadcast %cst_4 : f32 to vector<8x1xf32>
    %15 = arith.addf %11, %14 : vector<8x1xf32>
    %16 = math.rsqrt %15 : vector<8x1xf32>
    %17 = vector.broadcast %16 : vector<8x1xf32> to vector<8x32xf32>
    %18 = arith.mulf %13, %17 : vector<8x32xf32>
    %c0_5 = arith.constant 0 : index
    %c0_6 = arith.constant 0 : index
    %19 = vector.load %arg2[%c0_5, %c0_6] : memref<5x32xf32, #tpu.memory_space<vmem>>, vector<1x32xf32>
    %20 = vector.broadcast %19 : vector<1x32xf32> to vector<8x32xf32>
    %21 = arith.mulf %18, %20 : vector<8x32xf32>
    %c0_7 = arith.constant 0 : index
    %c0_8 = arith.constant 0 : index
    %22 = vector.load %arg3[%c0_7, %c0_8] : memref<5x32xf32, #tpu.memory_space<vmem>>, vector<1x32xf32>
    %23 = vector.broadcast %22 : vector<1x32xf32> to vector<8x32xf32>
    %24 = arith.addf %21, %23 : vector<8x32xf32>
    %c0_9 = arith.constant 0 : index
    %c0_10 = arith.constant 0 : index
    %25 = vector.load %arg4[%c0_9, %c0_10] : memref<32x128xbf16, #tpu.memory_space<vmem>>, vector<32x128xbf16>
    %26 = arith.truncf %24 : vector<8x32xf32> to vector<8x32xbf16>
    %cst_11 = arith.constant dense<0.000000e+00> : vector<8x128xf32>
    %27 = tpu.matmul %26, %25, %cst_11 {dimension_numbers = #tpu.dot_dimension_numbers<[1], [0], [0], [1], [0, 0, 1, 1], [], []>} : vector<8x32xbf16>, vector<32x128xbf16>, vector<8x128xf32> -> vector<8x128xf32>
    %c0_12 = arith.constant 0 : index
    %c0_13 = arith.constant 0 : index
    %28 = vector.load %arg5[%c0_12, %c0_13] : memref<1x128xf32, #tpu.memory_space<vmem>>, vector<1x128xf32>
    %29 = vector.broadcast %28 : vector<1x128xf32> to vector<8x128xf32>
    %30 = arith.addf %27, %29 : vector<8x128xf32>
    %31 = arith.negf %30 : vector<8x128xf32>
    %32 = math.exp %31 : vector<8x128xf32>
    %cst_14 = arith.constant 1.000000e+00 : f32
    %33 = vector.broadcast %cst_14 : f32 to vector<8x128xf32>
    %34 = arith.addf %33, %32 : vector<8x128xf32>
    %35 = arith.divf %33, %34 : vector<8x128xf32>
    %36 = arith.mulf %30, %35 : vector<8x128xf32>
    %c0_15 = arith.constant 0 : index
    %c0_16 = arith.constant 0 : index
    %37 = vector.load %arg6[%c0_15, %c0_16] : memref<128x32xbf16, #tpu.memory_space<vmem>>, vector<128x32xbf16>
    %38 = arith.truncf %36 : vector<8x128xf32> to vector<8x128xbf16>
    %cst_17 = arith.constant dense<0.000000e+00> : vector<8x32xf32>
    %39 = tpu.matmul %38, %37, %cst_17 {dimension_numbers = #tpu.dot_dimension_numbers<[1], [0], [0], [1], [0, 0, 1, 1], [], []>} : vector<8x128xbf16>, vector<128x32xbf16>, vector<8x32xf32> -> vector<8x32xf32>
    %c0_18 = arith.constant 0 : index
    %c0_19 = arith.constant 0 : index
    %40 = vector.load %arg7[%c0_18, %c0_19] : memref<1x32xf32, #tpu.memory_space<vmem>>, vector<1x32xf32>
    %41 = vector.broadcast %40 : vector<1x32xf32> to vector<8x32xf32>
    %42 = arith.addf %39, %41 : vector<8x32xf32>
    %cst_20 = arith.constant 5.000000e-01 : f32
    %43 = vector.broadcast %cst_20 : f32 to vector<8x32xf32>
    %44 = arith.mulf %43, %42 : vector<8x32xf32>
    %45 = arith.addf %0, %44 : vector<8x32xf32>
    %cst_21 = arith.constant dense<0.000000e+00> : vector<8xf32>
    %46 = vector.multi_reduction <add>, %45, %cst_21 [1] : vector<8x32xf32> to vector<8xf32>
    %47 = vector.shape_cast %46 : vector<8xf32> to vector<8x1xf32>
    %cst_22 = arith.constant 3.200000e+01 : f32
    %48 = vector.broadcast %cst_22 : f32 to vector<8x1xf32>
    %49 = arith.divf %47, %48 : vector<8x1xf32>
    %50 = vector.broadcast %49 : vector<8x1xf32> to vector<8x32xf32>
    %51 = arith.subf %45, %50 : vector<8x32xf32>
    %52 = arith.mulf %51, %51 : vector<8x32xf32>
    %cst_23 = arith.constant dense<0.000000e+00> : vector<8xf32>
    %53 = vector.multi_reduction <add>, %52, %cst_23 [1] : vector<8x32xf32> to vector<8xf32>
    %54 = vector.shape_cast %53 : vector<8xf32> to vector<8x1xf32>
    %cst_24 = arith.constant 3.200000e+01 : f32
    %55 = vector.broadcast %cst_24 : f32 to vector<8x1xf32>
    %56 = arith.divf %54, %55 : vector<8x1xf32>
    %57 = vector.broadcast %49 : vector<8x1xf32> to vector<8x32xf32>
    %58 = arith.subf %45, %57 : vector<8x32xf32>
    %cst_25 = arith.constant 9.99999974E-6 : f32
    %59 = vector.broadcast %cst_25 : f32 to vector<8x1xf32>
    %60 = arith.addf %56, %59 : vector<8x1xf32>
    %61 = math.rsqrt %60 : vector<8x1xf32>
    %62 = vector.broadcast %61 : vector<8x1xf32> to vector<8x32xf32>
    %63 = arith.mulf %58, %62 : vector<8x32xf32>
    %c1 = arith.constant 1 : index
    %c0_26 = arith.constant 0 : index
    %64 = vector.load %arg2[%c1, %c0_26] : memref<5x32xf32, #tpu.memory_space<vmem>>, vector<1x32xf32>
    %65 = vector.broadcast %64 : vector<1x32xf32> to vector<8x32xf32>
    %66 = arith.mulf %63, %65 : vector<8x32xf32>
    %c1_27 = arith.constant 1 : index
    %c0_28 = arith.constant 0 : index
    %67 = vector.load %arg3[%c1_27, %c0_28] : memref<5x32xf32, #tpu.memory_space<vmem>>, vector<1x32xf32>
    %68 = vector.broadcast %67 : vector<1x32xf32> to vector<8x32xf32>
    %69 = arith.addf %66, %68 : vector<8x32xf32>
    %70 = arith.truncf %69 : vector<8x32xf32> to vector<8x32xbf16>
    %71 = vector.shape_cast %70 : vector<8x32xbf16> to vector<1x8x32xbf16>
    %72 = vector.broadcast %71 : vector<1x8x32xbf16> to vector<4x8x32xbf16>
    %c0_29 = arith.constant 0 : index
    %c0_30 = arith.constant 0 : index
    %c0_31 = arith.constant 0 : index
    %73 = vector.load %arg8[%c0_29, %c0_30, %c0_31] : memref<4x32x8xbf16, #tpu.memory_space<vmem>>, vector<4x32x8xbf16>
    "tpu.trace_start"() <{level = 10 : i32, message = "htd,hde->hte"}> : () -> ()
    %cst_32 = arith.constant dense<0.000000e+00> : vector<4x8x8xf32>
    %74 = tpu.matmul %72, %73, %cst_32 {dimension_numbers = #tpu.dot_dimension_numbers<[2], [1], [1], [2], [0, 0, 0, 1, 1, 2], [0], [0]>} : vector<4x8x32xbf16>, vector<4x32x8xbf16>, vector<4x8x8xf32> -> vector<4x8x8xf32>
    "tpu.trace_stop"() : () -> ()
    %c0_33 = arith.constant 0 : index
    %c0_34 = arith.constant 0 : index
    %c0_35 = arith.constant 0 : index
    %75 = vector.load %arg9[%c0_33, %c0_34, %c0_35] : memref<4x1x8xf32, #tpu.memory_space<vmem>>, vector<4x1x8xf32>
    %76 = vector.broadcast %75 : vector<4x1x8xf32> to vector<4x8x8xf32>
    %77 = arith.addf %74, %76 : vector<4x8x8xf32>
    %c0_36 = arith.constant 0 : index
    %c0_37 = arith.constant 0 : index
    %c0_38 = arith.constant 0 : index
    %78 = vector.load %arg10[%c0_36, %c0_37, %c0_38] : memref<4x32x8xbf16, #tpu.memory_space<vmem>>, vector<4x32x8xbf16>
    "tpu.trace_start"() <{level = 10 : i32, message = "htd,hde->hte"}> : () -> ()
    %cst_39 = arith.constant dense<0.000000e+00> : vector<4x8x8xf32>
    %79 = tpu.matmul %72, %78, %cst_39 {dimension_numbers = #tpu.dot_dimension_numbers<[2], [1], [1], [2], [0, 0, 0, 1, 1, 2], [0], [0]>} : vector<4x8x32xbf16>, vector<4x32x8xbf16>, vector<4x8x8xf32> -> vector<4x8x8xf32>
    "tpu.trace_stop"() : () -> ()
    %c0_40 = arith.constant 0 : index
    %c0_41 = arith.constant 0 : index
    %c0_42 = arith.constant 0 : index
    %80 = vector.load %arg11[%c0_40, %c0_41, %c0_42] : memref<4x1x8xf32, #tpu.memory_space<vmem>>, vector<4x1x8xf32>
    %81 = vector.broadcast %80 : vector<4x1x8xf32> to vector<4x8x8xf32>
    %82 = arith.addf %79, %81 : vector<4x8x8xf32>
    %c0_43 = arith.constant 0 : index
    %c0_44 = arith.constant 0 : index
    %c0_45 = arith.constant 0 : index
    %83 = vector.load %arg12[%c0_43, %c0_44, %c0_45] : memref<4x32x32xbf16, #tpu.memory_space<vmem>>, vector<4x32x32xbf16>
    "tpu.trace_start"() <{level = 10 : i32, message = "htd,hde->hte"}> : () -> ()
    %cst_46 = arith.constant dense<0.000000e+00> : vector<4x8x32xf32>
    %84 = tpu.matmul %72, %83, %cst_46 {dimension_numbers = #tpu.dot_dimension_numbers<[2], [1], [1], [2], [0, 0, 0, 1, 1, 2], [0], [0]>} : vector<4x8x32xbf16>, vector<4x32x32xbf16>, vector<4x8x32xf32> -> vector<4x8x32xf32>
    "tpu.trace_stop"() : () -> ()
    %85 = arith.truncf %77 : vector<4x8x8xf32> to vector<4x8x8xbf16>
    %86 = arith.truncf %82 : vector<4x8x8xf32> to vector<4x8x8xbf16>
    "tpu.trace_start"() <{level = 10 : i32, message = "hte,hse->hts"}> : () -> ()
    %cst_47 = arith.constant dense<0.000000e+00> : vector<4x8x8xf32>
    %87 = tpu.matmul %85, %86, %cst_47 {dimension_numbers = #tpu.dot_dimension_numbers<[2], [2], [1], [1], [0, 0, 0, 1, 1, 1], [0], [0]>} : vector<4x8x8xbf16>, vector<4x8x8xbf16>, vector<4x8x8xf32> -> vector<4x8x8xf32>
    "tpu.trace_stop"() : () -> ()
    %cst_48 = arith.constant 0.353553385 : f32
    %88 = vector.broadcast %cst_48 : f32 to vector<4x8x8xf32>
    %89 = arith.mulf %87, %88 : vector<4x8x8xf32>
    %cst_49 = arith.constant dense<0xFF800000> : vector<4x8xf32>
    %90 = vector.multi_reduction <maximumf>, %89, %cst_49 [2] : vector<4x8x8xf32> to vector<4x8xf32>
    %91 = vector.shape_cast %90 : vector<4x8xf32> to vector<4x8x1xf32>
    %92 = vector.broadcast %91 : vector<4x8x1xf32> to vector<4x8x8xf32>
    %93 = arith.subf %89, %92 : vector<4x8x8xf32>
    %94 = math.exp %93 : vector<4x8x8xf32>
    %cst_50 = arith.constant dense<0.000000e+00> : vector<4x8xf32>
    %95 = vector.multi_reduction <add>, %94, %cst_50 [2] : vector<4x8x8xf32> to vector<4x8xf32>
    %96 = vector.shape_cast %95 : vector<4x8xf32> to vector<4x8x1xf32>
    %97 = tpu.reciprocal %96 {approx = true} : vector<4x8x1xf32> -> vector<4x8x1xf32>
    %98 = vector.broadcast %97 : vector<4x8x1xf32> to vector<4x8x8xf32>
    %99 = arith.mulf %94, %98 : vector<4x8x8xf32>
    %100 = arith.truncf %99 : vector<4x8x8xf32> to vector<4x8x8xbf16>
    %101 = arith.truncf %84 : vector<4x8x32xf32> to vector<4x8x32xbf16>
    "tpu.trace_start"() <{level = 10 : i32, message = "hts,hsd->htd"}> : () -> ()
    %cst_51 = arith.constant dense<0.000000e+00> : vector<4x8x32xf32>
    %102 = tpu.matmul %100, %101, %cst_51 {dimension_numbers = #tpu.dot_dimension_numbers<[2], [1], [1], [2], [0, 0, 0, 1, 1, 2], [0], [0]>} : vector<4x8x8xbf16>, vector<4x8x32xbf16>, vector<4x8x32xf32> -> vector<4x8x32xf32>
    "tpu.trace_stop"() : () -> ()
    %cst_52 = arith.constant dense<0.000000e+00> : vector<8x32xf32>
    %103 = vector.multi_reduction <add>, %102, %cst_52 [0] : vector<4x8x32xf32> to vector<8x32xf32>
    %c0_53 = arith.constant 0 : index
    %c0_54 = arith.constant 0 : index
    %104 = vector.load %arg13[%c0_53, %c0_54] : memref<1x32xf32, #tpu.memory_space<vmem>>, vector<1x32xf32>
    %105 = vector.broadcast %104 : vector<1x32xf32> to vector<8x32xf32>
    %106 = arith.addf %103, %105 : vector<8x32xf32>
    %107 = arith.addf %45, %106 : vector<8x32xf32>
    %cst_55 = arith.constant dense<0.000000e+00> : vector<8xf32>
    %108 = vector.multi_reduction <add>, %107, %cst_55 [1] : vector<8x32xf32> to vector<8xf32>
    %109 = vector.shape_cast %108 : vector<8xf32> to vector<8x1xf32>
    %cst_56 = arith.constant 3.200000e+01 : f32
    %110 = vector.broadcast %cst_56 : f32 to vector<8x1xf32>
    %111 = arith.divf %109, %110 : vector<8x1xf32>
    %112 = vector.broadcast %111 : vector<8x1xf32> to vector<8x32xf32>
    %113 = arith.subf %107, %112 : vector<8x32xf32>
    %114 = arith.mulf %113, %113 : vector<8x32xf32>
    %cst_57 = arith.constant dense<0.000000e+00> : vector<8xf32>
    %115 = vector.multi_reduction <add>, %114, %cst_57 [1] : vector<8x32xf32> to vector<8xf32>
    %116 = vector.shape_cast %115 : vector<8xf32> to vector<8x1xf32>
    %cst_58 = arith.constant 3.200000e+01 : f32
    %117 = vector.broadcast %cst_58 : f32 to vector<8x1xf32>
    %118 = arith.divf %116, %117 : vector<8x1xf32>
    %119 = vector.broadcast %111 : vector<8x1xf32> to vector<8x32xf32>
    %120 = arith.subf %107, %119 : vector<8x32xf32>
    %cst_59 = arith.constant 9.99999974E-6 : f32
    %121 = vector.broadcast %cst_59 : f32 to vector<8x1xf32>
    %122 = arith.addf %118, %121 : vector<8x1xf32>
    %123 = math.rsqrt %122 : vector<8x1xf32>
    %124 = vector.broadcast %123 : vector<8x1xf32> to vector<8x32xf32>
    %125 = arith.mulf %120, %124 : vector<8x32xf32>
    %c2 = arith.constant 2 : index
    %c0_60 = arith.constant 0 : index
    %126 = vector.load %arg2[%c2, %c0_60] : memref<5x32xf32, #tpu.memory_space<vmem>>, vector<1x32xf32>
    %127 = vector.broadcast %126 : vector<1x32xf32> to vector<8x32xf32>
    %128 = arith.mulf %125, %127 : vector<8x32xf32>
    %c2_61 = arith.constant 2 : index
    %c0_62 = arith.constant 0 : index
    %129 = vector.load %arg3[%c2_61, %c0_62] : memref<5x32xf32, #tpu.memory_space<vmem>>, vector<1x32xf32>
    %130 = vector.broadcast %129 : vector<1x32xf32> to vector<8x32xf32>
    %131 = arith.addf %128, %130 : vector<8x32xf32>
    %c0_63 = arith.constant 0 : index
    %c0_64 = arith.constant 0 : index
    %132 = vector.load %arg14[%c0_63, %c0_64] : memref<32x64xbf16, #tpu.memory_space<vmem>>, vector<32x64xbf16>
    %133 = arith.truncf %131 : vector<8x32xf32> to vector<8x32xbf16>
    %cst_65 = arith.constant dense<0.000000e+00> : vector<8x64xf32>
    %134 = tpu.matmul %133, %132, %cst_65 {dimension_numbers = #tpu.dot_dimension_numbers<[1], [0], [0], [1], [0, 0, 1, 1], [], []>} : vector<8x32xbf16>, vector<32x64xbf16>, vector<8x64xf32> -> vector<8x64xf32>
    %c0_66 = arith.constant 0 : index
    %c0_67 = arith.constant 0 : index
    %135 = vector.load %arg15[%c0_66, %c0_67] : memref<1x64xf32, #tpu.memory_space<vmem>>, vector<1x64xf32>
    %136 = vector.broadcast %135 : vector<1x64xf32> to vector<8x64xf32>
    %137 = arith.addf %134, %136 : vector<8x64xf32>
    %138 = vector.extract_strided_slice %137 {offsets = [0, 0], sizes = [8, 32], strides = [1, 1]} : vector<8x64xf32> to vector<8x32xf32>
    %139 = vector.extract_strided_slice %137 {offsets = [0, 32], sizes = [8, 32], strides = [1, 1]} : vector<8x64xf32> to vector<8x32xf32>
    %140 = arith.negf %139 : vector<8x32xf32>
    %141 = math.exp %140 : vector<8x32xf32>
    %cst_68 = arith.constant 1.000000e+00 : f32
    %142 = vector.broadcast %cst_68 : f32 to vector<8x32xf32>
    %143 = arith.addf %142, %141 : vector<8x32xf32>
    %144 = arith.divf %142, %143 : vector<8x32xf32>
    %145 = arith.mulf %138, %144 : vector<8x32xf32>
    %146 = tpu.iota {dimensions = array<i32: 0>} : vector<8x32xi32>
    %cst_69 = arith.constant 0.000000e+00 : f32
    %147 = vector.broadcast %cst_69 : f32 to vector<8x32xf32>
    %c3_i32 = arith.constant 3 : i32
    %148 = tpu.dynamic_rotate %145 by %c3_i32 dim 0 : vector<8x32xf32>, i32 -> vector<8x32xf32>
    %c-3_i32 = arith.constant -3 : i32
    %149 = vector.broadcast %c-3_i32 : i32 to vector<8x32xi32>
    %150 = arith.addi %146, %149 : vector<8x32xi32>
    %c0_i32 = arith.constant 0 : i32
    %151 = vector.broadcast %c0_i32 : i32 to vector<8x32xi32>
    %152 = arith.cmpi sge, %150, %151 : vector<8x32xi32>
    %c-3_i32_70 = arith.constant -3 : i32
    %153 = vector.broadcast %c-3_i32_70 : i32 to vector<8x32xi32>
    %154 = arith.addi %146, %153 : vector<8x32xi32>
    %c8_i32 = arith.constant 8 : i32
    %155 = vector.broadcast %c8_i32 : i32 to vector<8x32xi32>
    %156 = arith.cmpi slt, %154, %155 : vector<8x32xi32>
    %157 = arith.andi %152, %156 : vector<8x32xi1>
    %cst_71 = arith.constant 0.000000e+00 : f32
    %158 = vector.broadcast %cst_71 : f32 to vector<8x32xf32>
    %159 = arith.select %157, %148, %158 : vector<8x32xi1>, vector<8x32xf32>
    %c0_72 = arith.constant 0 : index
    %c0_73 = arith.constant 0 : index
    %160 = vector.load %arg16[%c0_72, %c0_73] : memref<7x32xf32, #tpu.memory_space<vmem>>, vector<1x32xf32>
    %161 = vector.broadcast %160 : vector<1x32xf32> to vector<8x32xf32>
    %162 = arith.mulf %159, %161 : vector<8x32xf32>
    %163 = arith.addf %147, %162 : vector<8x32xf32>
    %c2_i32 = arith.constant 2 : i32
    %164 = tpu.dynamic_rotate %145 by %c2_i32 dim 0 : vector<8x32xf32>, i32 -> vector<8x32xf32>
    %c-2_i32 = arith.constant -2 : i32
    %165 = vector.broadcast %c-2_i32 : i32 to vector<8x32xi32>
    %166 = arith.addi %146, %165 : vector<8x32xi32>
    %c0_i32_74 = arith.constant 0 : i32
    %167 = vector.broadcast %c0_i32_74 : i32 to vector<8x32xi32>
    %168 = arith.cmpi sge, %166, %167 : vector<8x32xi32>
    %c-2_i32_75 = arith.constant -2 : i32
    %169 = vector.broadcast %c-2_i32_75 : i32 to vector<8x32xi32>
    %170 = arith.addi %146, %169 : vector<8x32xi32>
    %c8_i32_76 = arith.constant 8 : i32
    %171 = vector.broadcast %c8_i32_76 : i32 to vector<8x32xi32>
    %172 = arith.cmpi slt, %170, %171 : vector<8x32xi32>
    %173 = arith.andi %168, %172 : vector<8x32xi1>
    %cst_77 = arith.constant 0.000000e+00 : f32
    %174 = vector.broadcast %cst_77 : f32 to vector<8x32xf32>
    %175 = arith.select %173, %164, %174 : vector<8x32xi1>, vector<8x32xf32>
    %c1_78 = arith.constant 1 : index
    %c0_79 = arith.constant 0 : index
    %176 = vector.load %arg16[%c1_78, %c0_79] : memref<7x32xf32, #tpu.memory_space<vmem>>, vector<1x32xf32>
    %177 = vector.broadcast %176 : vector<1x32xf32> to vector<8x32xf32>
    %178 = arith.mulf %175, %177 : vector<8x32xf32>
    %179 = arith.addf %163, %178 : vector<8x32xf32>
    %c1_i32 = arith.constant 1 : i32
    %180 = tpu.dynamic_rotate %145 by %c1_i32 dim 0 : vector<8x32xf32>, i32 -> vector<8x32xf32>
    %c-1_i32 = arith.constant -1 : i32
    %181 = vector.broadcast %c-1_i32 : i32 to vector<8x32xi32>
    %182 = arith.addi %146, %181 : vector<8x32xi32>
    %c0_i32_80 = arith.constant 0 : i32
    %183 = vector.broadcast %c0_i32_80 : i32 to vector<8x32xi32>
    %184 = arith.cmpi sge, %182, %183 : vector<8x32xi32>
    %c-1_i32_81 = arith.constant -1 : i32
    %185 = vector.broadcast %c-1_i32_81 : i32 to vector<8x32xi32>
    %186 = arith.addi %146, %185 : vector<8x32xi32>
    %c8_i32_82 = arith.constant 8 : i32
    %187 = vector.broadcast %c8_i32_82 : i32 to vector<8x32xi32>
    %188 = arith.cmpi slt, %186, %187 : vector<8x32xi32>
    %189 = arith.andi %184, %188 : vector<8x32xi1>
    %cst_83 = arith.constant 0.000000e+00 : f32
    %190 = vector.broadcast %cst_83 : f32 to vector<8x32xf32>
    %191 = arith.select %189, %180, %190 : vector<8x32xi1>, vector<8x32xf32>
    %c2_84 = arith.constant 2 : index
    %c0_85 = arith.constant 0 : index
    %192 = vector.load %arg16[%c2_84, %c0_85] : memref<7x32xf32, #tpu.memory_space<vmem>>, vector<1x32xf32>
    %193 = vector.broadcast %192 : vector<1x32xf32> to vector<8x32xf32>
    %194 = arith.mulf %191, %193 : vector<8x32xf32>
    %195 = arith.addf %179, %194 : vector<8x32xf32>
    %c0_i32_86 = arith.constant 0 : i32
    %196 = vector.broadcast %c0_i32_86 : i32 to vector<8x32xi32>
    %197 = arith.addi %146, %196 : vector<8x32xi32>
    %c0_i32_87 = arith.constant 0 : i32
    %198 = vector.broadcast %c0_i32_87 : i32 to vector<8x32xi32>
    %199 = arith.cmpi sge, %197, %198 : vector<8x32xi32>
    %c0_i32_88 = arith.constant 0 : i32
    %200 = vector.broadcast %c0_i32_88 : i32 to vector<8x32xi32>
    %201 = arith.addi %146, %200 : vector<8x32xi32>
    %c8_i32_89 = arith.constant 8 : i32
    %202 = vector.broadcast %c8_i32_89 : i32 to vector<8x32xi32>
    %203 = arith.cmpi slt, %201, %202 : vector<8x32xi32>
    %204 = arith.andi %199, %203 : vector<8x32xi1>
    %cst_90 = arith.constant 0.000000e+00 : f32
    %205 = vector.broadcast %cst_90 : f32 to vector<8x32xf32>
    %206 = arith.select %204, %145, %205 : vector<8x32xi1>, vector<8x32xf32>
    %c3 = arith.constant 3 : index
    %c0_91 = arith.constant 0 : index
    %207 = vector.load %arg16[%c3, %c0_91] : memref<7x32xf32, #tpu.memory_space<vmem>>, vector<1x32xf32>
    %208 = vector.broadcast %207 : vector<1x32xf32> to vector<8x32xf32>
    %209 = arith.mulf %206, %208 : vector<8x32xf32>
    %210 = arith.addf %195, %209 : vector<8x32xf32>
    %c7_i32 = arith.constant 7 : i32
    %211 = tpu.dynamic_rotate %145 by %c7_i32 dim 0 : vector<8x32xf32>, i32 -> vector<8x32xf32>
    %c1_i32_92 = arith.constant 1 : i32
    %212 = vector.broadcast %c1_i32_92 : i32 to vector<8x32xi32>
    %213 = arith.addi %146, %212 : vector<8x32xi32>
    %c0_i32_93 = arith.constant 0 : i32
    %214 = vector.broadcast %c0_i32_93 : i32 to vector<8x32xi32>
    %215 = arith.cmpi sge, %213, %214 : vector<8x32xi32>
    %c1_i32_94 = arith.constant 1 : i32
    %216 = vector.broadcast %c1_i32_94 : i32 to vector<8x32xi32>
    %217 = arith.addi %146, %216 : vector<8x32xi32>
    %c8_i32_95 = arith.constant 8 : i32
    %218 = vector.broadcast %c8_i32_95 : i32 to vector<8x32xi32>
    %219 = arith.cmpi slt, %217, %218 : vector<8x32xi32>
    %220 = arith.andi %215, %219 : vector<8x32xi1>
    %cst_96 = arith.constant 0.000000e+00 : f32
    %221 = vector.broadcast %cst_96 : f32 to vector<8x32xf32>
    %222 = arith.select %220, %211, %221 : vector<8x32xi1>, vector<8x32xf32>
    %c4 = arith.constant 4 : index
    %c0_97 = arith.constant 0 : index
    %223 = vector.load %arg16[%c4, %c0_97] : memref<7x32xf32, #tpu.memory_space<vmem>>, vector<1x32xf32>
    %224 = vector.broadcast %223 : vector<1x32xf32> to vector<8x32xf32>
    %225 = arith.mulf %222, %224 : vector<8x32xf32>
    %226 = arith.addf %210, %225 : vector<8x32xf32>
    %c6_i32 = arith.constant 6 : i32
    %227 = tpu.dynamic_rotate %145 by %c6_i32 dim 0 : vector<8x32xf32>, i32 -> vector<8x32xf32>
    %c2_i32_98 = arith.constant 2 : i32
    %228 = vector.broadcast %c2_i32_98 : i32 to vector<8x32xi32>
    %229 = arith.addi %146, %228 : vector<8x32xi32>
    %c0_i32_99 = arith.constant 0 : i32
    %230 = vector.broadcast %c0_i32_99 : i32 to vector<8x32xi32>
    %231 = arith.cmpi sge, %229, %230 : vector<8x32xi32>
    %c2_i32_100 = arith.constant 2 : i32
    %232 = vector.broadcast %c2_i32_100 : i32 to vector<8x32xi32>
    %233 = arith.addi %146, %232 : vector<8x32xi32>
    %c8_i32_101 = arith.constant 8 : i32
    %234 = vector.broadcast %c8_i32_101 : i32 to vector<8x32xi32>
    %235 = arith.cmpi slt, %233, %234 : vector<8x32xi32>
    %236 = arith.andi %231, %235 : vector<8x32xi1>
    %cst_102 = arith.constant 0.000000e+00 : f32
    %237 = vector.broadcast %cst_102 : f32 to vector<8x32xf32>
    %238 = arith.select %236, %227, %237 : vector<8x32xi1>, vector<8x32xf32>
    %c5 = arith.constant 5 : index
    %c0_103 = arith.constant 0 : index
    %239 = vector.load %arg16[%c5, %c0_103] : memref<7x32xf32, #tpu.memory_space<vmem>>, vector<1x32xf32>
    %240 = vector.broadcast %239 : vector<1x32xf32> to vector<8x32xf32>
    %241 = arith.mulf %238, %240 : vector<8x32xf32>
    %242 = arith.addf %226, %241 : vector<8x32xf32>
    %c5_i32 = arith.constant 5 : i32
    %243 = tpu.dynamic_rotate %145 by %c5_i32 dim 0 : vector<8x32xf32>, i32 -> vector<8x32xf32>
    %c3_i32_104 = arith.constant 3 : i32
    %244 = vector.broadcast %c3_i32_104 : i32 to vector<8x32xi32>
    %245 = arith.addi %146, %244 : vector<8x32xi32>
    %c0_i32_105 = arith.constant 0 : i32
    %246 = vector.broadcast %c0_i32_105 : i32 to vector<8x32xi32>
    %247 = arith.cmpi sge, %245, %246 : vector<8x32xi32>
    %c3_i32_106 = arith.constant 3 : i32
    %248 = vector.broadcast %c3_i32_106 : i32 to vector<8x32xi32>
    %249 = arith.addi %146, %248 : vector<8x32xi32>
    %c8_i32_107 = arith.constant 8 : i32
    %250 = vector.broadcast %c8_i32_107 : i32 to vector<8x32xi32>
    %251 = arith.cmpi slt, %249, %250 : vector<8x32xi32>
    %252 = arith.andi %247, %251 : vector<8x32xi1>
    %cst_108 = arith.constant 0.000000e+00 : f32
    %253 = vector.broadcast %cst_108 : f32 to vector<8x32xf32>
    %254 = arith.select %252, %243, %253 : vector<8x32xi1>, vector<8x32xf32>
    %c6 = arith.constant 6 : index
    %c0_109 = arith.constant 0 : index
    %255 = vector.load %arg16[%c6, %c0_109] : memref<7x32xf32, #tpu.memory_space<vmem>>, vector<1x32xf32>
    %256 = vector.broadcast %255 : vector<1x32xf32> to vector<8x32xf32>
    %257 = arith.mulf %254, %256 : vector<8x32xf32>
    %258 = arith.addf %242, %257 : vector<8x32xf32>
    %c0_110 = arith.constant 0 : index
    %c0_111 = arith.constant 0 : index
    %259 = vector.load %arg17[%c0_110, %c0_111] : memref<1x32xf32, #tpu.memory_space<vmem>>, vector<1x32xf32>
    %260 = vector.broadcast %259 : vector<1x32xf32> to vector<8x32xf32>
    %261 = arith.addf %258, %260 : vector<8x32xf32>
    %262 = arith.negf %261 : vector<8x32xf32>
    %263 = math.exp %262 : vector<8x32xf32>
    %cst_112 = arith.constant 1.000000e+00 : f32
    %264 = vector.broadcast %cst_112 : f32 to vector<8x32xf32>
    %265 = arith.addf %264, %263 : vector<8x32xf32>
    %266 = arith.divf %264, %265 : vector<8x32xf32>
    %267 = arith.mulf %261, %266 : vector<8x32xf32>
    %c0_113 = arith.constant 0 : index
    %c0_114 = arith.constant 0 : index
    %268 = vector.load %arg18[%c0_113, %c0_114] : memref<32x32xbf16, #tpu.memory_space<vmem>>, vector<32x32xbf16>
    %269 = arith.truncf %267 : vector<8x32xf32> to vector<8x32xbf16>
    %cst_115 = arith.constant dense<0.000000e+00> : vector<8x32xf32>
    %270 = tpu.matmul %269, %268, %cst_115 {dimension_numbers = #tpu.dot_dimension_numbers<[1], [0], [0], [1], [0, 0, 1, 1], [], []>} : vector<8x32xbf16>, vector<32x32xbf16>, vector<8x32xf32> -> vector<8x32xf32>
    %c0_116 = arith.constant 0 : index
    %c0_117 = arith.constant 0 : index
    %271 = vector.load %arg19[%c0_116, %c0_117] : memref<1x32xf32, #tpu.memory_space<vmem>>, vector<1x32xf32>
    %272 = vector.broadcast %271 : vector<1x32xf32> to vector<8x32xf32>
    %273 = arith.addf %270, %272 : vector<8x32xf32>
    %274 = arith.addf %107, %273 : vector<8x32xf32>
    %cst_118 = arith.constant dense<0.000000e+00> : vector<8xf32>
    %275 = vector.multi_reduction <add>, %274, %cst_118 [1] : vector<8x32xf32> to vector<8xf32>
    %276 = vector.shape_cast %275 : vector<8xf32> to vector<8x1xf32>
    %cst_119 = arith.constant 3.200000e+01 : f32
    %277 = vector.broadcast %cst_119 : f32 to vector<8x1xf32>
    %278 = arith.divf %276, %277 : vector<8x1xf32>
    %279 = vector.broadcast %278 : vector<8x1xf32> to vector<8x32xf32>
    %280 = arith.subf %274, %279 : vector<8x32xf32>
    %281 = arith.mulf %280, %280 : vector<8x32xf32>
    %cst_120 = arith.constant dense<0.000000e+00> : vector<8xf32>
    %282 = vector.multi_reduction <add>, %281, %cst_120 [1] : vector<8x32xf32> to vector<8xf32>
    %283 = vector.shape_cast %282 : vector<8xf32> to vector<8x1xf32>
    %cst_121 = arith.constant 3.200000e+01 : f32
    %284 = vector.broadcast %cst_121 : f32 to vector<8x1xf32>
    %285 = arith.divf %283, %284 : vector<8x1xf32>
    %286 = vector.broadcast %278 : vector<8x1xf32> to vector<8x32xf32>
    %287 = arith.subf %274, %286 : vector<8x32xf32>
    %cst_122 = arith.constant 9.99999974E-6 : f32
    %288 = vector.broadcast %cst_122 : f32 to vector<8x1xf32>
    %289 = arith.addf %285, %288 : vector<8x1xf32>
    %290 = math.rsqrt %289 : vector<8x1xf32>
    %291 = vector.broadcast %290 : vector<8x1xf32> to vector<8x32xf32>
    %292 = arith.mulf %287, %291 : vector<8x32xf32>
    %c3_123 = arith.constant 3 : index
    %c0_124 = arith.constant 0 : index
    %293 = vector.load %arg2[%c3_123, %c0_124] : memref<5x32xf32, #tpu.memory_space<vmem>>, vector<1x32xf32>
    %294 = vector.broadcast %293 : vector<1x32xf32> to vector<8x32xf32>
    %295 = arith.mulf %292, %294 : vector<8x32xf32>
    %c3_125 = arith.constant 3 : index
    %c0_126 = arith.constant 0 : index
    %296 = vector.load %arg3[%c3_125, %c0_126] : memref<5x32xf32, #tpu.memory_space<vmem>>, vector<1x32xf32>
    %297 = vector.broadcast %296 : vector<1x32xf32> to vector<8x32xf32>
    %298 = arith.addf %295, %297 : vector<8x32xf32>
    %c0_127 = arith.constant 0 : index
    %c0_128 = arith.constant 0 : index
    %299 = vector.load %arg20[%c0_127, %c0_128] : memref<32x128xbf16, #tpu.memory_space<vmem>>, vector<32x128xbf16>
    %300 = arith.truncf %298 : vector<8x32xf32> to vector<8x32xbf16>
    %cst_129 = arith.constant dense<0.000000e+00> : vector<8x128xf32>
    %301 = tpu.matmul %300, %299, %cst_129 {dimension_numbers = #tpu.dot_dimension_numbers<[1], [0], [0], [1], [0, 0, 1, 1], [], []>} : vector<8x32xbf16>, vector<32x128xbf16>, vector<8x128xf32> -> vector<8x128xf32>
    %c0_130 = arith.constant 0 : index
    %c0_131 = arith.constant 0 : index
    %302 = vector.load %arg21[%c0_130, %c0_131] : memref<1x128xf32, #tpu.memory_space<vmem>>, vector<1x128xf32>
    %303 = vector.broadcast %302 : vector<1x128xf32> to vector<8x128xf32>
    %304 = arith.addf %301, %303 : vector<8x128xf32>
    %305 = arith.negf %304 : vector<8x128xf32>
    %306 = math.exp %305 : vector<8x128xf32>
    %cst_132 = arith.constant 1.000000e+00 : f32
    %307 = vector.broadcast %cst_132 : f32 to vector<8x128xf32>
    %308 = arith.addf %307, %306 : vector<8x128xf32>
    %309 = arith.divf %307, %308 : vector<8x128xf32>
    %310 = arith.mulf %304, %309 : vector<8x128xf32>
    %c0_133 = arith.constant 0 : index
    %c0_134 = arith.constant 0 : index
    %311 = vector.load %arg22[%c0_133, %c0_134] : memref<128x32xbf16, #tpu.memory_space<vmem>>, vector<128x32xbf16>
    %312 = arith.truncf %310 : vector<8x128xf32> to vector<8x128xbf16>
    %cst_135 = arith.constant dense<0.000000e+00> : vector<8x32xf32>
    %313 = tpu.matmul %312, %311, %cst_135 {dimension_numbers = #tpu.dot_dimension_numbers<[1], [0], [0], [1], [0, 0, 1, 1], [], []>} : vector<8x128xbf16>, vector<128x32xbf16>, vector<8x32xf32> -> vector<8x32xf32>
    %c0_136 = arith.constant 0 : index
    %c0_137 = arith.constant 0 : index
    %314 = vector.load %arg23[%c0_136, %c0_137] : memref<1x32xf32, #tpu.memory_space<vmem>>, vector<1x32xf32>
    %315 = vector.broadcast %314 : vector<1x32xf32> to vector<8x32xf32>
    %316 = arith.addf %313, %315 : vector<8x32xf32>
    %cst_138 = arith.constant 5.000000e-01 : f32
    %317 = vector.broadcast %cst_138 : f32 to vector<8x32xf32>
    %318 = arith.mulf %317, %316 : vector<8x32xf32>
    %319 = arith.addf %274, %318 : vector<8x32xf32>
    %cst_139 = arith.constant dense<0.000000e+00> : vector<8xf32>
    %320 = vector.multi_reduction <add>, %319, %cst_139 [1] : vector<8x32xf32> to vector<8xf32>
    %321 = vector.shape_cast %320 : vector<8xf32> to vector<8x1xf32>
    %cst_140 = arith.constant 3.200000e+01 : f32
    %322 = vector.broadcast %cst_140 : f32 to vector<8x1xf32>
    %323 = arith.divf %321, %322 : vector<8x1xf32>
    %324 = vector.broadcast %323 : vector<8x1xf32> to vector<8x32xf32>
    %325 = arith.subf %319, %324 : vector<8x32xf32>
    %326 = arith.mulf %325, %325 : vector<8x32xf32>
    %cst_141 = arith.constant dense<0.000000e+00> : vector<8xf32>
    %327 = vector.multi_reduction <add>, %326, %cst_141 [1] : vector<8x32xf32> to vector<8xf32>
    %328 = vector.shape_cast %327 : vector<8xf32> to vector<8x1xf32>
    %cst_142 = arith.constant 3.200000e+01 : f32
    %329 = vector.broadcast %cst_142 : f32 to vector<8x1xf32>
    %330 = arith.divf %328, %329 : vector<8x1xf32>
    %331 = vector.broadcast %323 : vector<8x1xf32> to vector<8x32xf32>
    %332 = arith.subf %319, %331 : vector<8x32xf32>
    %cst_143 = arith.constant 9.99999974E-6 : f32
    %333 = vector.broadcast %cst_143 : f32 to vector<8x1xf32>
    %334 = arith.addf %330, %333 : vector<8x1xf32>
    %335 = math.rsqrt %334 : vector<8x1xf32>
    %336 = vector.broadcast %335 : vector<8x1xf32> to vector<8x32xf32>
    %337 = arith.mulf %332, %336 : vector<8x32xf32>
    %c4_144 = arith.constant 4 : index
    %c0_145 = arith.constant 0 : index
    %338 = vector.load %arg2[%c4_144, %c0_145] : memref<5x32xf32, #tpu.memory_space<vmem>>, vector<1x32xf32>
    %339 = vector.broadcast %338 : vector<1x32xf32> to vector<8x32xf32>
    %340 = arith.mulf %337, %339 : vector<8x32xf32>
    %c4_146 = arith.constant 4 : index
    %c0_147 = arith.constant 0 : index
    %341 = vector.load %arg3[%c4_146, %c0_147] : memref<5x32xf32, #tpu.memory_space<vmem>>, vector<1x32xf32>
    %342 = vector.broadcast %341 : vector<1x32xf32> to vector<8x32xf32>
    %343 = arith.addf %340, %342 : vector<8x32xf32>
    %c0_148 = arith.constant 0 : index
    %c0_149 = arith.constant 0 : index
    %344 = vector.load %arg24[%c0_148, %c0_149] : memref<8x32xf32, #tpu.memory_space<vmem>>, vector<8x32xf32>
    tpu.vector_store %arg24[%c0_148, %c0_149], %343 {strides = array<i32>} : memref<8x32xf32, #tpu.memory_space<vmem>>, vector<8x32xf32>,
    return
  }
  func.func @transform_0(%arg0: i32) -> (i32, i32) {
    %c0_i32 = arith.constant 0 : i32
    %c0_i32_0 = arith.constant 0 : i32
    return %arg0, %c0_i32 : i32, i32
  }
  func.func @transform_1(%arg0: i32) -> (i32, i32) {
    %c0_i32 = arith.constant 0 : i32
    %c0_i32_0 = arith.constant 0 : i32
    %c0_i32_1 = arith.constant 0 : i32
    return %c0_i32, %c0_i32_0 : i32, i32
  }
  func.func @transform_2(%arg0: i32) -> (i32, i32) {
    %c0_i32 = arith.constant 0 : i32
    %c0_i32_0 = arith.constant 0 : i32
    %c0_i32_1 = arith.constant 0 : i32
    return %c0_i32, %c0_i32_0 : i32, i32
  }
  func.func @transform_3(%arg0: i32) -> (i32, i32) {
    %c0_i32 = arith.constant 0 : i32
    %c0_i32_0 = arith.constant 0 : i32
    %c0_i32_1 = arith.constant 0 : i32
    return %c0_i32, %c0_i32_0 : i32, i32
  }
  func.func @transform_4(%arg0: i32) -> (i32, i32) {
    %c0_i32 = arith.constant 0 : i32
    %c0_i32_0 = arith.constant 0 : i32
    %c0_i32_1 = arith.constant 0 : i32
    return %c0_i32, %c0_i32_0 : i32, i32
  }
  func.func @transform_5(%arg0: i32) -> (i32, i32) {
    %c0_i32 = arith.constant 0 : i32
    %c0_i32_0 = arith.constant 0 : i32
    %c0_i32_1 = arith.constant 0 : i32
    return %c0_i32, %c0_i32_0 : i32, i32
  }
  func.func @transform_6(%arg0: i32) -> (i32, i32) {
    %c0_i32 = arith.constant 0 : i32
    %c0_i32_0 = arith.constant 0 : i32
    %c0_i32_1 = arith.constant 0 : i32
    return %c0_i32, %c0_i32_0 : i32, i32
  }
  func.func @transform_7(%arg0: i32) -> (i32, i32, i32) {
    %c0_i32 = arith.constant 0 : i32
    %c0_i32_0 = arith.constant 0 : i32
    %c0_i32_1 = arith.constant 0 : i32
    %c0_i32_2 = arith.constant 0 : i32
    return %c0_i32, %c0_i32_0, %c0_i32_1 : i32, i32, i32
  }
  func.func @transform_8(%arg0: i32) -> (i32, i32, i32) {
    %c0_i32 = arith.constant 0 : i32
    %c0_i32_0 = arith.constant 0 : i32
    %c0_i32_1 = arith.constant 0 : i32
    %c0_i32_2 = arith.constant 0 : i32
    return %c0_i32, %c0_i32_0, %c0_i32_1 : i32, i32, i32
  }
  func.func @transform_9(%arg0: i32) -> (i32, i32, i32) {
    %c0_i32 = arith.constant 0 : i32
    %c0_i32_0 = arith.constant 0 : i32
    %c0_i32_1 = arith.constant 0 : i32
    %c0_i32_2 = arith.constant 0 : i32
    return %c0_i32, %c0_i32_0, %c0_i32_1 : i32, i32, i32
  }
  func.func @transform_10(%arg0: i32) -> (i32, i32, i32) {
    %c0_i32 = arith.constant 0 : i32
    %c0_i32_0 = arith.constant 0 : i32
    %c0_i32_1 = arith.constant 0 : i32
    %c0_i32_2 = arith.constant 0 : i32
    return %c0_i32, %c0_i32_0, %c0_i32_1 : i32, i32, i32
  }
  func.func @transform_11(%arg0: i32) -> (i32, i32, i32) {
    %c0_i32 = arith.constant 0 : i32
    %c0_i32_0 = arith.constant 0 : i32
    %c0_i32_1 = arith.constant 0 : i32
    %c0_i32_2 = arith.constant 0 : i32
    return %c0_i32, %c0_i32_0, %c0_i32_1 : i32, i32, i32
  }
  func.func @transform_12(%arg0: i32) -> (i32, i32) {
    %c0_i32 = arith.constant 0 : i32
    %c0_i32_0 = arith.constant 0 : i32
    %c0_i32_1 = arith.constant 0 : i32
    return %c0_i32, %c0_i32_0 : i32, i32
  }
  func.func @transform_13(%arg0: i32) -> (i32, i32) {
    %c0_i32 = arith.constant 0 : i32
    %c0_i32_0 = arith.constant 0 : i32
    %c0_i32_1 = arith.constant 0 : i32
    return %c0_i32, %c0_i32_0 : i32, i32
  }
  func.func @transform_14(%arg0: i32) -> (i32, i32) {
    %c0_i32 = arith.constant 0 : i32
    %c0_i32_0 = arith.constant 0 : i32
    %c0_i32_1 = arith.constant 0 : i32
    return %c0_i32, %c0_i32_0 : i32, i32
  }
  func.func @transform_15(%arg0: i32) -> (i32, i32) {
    %c0_i32 = arith.constant 0 : i32
    %c0_i32_0 = arith.constant 0 : i32
    %c0_i32_1 = arith.constant 0 : i32
    return %c0_i32, %c0_i32_0 : i32, i32
  }
  func.func @transform_16(%arg0: i32) -> (i32, i32) {
    %c0_i32 = arith.constant 0 : i32
    %c0_i32_0 = arith.constant 0 : i32
    %c0_i32_1 = arith.constant 0 : i32
    return %c0_i32, %c0_i32_0 : i32, i32
  }
  func.func @transform_17(%arg0: i32) -> (i32, i32) {
    %c0_i32 = arith.constant 0 : i32
    %c0_i32_0 = arith.constant 0 : i32
    %c0_i32_1 = arith.constant 0 : i32
    return %c0_i32, %c0_i32_0 : i32, i32
  }
  func.func @transform_18(%arg0: i32) -> (i32, i32) {
    %c0_i32 = arith.constant 0 : i32
    %c0_i32_0 = arith.constant 0 : i32
    %c0_i32_1 = arith.constant 0 : i32
    return %c0_i32, %c0_i32_0 : i32, i32
  }
  func.func @transform_19(%arg0: i32) -> (i32, i32) {
    %c0_i32 = arith.constant 0 : i32
    %c0_i32_0 = arith.constant 0 : i32
    %c0_i32_1 = arith.constant 0 : i32
    return %c0_i32, %c0_i32_0 : i32, i32
  }
  func.func @transform_20(%arg0: i32) -> (i32, i32) {
    %c0_i32 = arith.constant 0 : i32
    %c0_i32_0 = arith.constant 0 : i32
    %c0_i32_1 = arith.constant 0 : i32
    return %c0_i32, %c0_i32_0 : i32, i32
  }
  func.func @transform_21(%arg0: i32) -> (i32, i32) {
    %c0_i32 = arith.constant 0 : i32
    %c0_i32_0 = arith.constant 0 : i32
    %c0_i32_1 = arith.constant 0 : i32
    return %c0_i32, %c0_i32_0 : i32, i32
  }
  func.func @transform_22(%arg0: i32) -> (i32, i32) {
    %c0_i32 = arith.constant 0 : i32
    %c0_i32_0 = arith.constant 0 : i32
    %c0_i32_1 = arith.constant 0 : i32
    return %c0_i32, %c0_i32_0 : i32, i32
  }
  func.func @transform_23(%arg0: i32) -> (i32, i32) {
    %c0_i32 = arith.constant 0 : i32
    %c0_i32_0 = arith.constant 0 : i32
    return %arg0, %c0_i32 : i32, i32
  }
}

</mosaic_0001>

<bundles_post_ra>
// kernel: _lambda_.9
= control target key start
LH: loop header
LB: loop body
LE: loop exit
PB: predicated region body
PF: predicated region fallthrough
CT: control target
= control target key end

     0   :  { %s1254_s12 = smov 0   ;;  %s1482_s0 = inlined_call_operand.vmem [shape: bf16[1024,27], index: 0, kind: input, shape index: {}]   ;;  %s1483_s1 = inlined_call_operand.vmem [shape: bf16[27,128], index: 1, kind: input, shape index: {}]   ;;  %s1484_s2 = inlined_call_operand.vmem [shape: f32[1,128], index: 2, kind: input, shape index: {}]   ;;  %s1485_s3 = inlined_call_operand.vmem [shape: f32[1024,128], index: 3, kind: output, shape index: {}]  }
   0x1 LB: > { %s998_s13 = sadd.s32 4294967295, %s1231_s12   ;;  %p1002_p0 = scmp.ge.s32.totalorder %s1231_s12, 1  ;;  %s1231_s12 = sphi %s1254_s12, %s13_s12  }
   0x2   : > { %p138_p1 = scmp.lt.s32.totalorder %s1231_s12, 3 }
   0x4   : > { %p139_p2 = pnand %p1002_p0, %p138_p1 }
   0x5   : > { %s1003_s16 = sshll.u32 (!%p139_p2), %s998_s13, 6 }
   0x6   : > { %142 = sbr.rel (%p139_p2) target bundleno = 284 (0x11c), region = 32  ;;  %p163_p3 = scmp.lt.s32.totalorder (!%p139_p2), %s1003_s16, 127 }
   0xb   : > { %v1191_v0 = vld [vmem:[%s1483_s1 + $0x8] sm:$0x3f]   ;;  %vm518_vm0 = vcmask 1044480   ;;  %vm519_vm1 = vcmask 1045504   ;;  %v1233_v1 = vmov 65535   ;;  %v1192_v5 = vld [vmem:[%s1483_s1] sm:$0xff]  }
   0xc   : > { %v520_v2 = vsel %vm518_vm0, 4294967295, %v1233_v1  ;;  %s1487_s16 = smov (!%p163_p3, %s1003_s16), 127  ;;  %vm421_vm2 = vcmask 220160   ;;  %v1343_v38 = vld [vmem:[%s1484_s2] ss:$0 sm:$0xff] }
   0xd   : > { %v521_v3 = vsel %vm519_vm1, %v520_v2, 0  ;;  %s1004_s19 = sshll.u32 %s1487_s16, 2  ;;  %s1006_s25 = sshll.u32 %s1487_s16, 3 }
   0xe   : > { %v523_v4 = vand.u32 %v1191_v0, %v521_v3  ;;  %s1274_s22 = scalar_lea.vmem %s1482_s0, %s1004_s19  ;;  %s1351_s28 = scalar_lea.vmem %s1485_s3, %s1006_s25 }
   0xf   : > { %v1193_v6 = vld [vmem:[%s1274_s22] sm:$0xff]   ;;  %v1195_v8 = vld [vmem:[%s1274_s22 + $0x8] sm:$0xff]   ;;  %v1197_v10 = vld [vmem:[%s1274_s22 + $0x10] sm:$0xff]  }
  0x10   : > { %1110 = vmatprep.subr.bf16.mxu0 %v523_v4  ;;  %1178 = vmatprep.subr.bf16.mxu1 %v523_v4  ;;  %v1194_v7 = vld [vmem:[%s1274_s22 + $0x80] sm:$0xff]   ;;  %v1196_v9 = vld [vmem:[%s1274_s22 + $0x88] sm:$0xff]   ;;  %v1198_v11 = vld [vmem:[%s1274_s22 + $0x90] sm:$0xff]  }
  0x11   : > { %1111 = vmatpush3.bf16.msra.mxu0 %v523_v4  ;;  %1180 = vmatpush3.bf16.msra.mxu1 %v523_v4  ;;  %v1199_v12 = vld [vmem:[%s1274_s22 + $0x18] sm:$0xff]   ;;  %v1201_v14 = vld [vmem:[%s1274_s22 + $0x20] sm:$0xff]   ;;  %v1203_v16 = vld [vmem:[%s1274_s22 + $0x28] sm:$0xff]  }
  0x12   : > { %1112 = vmatprep.subr.bf16.mxu0 %v1192_v5  ;;  %1179 = vmatprep.subr.bf16.mxu1 %v1192_v5  ;;  %v1200_v13 = vld [vmem:[%s1274_s22 + $0x98] sm:$0xff]   ;;  %v1202_v15 = vld [vmem:[%s1274_s22 + $0xa0] sm:$0xff]   ;;  %v1204_v17 = vld [vmem:[%s1274_s22 + $0xa8] sm:$0xff]  }
  0x13   : > { %1114 = vmatprep.mubr.msk.bf16.mxu0 %vm421_vm2, %v1193_v6  ;;  %1146 = vmatprep.mubr.msk.bf16.mxu1 %vm421_vm2, %v1194_v7  ;;  %v1205_v18 = vld [vmem:[%s1274_s22 + $0x30] sm:$0xff]   ;;  %v1207_v20 = vld [vmem:[%s1274_s22 + $0x38] sm:$0xff]   ;;  %v1209_v22 = vld [vmem:[%s1274_s22 + $0x40] sm:$0xff]  }
  0x14   : > { %v1206_v19 = vld [vmem:[%s1274_s22 + $0xb0] sm:$0xff]   ;;  %v1208_v21 = vld [vmem:[%s1274_s22 + $0xb8] sm:$0xff]   ;;  %v1210_v23 = vld [vmem:[%s1274_s22 + $0xc0] sm:$0xff]  }
  0x15   : > { %1113 = vmatpush3.bf16.msra.mxu0 %v1192_v5  ;;  %1181 = vmatpush3.bf16.msra.mxu1 %v1192_v5  ;;  %v1211_v24 = vld [vmem:[%s1274_s22 + $0x48] sm:$0xff]   ;;  %v1213_v26 = vld [vmem:[%s1274_s22 + $0x50] sm:$0xff]   ;;  %v1215_v28 = vld [vmem:[%s1274_s22 + $0x58] sm:$0xff]  }
  0x16   : > { %v1212_v25 = vld [vmem:[%s1274_s22 + $0xc8] sm:$0xff]   ;;  %v1214_v27 = vld [vmem:[%s1274_s22 + $0xd0] sm:$0xff]   ;;  %v1216_v29 = vld [vmem:[%s1274_s22 + $0xd8] sm:$0xff]  }
  0x17   : > { %v1217_v30 = vld [vmem:[%s1274_s22 + $0x60] sm:$0xff]   ;;  %v1219_v32 = vld [vmem:[%s1274_s22 + $0x68] sm:$0xff]   ;;  %v1221_v34 = vld [vmem:[%s1274_s22 + $0x70] sm:$0xff]  }
  0x18   : > { %1115 = vmatmul.mubr.msk.bf16.vlgmr.msra.gmra.mxu0 %vm421_vm2, %v1195_v8  ;;  %1147 = vmatmul.mubr.msk.bf16.vlgmr.msra.gmra.mxu1 %vm421_vm2, %v1196_v9  ;;  %v1218_v31 = vld [vmem:[%s1274_s22 + $0xe0] sm:$0xff]   ;;  %v1220_v33 = vld [vmem:[%s1274_s22 + $0xe8] sm:$0xff]   ;;  %v1222_v35 = vld [vmem:[%s1274_s22 + $0xf0] sm:$0xff]  }
  0x19   : > { %1118 = vmatprep.mubr.msk.bf16.mxu0 %vm421_vm2, %v1197_v10  ;;  %1150 = vmatprep.mubr.msk.bf16.mxu1 %vm421_vm2, %v1198_v11  ;;  %v1223_v36 = vld [vmem:[%s1274_s22 + $0x78] sm:$0xff]  }
  0x1a   : > { %v1224_v37 = vld [vmem:[%s1274_s22 + $0xf8] sm:$0xff]  }
  0x20   : > { %1119 = vmatmul.mubr.msk.bf16.gmra.mxu0 %vm421_vm2, %v1199_v12  ;;  %1151 = vmatmul.mubr.msk.bf16.gmra.mxu1 %vm421_vm2, %v1200_v13 }
  0x21   : > { %1122 = vmatprep.mubr.msk.bf16.mxu0 %vm421_vm2, %v1201_v14  ;;  %1154 = vmatprep.mubr.msk.bf16.mxu1 %vm421_vm2, %v1202_v15 }
  0x28   : > { %1123 = vmatmul.mubr.msk.bf16.gmra.mxu0 %vm421_vm2, %v1203_v16  ;;  %1155 = vmatmul.mubr.msk.bf16.gmra.mxu1 %vm421_vm2, %v1204_v17 }
  0x29   : > { %1126 = vmatprep.mubr.msk.bf16.mxu0 %vm421_vm2, %v1205_v18  ;;  %1158 = vmatprep.mubr.msk.bf16.mxu1 %vm421_vm2, %v1206_v19 }
  0x30   : > { %1127 = vmatmul.mubr.msk.bf16.gmra.mxu0 %vm421_vm2, %v1207_v20  ;;  %1159 = vmatmul.mubr.msk.bf16.gmra.mxu1 %vm421_vm2, %v1208_v21 }
  0x31   : > { %1130 = vmatprep.mubr.msk.bf16.mxu0 %vm421_vm2, %v1209_v22  ;;  %1162 = vmatprep.mubr.msk.bf16.mxu1 %vm421_vm2, %v1210_v23 }
  0x38   : > { %1131 = vmatmul.mubr.msk.bf16.gmra.mxu0 %vm421_vm2, %v1211_v24  ;;  %1163 = vmatmul.mubr.msk.bf16.gmra.mxu1 %vm421_vm2, %v1212_v25 }
  0x39   : > { %1134 = vmatprep.mubr.msk.bf16.mxu0 %vm421_vm2, %v1213_v26  ;;  %1166 = vmatprep.mubr.msk.bf16.mxu1 %vm421_vm2, %v1214_v27 }
  0x40   : > { %1135 = vmatmul.mubr.msk.bf16.gmra.mxu0 %vm421_vm2, %v1215_v28  ;;  %1167 = vmatmul.mubr.msk.bf16.gmra.mxu1 %vm421_vm2, %v1216_v29 }
  0x41   : > { %1138 = vmatprep.mubr.msk.bf16.mxu0 %vm421_vm2, %v1217_v30  ;;  %1170 = vmatprep.mubr.msk.bf16.mxu1 %vm421_vm2, %v1218_v31 }
  0x48   : > { %1139 = vmatmul.mubr.msk.bf16.gmra.mxu0 %vm421_vm2, %v1219_v32  ;;  %1171 = vmatmul.mubr.msk.bf16.gmra.mxu1 %vm421_vm2, %v1220_v33 }
  0x49   : > { %1142 = vmatprep.mubr.msk.bf16.mxu0 %vm421_vm2, %v1221_v34  ;;  %1174 = vmatprep.mubr.msk.bf16.mxu1 %vm421_vm2, %v1222_v35 }
  0x50   : > { %1143 = vmatmul.mubr.msk.bf16.gmra.mxu0 %vm421_vm2, %v1223_v36  ;;  %1175 = vmatmul.mubr.msk.bf16.gmra.mxu1 %vm421_vm2, %v1224_v37 }
  0xd8   : > { %v1116_v39 = vpop.f32.mrf.mxu0  ;;  %v1148_v40 = vpop.f32.mrf.mxu1 }
  0xd9   : > { %v568_v41 = vadd.f32 %v1116_v39, %v1343_v38  ;;  %v696_v42 = vadd.f32 %v1148_v40, %v1343_v38 }
  0xda   : > { %v559_v43 = vpop.f32.mrf.mxu0  ;;  %v687_v44 = vpop.f32.mrf.mxu1 }
  0xdb   : > { %v816_v45 = vmax.f32 %v568_v41, 0.0  ;;  %v848_v46 = vmax.f32 %v696_v42, 0.0  ;;  %v560_v47 = vadd.f32 %v1343_v38, %v559_v43  ;;  %v688_v48 = vadd.f32 %v1343_v38, %v687_v44 }
  0xdc   : > { %v1117_v49 = vpop.f32.mrf.mxu0  ;;  %v1149_v50 = vpop.f32.mrf.mxu1 }
  0xdd   : > { %880 = vst [vmem:[%s1351_s28 + $0x10] sm:$0xff] %v816_v45  ;;  %912 = vst [vmem:[%s1351_s28 + $0x110] sm:$0xff] %v848_v46  ;;  %v814_v51 = vmax.f32 %v560_v47, 0.0  ;;  %v846_v52 = vmax.f32 %v688_v48, 0.0  ;;  %v571_v53 = vadd.f32 %v1117_v49, %v1343_v38  ;;  %v699_v54 = vadd.f32 %v1149_v50, %v1343_v38 }
  0xde   : > { %v562_v55 = vpop.f32.mrf.mxu0  ;;  %v690_v56 = vpop.f32.mrf.mxu1 }
  0xdf   : > { %878 = vst [vmem:[%s1351_s28] sm:$0xff] %v814_v51  ;;  %910 = vst [vmem:[%s1351_s28 + $0x100] sm:$0xff] %v846_v52  ;;  %v817_v57 = vmax.f32 %v571_v53, 0.0  ;;  %v849_v58 = vmax.f32 %v699_v54, 0.0  ;;  %v563_v59 = vadd.f32 %v1343_v38, %v562_v55  ;;  %v691_v60 = vadd.f32 %v1343_v38, %v690_v56 }
  0xe0   : > { %v1120_v61 = vpop.f32.mrf.mxu0  ;;  %v1152_v62 = vpop.f32.mrf.mxu1 }
  0xe1   : > { %881 = vst [vmem:[%s1351_s28 + $0x18] sm:$0xff] %v817_v57  ;;  %913 = vst [vmem:[%s1351_s28 + $0x118] sm:$0xff] %v849_v58  ;;  %v815_v63 = vmax.f32 %v563_v59, 0.0  ;;  %v847_v0 = vmax.f32 %v691_v60, 0.0  ;;  %v584_v1 = vadd.f32 %v1120_v61, %v1343_v38  ;;  %v712_v2 = vadd.f32 %v1152_v62, %v1343_v38 }
  0xe2   : > { %v575_v3 = vpop.f32.mrf.mxu0  ;;  %v703_v4 = vpop.f32.mrf.mxu1 }
  0xe3   : > { %879 = vst [vmem:[%s1351_s28 + $0x8] sm:$0xff] %v815_v63  ;;  %911 = vst [vmem:[%s1351_s28 + $0x108] sm:$0xff] %v847_v0  ;;  %v820_v5 = vmax.f32 %v584_v1, 0.0  ;;  %v852_v6 = vmax.f32 %v712_v2, 0.0  ;;  %v576_v7 = vadd.f32 %v1343_v38, %v575_v3  ;;  %v704_v8 = vadd.f32 %v1343_v38, %v703_v4 }
  0xe4   : > { %v1121_v9 = vpop.f32.mrf.mxu0  ;;  %v1153_v10 = vpop.f32.mrf.mxu1 }
  0xe5   : > { %884 = vst [vmem:[%s1351_s28 + $0x30] sm:$0xff] %v820_v5  ;;  %916 = vst [vmem:[%s1351_s28 + $0x130] sm:$0xff] %v852_v6  ;;  %v818_v11 = vmax.f32 %v576_v7, 0.0  ;;  %v850_v12 = vmax.f32 %v704_v8, 0.0  ;;  %v587_v13 = vadd.f32 %v1121_v9, %v1343_v38  ;;  %v715_v14 = vadd.f32 %v1153_v10, %v1343_v38 }
  0xe6   : > { %v578_v15 = vpop.f32.mrf.mxu0  ;;  %v706_v16 = vpop.f32.mrf.mxu1 }
  0xe7   : > { %882 = vst [vmem:[%s1351_s28 + $0x20] sm:$0xff] %v818_v11  ;;  %914 = vst [vmem:[%s1351_s28 + $0x120] sm:$0xff] %v850_v12  ;;  %v821_v17 = vmax.f32 %v587_v13, 0.0  ;;  %v853_v18 = vmax.f32 %v715_v14, 0.0  ;;  %v579_v19 = vadd.f32 %v1343_v38, %v578_v15  ;;  %v707_v20 = vadd.f32 %v1343_v38, %v706_v16 }
  0xe8   : > { %v1124_v21 = vpop.f32.mrf.mxu0  ;;  %v1156_v22 = vpop.f32.mrf.mxu1 }
  0xe9   : > { %885 = vst [vmem:[%s1351_s28 + $0x38] sm:$0xff] %v821_v17  ;;  %917 = vst [vmem:[%s1351_s28 + $0x138] sm:$0xff] %v853_v18  ;;  %v819_v23 = vmax.f32 %v579_v19, 0.0  ;;  %v851_v24 = vmax.f32 %v707_v20, 0.0  ;;  %v600_v25 = vadd.f32 %v1124_v21, %v1343_v38  ;;  %v728_v26 = vadd.f32 %v1156_v22, %v1343_v38 }
  0xea   : > { %v591_v27 = vpop.f32.mrf.mxu0  ;;  %v719_v28 = vpop.f32.mrf.mxu1 }
  0xeb   : > { %883 = vst [vmem:[%s1351_s28 + $0x28] sm:$0xff] %v819_v23  ;;  %915 = vst [vmem:[%s1351_s28 + $0x128] sm:$0xff] %v851_v24  ;;  %v824_v29 = vmax.f32 %v600_v25, 0.0  ;;  %v856_v30 = vmax.f32 %v728_v26, 0.0  ;;  %v592_v31 = vadd.f32 %v1343_v38, %v591_v27  ;;  %v720_v32 = vadd.f32 %v1343_v38, %v719_v28 }
  0xec   : > { %v1125_v33 = vpop.f32.mrf.mxu0  ;;  %v1157_v34 = vpop.f32.mrf.mxu1 }
  0xed   : > { %888 = vst [vmem:[%s1351_s28 + $0x50] sm:$0xff] %v824_v29  ;;  %920 = vst [vmem:[%s1351_s28 + $0x150] sm:$0xff] %v856_v30  ;;  %v822_v35 = vmax.f32 %v592_v31, 0.0  ;;  %v854_v36 = vmax.f32 %v720_v32, 0.0  ;;  %v603_v37 = vadd.f32 %v1125_v33, %v1343_v38  ;;  %v731_v39 = vadd.f32 %v1157_v34, %v1343_v38 }
  0xee   : > { %v594_v40 = vpop.f32.mrf.mxu0  ;;  %v722_v41 = vpop.f32.mrf.mxu1 }
  0xef   : > { %886 = vst [vmem:[%s1351_s28 + $0x40] sm:$0xff] %v822_v35  ;;  %918 = vst [vmem:[%s1351_s28 + $0x140] sm:$0xff] %v854_v36  ;;  %v825_v42 = vmax.f32 %v603_v37, 0.0  ;;  %v857_v43 = vmax.f32 %v731_v39, 0.0  ;;  %v595_v44 = vadd.f32 %v1343_v38, %v594_v40  ;;  %v723_v45 = vadd.f32 %v1343_v38, %v722_v41 }
  0xf0   : > { %v1128_v46 = vpop.f32.mrf.mxu0  ;;  %v1160_v47 = vpop.f32.mrf.mxu1 }
  0xf1   : > { %889 = vst [vmem:[%s1351_s28 + $0x58] sm:$0xff] %v825_v42  ;;  %921 = vst [vmem:[%s1351_s28 + $0x158] sm:$0xff] %v857_v43  ;;  %v823_v48 = vmax.f32 %v595_v44, 0.0  ;;  %v855_v49 = vmax.f32 %v723_v45, 0.0  ;;  %v616_v50 = vadd.f32 %v1128_v46, %v1343_v38  ;;  %v744_v51 = vadd.f32 %v1160_v47, %v1343_v38 }
  0xf2   : > { %v607_v52 = vpop.f32.mrf.mxu0  ;;  %v735_v53 = vpop.f32.mrf.mxu1 }
  0xf3   : > { %887 = vst [vmem:[%s1351_s28 + $0x48] sm:$0xff] %v823_v48  ;;  %919 = vst [vmem:[%s1351_s28 + $0x148] sm:$0xff] %v855_v49  ;;  %v828_v54 = vmax.f32 %v616_v50, 0.0  ;;  %v860_v55 = vmax.f32 %v744_v51, 0.0  ;;  %v608_v56 = vadd.f32 %v1343_v38, %v607_v52  ;;  %v736_v57 = vadd.f32 %v1343_v38, %v735_v53 }
  0xf4   : > { %v1129_v58 = vpop.f32.mrf.mxu0  ;;  %v1161_v59 = vpop.f32.mrf.mxu1 }
  0xf5   : > { %892 = vst [vmem:[%s1351_s28 + $0x70] sm:$0xff] %v828_v54  ;;  %924 = vst [vmem:[%s1351_s28 + $0x170] sm:$0xff] %v860_v55  ;;  %v826_v60 = vmax.f32 %v608_v56, 0.0  ;;  %v858_v61 = vmax.f32 %v736_v57, 0.0  ;;  %v619_v62 = vadd.f32 %v1129_v58, %v1343_v38  ;;  %v747_v63 = vadd.f32 %v1161_v59, %v1343_v38 }
  0xf6   : > { %v610_v0 = vpop.f32.mrf.mxu0  ;;  %v738_v1 = vpop.f32.mrf.mxu1 }
  0xf7   : > { %890 = vst [vmem:[%s1351_s28 + $0x60] sm:$0xff] %v826_v60  ;;  %922 = vst [vmem:[%s1351_s28 + $0x160] sm:$0xff] %v858_v61  ;;  %v829_v2 = vmax.f32 %v619_v62, 0.0  ;;  %v861_v3 = vmax.f32 %v747_v63, 0.0  ;;  %v611_v4 = vadd.f32 %v1343_v38, %v610_v0  ;;  %v739_v5 = vadd.f32 %v1343_v38, %v738_v1 }
  0xf8   : > { %v1132_v6 = vpop.f32.mrf.mxu0  ;;  %v1164_v7 = vpop.f32.mrf.mxu1 }
  0xf9   : > { %893 = vst [vmem:[%s1351_s28 + $0x78] sm:$0xff] %v829_v2  ;;  %925 = vst [vmem:[%s1351_s28 + $0x178] sm:$0xff] %v861_v3  ;;  %v827_v8 = vmax.f32 %v611_v4, 0.0  ;;  %v859_v9 = vmax.f32 %v739_v5, 0.0  ;;  %v632_v10 = vadd.f32 %v1132_v6, %v1343_v38  ;;  %v760_v11 = vadd.f32 %v1164_v7, %v1343_v38 }
  0xfa   : > { %v623_v12 = vpop.f32.mrf.mxu0  ;;  %v751_v13 = vpop.f32.mrf.mxu1 }
  0xfb   : > { %891 = vst [vmem:[%s1351_s28 + $0x68] sm:$0xff] %v827_v8  ;;  %923 = vst [vmem:[%s1351_s28 + $0x168] sm:$0xff] %v859_v9  ;;  %v832_v14 = vmax.f32 %v632_v10, 0.0  ;;  %v864_v15 = vmax.f32 %v760_v11, 0.0  ;;  %v624_v16 = vadd.f32 %v1343_v38, %v623_v12  ;;  %v752_v17 = vadd.f32 %v1343_v38, %v751_v13 }
  0xfc   : > { %v1133_v18 = vpop.f32.mrf.mxu0  ;;  %v1165_v19 = vpop.f32.mrf.mxu1 }
  0xfd   : > { %896 = vst [vmem:[%s1351_s28 + $0x90] sm:$0xff] %v832_v14  ;;  %928 = vst [vmem:[%s1351_s28 + $0x190] sm:$0xff] %v864_v15  ;;  %v830_v20 = vmax.f32 %v624_v16, 0.0  ;;  %v862_v21 = vmax.f32 %v752_v17, 0.0  ;;  %v635_v22 = vadd.f32 %v1133_v18, %v1343_v38  ;;  %v763_v23 = vadd.f32 %v1165_v19, %v1343_v38 }
  0xfe   : > { %v626_v24 = vpop.f32.mrf.mxu0  ;;  %v754_v25 = vpop.f32.mrf.mxu1 }
  0xff   : > { %894 = vst [vmem:[%s1351_s28 + $0x80] sm:$0xff] %v830_v20  ;;  %926 = vst [vmem:[%s1351_s28 + $0x180] sm:$0xff] %v862_v21  ;;  %v833_v26 = vmax.f32 %v635_v22, 0.0  ;;  %v865_v27 = vmax.f32 %v763_v23, 0.0  ;;  %v627_v28 = vadd.f32 %v1343_v38, %v626_v24  ;;  %v755_v29 = vadd.f32 %v1343_v38, %v754_v25 }
 0x100   : > { %v1136_v30 = vpop.f32.mrf.mxu0  ;;  %v1168_v31 = vpop.f32.mrf.mxu1 }
 0x101   : > { %897 = vst [vmem:[%s1351_s28 + $0x98] sm:$0xff] %v833_v26  ;;  %929 = vst [vmem:[%s1351_s28 + $0x198] sm:$0xff] %v865_v27  ;;  %v831_v32 = vmax.f32 %v627_v28, 0.0  ;;  %v863_v33 = vmax.f32 %v755_v29, 0.0  ;;  %v648_v34 = vadd.f32 %v1136_v30, %v1343_v38  ;;  %v776_v35 = vadd.f32 %v1168_v31, %v1343_v38 }
 0x102   : > { %v639_v36 = vpop.f32.mrf.mxu0  ;;  %v767_v37 = vpop.f32.mrf.mxu1 }
 0x103   : > { %895 = vst [vmem:[%s1351_s28 + $0x88] sm:$0xff] %v831_v32  ;;  %927 = vst [vmem:[%s1351_s28 + $0x188] sm:$0xff] %v863_v33  ;;  %v836_v39 = vmax.f32 %v648_v34, 0.0  ;;  %v868_v40 = vmax.f32 %v776_v35, 0.0  ;;  %v640_v41 = vadd.f32 %v1343_v38, %v639_v36  ;;  %v768_v42 = vadd.f32 %v1343_v38, %v767_v37 }
 0x104   : > { %v1137_v43 = vpop.f32.mrf.mxu0  ;;  %v1169_v44 = vpop.f32.mrf.mxu1 }
 0x105   : > { %900 = vst [vmem:[%s1351_s28 + $0xb0] sm:$0xff] %v836_v39  ;;  %932 = vst [vmem:[%s1351_s28 + $0x1b0] sm:$0xff] %v868_v40  ;;  %v834_v45 = vmax.f32 %v640_v41, 0.0  ;;  %v866_v46 = vmax.f32 %v768_v42, 0.0  ;;  %v651_v47 = vadd.f32 %v1137_v43, %v1343_v38  ;;  %v779_v48 = vadd.f32 %v1169_v44, %v1343_v38 }
 0x106   : > { %v642_v49 = vpop.f32.mrf.mxu0  ;;  %v770_v50 = vpop.f32.mrf.mxu1 }
 0x107   : > { %898 = vst [vmem:[%s1351_s28 + $0xa0] sm:$0xff] %v834_v45  ;;  %930 = vst [vmem:[%s1351_s28 + $0x1a0] sm:$0xff] %v866_v46  ;;  %v837_v51 = vmax.f32 %v651_v47, 0.0  ;;  %v869_v52 = vmax.f32 %v779_v48, 0.0  ;;  %v643_v53 = vadd.f32 %v1343_v38, %v642_v49  ;;  %v771_v54 = vadd.f32 %v1343_v38, %v770_v50 }
 0x108   : > { %v1140_v55 = vpop.f32.mrf.mxu0  ;;  %v1172_v56 = vpop.f32.mrf.mxu1 }
 0x109   : > { %901 = vst [vmem:[%s1351_s28 + $0xb8] sm:$0xff] %v837_v51  ;;  %933 = vst [vmem:[%s1351_s28 + $0x1b8] sm:$0xff] %v869_v52  ;;  %v835_v57 = vmax.f32 %v643_v53, 0.0  ;;  %v867_v58 = vmax.f32 %v771_v54, 0.0  ;;  %v664_v59 = vadd.f32 %v1140_v55, %v1343_v38  ;;  %v792_v60 = vadd.f32 %v1172_v56, %v1343_v38 }
 0x10a   : > { %v655_v61 = vpop.f32.mrf.mxu0  ;;  %v783_v62 = vpop.f32.mrf.mxu1 }
 0x10b   : > { %899 = vst [vmem:[%s1351_s28 + $0xa8] sm:$0xff] %v835_v57  ;;  %931 = vst [vmem:[%s1351_s28 + $0x1a8] sm:$0xff] %v867_v58  ;;  %v840_v63 = vmax.f32 %v664_v59, 0.0  ;;  %v872_v0 = vmax.f32 %v792_v60, 0.0  ;;  %v656_v1 = vadd.f32 %v1343_v38, %v655_v61  ;;  %v784_v2 = vadd.f32 %v1343_v38, %v783_v62 }
 0x10c   : > { %v1141_v3 = vpop.f32.mrf.mxu0  ;;  %v1173_v4 = vpop.f32.mrf.mxu1 }
 0x10d   : > { %904 = vst [vmem:[%s1351_s28 + $0xd0] sm:$0xff] %v840_v63  ;;  %936 = vst [vmem:[%s1351_s28 + $0x1d0] sm:$0xff] %v872_v0  ;;  %v838_v5 = vmax.f32 %v656_v1, 0.0  ;;  %v870_v6 = vmax.f32 %v784_v2, 0.0  ;;  %v667_v7 = vadd.f32 %v1141_v3, %v1343_v38  ;;  %v795_v8 = vadd.f32 %v1173_v4, %v1343_v38 }
 0x10e   : > { %v658_v9 = vpop.f32.mrf.mxu0  ;;  %v786_v10 = vpop.f32.mrf.mxu1 }
 0x10f   : > { %902 = vst [vmem:[%s1351_s28 + $0xc0] sm:$0xff] %v838_v5  ;;  %934 = vst [vmem:[%s1351_s28 + $0x1c0] sm:$0xff] %v870_v6  ;;  %v841_v11 = vmax.f32 %v667_v7, 0.0  ;;  %v873_v12 = vmax.f32 %v795_v8, 0.0  ;;  %v659_v13 = vadd.f32 %v1343_v38, %v658_v9  ;;  %v787_v14 = vadd.f32 %v1343_v38, %v786_v10 }
 0x110   : > { %v1144_v15 = vpop.f32.mrf.mxu0  ;;  %v1176_v16 = vpop.f32.mrf.mxu1 }
 0x111   : > { %905 = vst [vmem:[%s1351_s28 + $0xd8] sm:$0xff] %v841_v11  ;;  %937 = vst [vmem:[%s1351_s28 + $0x1d8] sm:$0xff] %v873_v12  ;;  %v839_v17 = vmax.f32 %v659_v13, 0.0  ;;  %v871_v18 = vmax.f32 %v787_v14, 0.0  ;;  %v680_v19 = vadd.f32 %v1144_v15, %v1343_v38  ;;  %v808_v20 = vadd.f32 %v1176_v16, %v1343_v38 }
 0x112   : > { %v671_v21 = vpop.f32.mrf.mxu0  ;;  %v799_v22 = vpop.f32.mrf.mxu1 }
 0x113   : > { %903 = vst [vmem:[%s1351_s28 + $0xc8] sm:$0xff] %v839_v17  ;;  %935 = vst [vmem:[%s1351_s28 + $0x1c8] sm:$0xff] %v871_v18  ;;  %v844_v23 = vmax.f32 %v680_v19, 0.0  ;;  %v876_v24 = vmax.f32 %v808_v20, 0.0  ;;  %v672_v25 = vadd.f32 %v1343_v38, %v671_v21  ;;  %v800_v26 = vadd.f32 %v1343_v38, %v799_v22 }
 0x114   : > { %v1145_v27 = vpop.f32.mrf.mxu0  ;;  %v1177_v28 = vpop.f32.mrf.mxu1 }
 0x115   : > { %908 = vst [vmem:[%s1351_s28 + $0xf0] sm:$0xff] %v844_v23  ;;  %940 = vst [vmem:[%s1351_s28 + $0x1f0] sm:$0xff] %v876_v24  ;;  %v842_v29 = vmax.f32 %v672_v25, 0.0  ;;  %v874_v30 = vmax.f32 %v800_v26, 0.0  ;;  %v683_v31 = vadd.f32 %v1145_v27, %v1343_v38  ;;  %v811_v32 = vadd.f32 %v1177_v28, %v1343_v38 }
 0x116   : > { %v674_v33 = vpop.f32.mrf.mxu0  ;;  %v802_v34 = vpop.f32.mrf.mxu1 }
 0x117   : > { %906 = vst [vmem:[%s1351_s28 + $0xe0] sm:$0xff] %v842_v29  ;;  %938 = vst [vmem:[%s1351_s28 + $0x1e0] sm:$0xff] %v874_v30  ;;  %v845_v35 = vmax.f32 %v683_v31, 0.0  ;;  %v877_v36 = vmax.f32 %v811_v32, 0.0  ;;  %v675_v37 = vadd.f32 %v1343_v38, %v674_v33  ;;  %v803_v39 = vadd.f32 %v1343_v38, %v802_v34 }
 0x119   : > { %909 = vst [vmem:[%s1351_s28 + $0xf8] sm:$0xff] %v845_v35  ;;  %941 = vst [vmem:[%s1351_s28 + $0x1f8] sm:$0xff] %v877_v36  ;;  %v843_v40 = vmax.f32 %v675_v37, 0.0  ;;  %v875_v41 = vmax.f32 %v803_v39, 0.0 }
 0x11b   : > { %907 = vst [vmem:[%s1351_s28 + $0xe8] sm:$0xff] %v843_v40  ;;  %939 = vst [vmem:[%s1351_s28 + $0x1e8] sm:$0xff] %v875_v41 }
 0x11c PF: > { %s13_s12 = sadd.s32 1, %s1231_s12  }
 0x11d   : > { %p10_p4 = scmp.ge.s32.totalorder %s13_s12, 4  }
 0x11f   :  { %12 = sbr.rel (!%p10_p4) target bundleno = 1 (0x1), region = 62 }

// kernel: _lambda_.10
= control target key start
LH: loop header
LB: loop body
LE: loop exit
PB: predicated region body
PF: predicated region fallthrough
CT: control target
= control target key end

     0   :  { %vm219_vm0 = vcmask 1043456   ;;  %vm170_vm1 = vcmask 588800   ;;  %s818_s1 = inlined_call_operand.vmem [shape: bf16[72,128], index: 1, kind: input, shape index: {}]   ;;  %s819_s0 = inlined_call_operand.vmem [shape: bf16[256,72], index: 0, kind: input, shape index: {}]   ;;  %s820_s2 = inlined_call_operand.vmem [shape: f32[1,128], index: 2, kind: input, shape index: {}]   ;;  %s821_s3 = inlined_call_operand.vmem [shape: f32[256,128], index: 3, kind: output, shape index: {}]  }
   0x1   :  { %v565_v0 = vld [vmem:[%s818_s1 + $0x20] ss:$0 sps:$4 sm:$0xff]   ;;  %v566_v1 = vld [vmem:[%s818_s1 + $0x18] sm:$0xff]   ;;  %v567_v3 = vld [vmem:[%s818_s1 + $0x10] sm:$0xff]  }
   0x2   :  { %563 = vmatprep.subr.msk.bf16.mxu0 %vm219_vm0, %v565_v0  ;;  %564 = vmatprep.subr.msk.bf16.mxu1 %vm219_vm0, %v565_v0  ;;  %v221_v2 = vsel %vm219_vm0, %v565_v0, 0  ;;  %v570_v4 = vld [vmem:[%s819_s0] sm:$0xff]   ;;  %v568_v6 = vld [vmem:[%s818_s1 + $0x8] sm:$0xff]   ;;  %v574_v10 = vld [vmem:[%s819_s0 + $0x10] sm:$0xff]  }
   0x3   :  { %512 = vmatpush3.bf16.msra.mxu0 %v221_v2  ;;  %558 = vmatpush3.bf16.msra.mxu1 %v221_v2  ;;  %v571_v5 = vld [vmem:[%s819_s0 + $0x40] sm:$0xff]   ;;  %v572_v8 = vld [vmem:[%s819_s0 + $0x8] sm:$0xff]   ;;  %v575_v11 = vld [vmem:[%s819_s0 + $0x50] sm:$0xff]  }
   0x4   :  { %513 = vmatprep.subr.bf16.mxu0 %v566_v1  ;;  %554 = vmatprep.subr.bf16.mxu1 %v566_v1  ;;  %v569_v7 = vld [vmem:[%s818_s1] sm:$0xff]   ;;  %v573_v9 = vld [vmem:[%s819_s0 + $0x48] sm:$0xff]   ;;  %v576_v12 = vld [vmem:[%s819_s0 + $0x18] sm:$0xff]  }
   0x5   :  { %521 = vmatprep.mubr.msk.bf16.mxu0 %vm170_vm1, %v570_v4  ;;  %537 = vmatprep.mubr.msk.bf16.mxu1 %vm170_vm1, %v571_v5  ;;  %v577_v13 = vld [vmem:[%s819_s0 + $0x58] sm:$0xff]   ;;  %v578_v14 = vld [vmem:[%s819_s0 + $0x20] sm:$0xff]   ;;  %v580_v16 = vld [vmem:[%s819_s0 + $0x28] sm:$0xff]  }
   0x6   :  { %v579_v15 = vld [vmem:[%s819_s0 + $0x60] sm:$0xff]   ;;  %v581_v17 = vld [vmem:[%s819_s0 + $0x68] sm:$0xff]   ;;  %v582_v18 = vld [vmem:[%s819_s0 + $0x30] sm:$0xff]  }
   0x7   :  { %514 = vmatpush3.bf16.msra.mxu0 %v566_v1  ;;  %559 = vmatpush3.bf16.msra.mxu1 %v566_v1  ;;  %v583_v19 = vld [vmem:[%s819_s0 + $0x70] sm:$0xff]   ;;  %v584_v20 = vld [vmem:[%s819_s0 + $0x38] sm:$0xff]   ;;  %v688_v22 = vld [vmem:[%s820_s2] ss:$0 sm:$0xff] }
   0x8   :  { %515 = vmatprep.subr.bf16.mxu0 %v567_v3  ;;  %555 = vmatprep.subr.bf16.mxu1 %v567_v3  ;;  %v585_v21 = vld [vmem:[%s819_s0 + $0x78] sm:$0xff]  }
   0xb   :  { %516 = vmatpush3.bf16.msra.mxu0 %v567_v3  ;;  %560 = vmatpush3.bf16.msra.mxu1 %v567_v3 }
   0xc   :  { %517 = vmatprep.subr.bf16.mxu0 %v568_v6  ;;  %556 = vmatprep.subr.bf16.mxu1 %v568_v6 }
   0xf   :  { %518 = vmatpush3.bf16.msra.mxu0 %v568_v6  ;;  %561 = vmatpush3.bf16.msra.mxu1 %v568_v6 }
  0x10   :  { %519 = vmatprep.subr.bf16.mxu0 %v569_v7  ;;  %557 = vmatprep.subr.bf16.mxu1 %v569_v7 }
  0x13   :  { %520 = vmatpush3.bf16.msra.mxu0 %v569_v7  ;;  %562 = vmatpush3.bf16.msra.mxu1 %v569_v7 }
  0x16   :  { %522 = vmatmul.mubr.msk.bf16.vlgmr.msra.gmra.mxu0 %vm170_vm1, %v572_v8  ;;  %538 = vmatmul.mubr.msk.bf16.vlgmr.msra.gmra.mxu1 %vm170_vm1, %v573_v9 }
  0x17   :  { %525 = vmatprep.mubr.msk.bf16.mxu0 %vm170_vm1, %v574_v10  ;;  %541 = vmatprep.mubr.msk.bf16.mxu1 %vm170_vm1, %v575_v11 }
  0x1e   :  { %526 = vmatmul.mubr.msk.bf16.gmra.mxu0 %vm170_vm1, %v576_v12  ;;  %542 = vmatmul.mubr.msk.bf16.gmra.mxu1 %vm170_vm1, %v577_v13 }
  0x1f   :  { %529 = vmatprep.mubr.msk.bf16.mxu0 %vm170_vm1, %v578_v14  ;;  %545 = vmatprep.mubr.msk.bf16.mxu1 %vm170_vm1, %v579_v15 }
  0x26   :  { %530 = vmatmul.mubr.msk.bf16.gmra.mxu0 %vm170_vm1, %v580_v16  ;;  %546 = vmatmul.mubr.msk.bf16.gmra.mxu1 %vm170_vm1, %v581_v17 }
  0x27   :  { %533 = vmatprep.mubr.msk.bf16.mxu0 %vm170_vm1, %v582_v18  ;;  %549 = vmatprep.mubr.msk.bf16.mxu1 %vm170_vm1, %v583_v19 }
  0x2e   :  { %534 = vmatmul.mubr.msk.bf16.gmra.mxu0 %vm170_vm1, %v584_v20  ;;  %550 = vmatmul.mubr.msk.bf16.gmra.mxu1 %vm170_vm1, %v585_v21 }
  0xd6   :  { %v523_v23 = vpop.f32.mrf.mxu0  ;;  %v539_v24 = vpop.f32.mrf.mxu1 }
  0xd7   :  { %v266_v25 = vadd.f32 %v523_v23, %v688_v22  ;;  %v330_v26 = vadd.f32 %v539_v24, %v688_v22 }
  0xd8   :  { %v257_v27 = vpop.f32.mrf.mxu0  ;;  %v321_v28 = vpop.f32.mrf.mxu1 }
  0xd9   :  { %v386_v29 = vmax.f32 %v266_v25, 0.0  ;;  %v402_v30 = vmax.f32 %v330_v26, 0.0  ;;  %v258_v31 = vadd.f32 %v688_v22, %v257_v27  ;;  %v322_v32 = vadd.f32 %v688_v22, %v321_v28 }
  0xda   :  { %v524_v33 = vpop.f32.mrf.mxu0  ;;  %v540_v34 = vpop.f32.mrf.mxu1 }
  0xdb   :  { %418 = vst [vmem:[%s821_s3 + $0x10] sm:$0xff] %v386_v29  ;;  %434 = vst [vmem:[%s821_s3 + $0x90] sm:$0xff] %v402_v30  ;;  %v384_v35 = vmax.f32 %v258_v31, 0.0  ;;  %v400_v36 = vmax.f32 %v322_v32, 0.0  ;;  %v269_v37 = vadd.f32 %v524_v33, %v688_v22  ;;  %v333_v38 = vadd.f32 %v540_v34, %v688_v22 }
  0xdc   :  { %v260_v39 = vpop.f32.mrf.mxu0  ;;  %v324_v40 = vpop.f32.mrf.mxu1 }
  0xdd   :  { %416 = vst [vmem:[%s821_s3] sm:$0xff] %v384_v35  ;;  %432 = vst [vmem:[%s821_s3 + $0x80] sm:$0xff] %v400_v36  ;;  %v387_v41 = vmax.f32 %v269_v37, 0.0  ;;  %v403_v42 = vmax.f32 %v333_v38, 0.0  ;;  %v261_v43 = vadd.f32 %v688_v22, %v260_v39  ;;  %v325_v44 = vadd.f32 %v688_v22, %v324_v40 }
  0xde   :  { %v527_v45 = vpop.f32.mrf.mxu0  ;;  %v543_v46 = vpop.f32.mrf.mxu1 }
  0xdf   :  { %419 = vst [vmem:[%s821_s3 + $0x18] sm:$0xff] %v387_v41  ;;  %435 = vst [vmem:[%s821_s3 + $0x98] sm:$0xff] %v403_v42  ;;  %v385_v47 = vmax.f32 %v261_v43, 0.0  ;;  %v401_v48 = vmax.f32 %v325_v44, 0.0  ;;  %v282_v49 = vadd.f32 %v527_v45, %v688_v22  ;;  %v346_v50 = vadd.f32 %v543_v46, %v688_v22 }
  0xe0   :  { %v273_v51 = vpop.f32.mrf.mxu0  ;;  %v337_v52 = vpop.f32.mrf.mxu1 }
  0xe1   :  { %417 = vst [vmem:[%s821_s3 + $0x8] sm:$0xff] %v385_v47  ;;  %433 = vst [vmem:[%s821_s3 + $0x88] sm:$0xff] %v401_v48  ;;  %v390_v53 = vmax.f32 %v282_v49, 0.0  ;;  %v406_v54 = vmax.f32 %v346_v50, 0.0  ;;  %v274_v55 = vadd.f32 %v688_v22, %v273_v51  ;;  %v338_v56 = vadd.f32 %v688_v22, %v337_v52 }
  0xe2   :  { %v528_v57 = vpop.f32.mrf.mxu0  ;;  %v544_v58 = vpop.f32.mrf.mxu1 }
  0xe3   :  { %422 = vst [vmem:[%s821_s3 + $0x30] sm:$0xff] %v390_v53  ;;  %438 = vst [vmem:[%s821_s3 + $0xb0] sm:$0xff] %v406_v54  ;;  %v388_v59 = vmax.f32 %v274_v55, 0.0  ;;  %v404_v60 = vmax.f32 %v338_v56, 0.0  ;;  %v285_v61 = vadd.f32 %v528_v57, %v688_v22  ;;  %v349_v62 = vadd.f32 %v544_v58, %v688_v22 }
  0xe4   :  { %v276_v63 = vpop.f32.mrf.mxu0  ;;  %v340_v0 = vpop.f32.mrf.mxu1 }
  0xe5   :  { %420 = vst [vmem:[%s821_s3 + $0x20] sm:$0xff] %v388_v59  ;;  %436 = vst [vmem:[%s821_s3 + $0xa0] sm:$0xff] %v404_v60  ;;  %v391_v1 = vmax.f32 %v285_v61, 0.0  ;;  %v407_v2 = vmax.f32 %v349_v62, 0.0  ;;  %v277_v3 = vadd.f32 %v688_v22, %v276_v63  ;;  %v341_v4 = vadd.f32 %v688_v22, %v340_v0 }
  0xe6   :  { %v531_v5 = vpop.f32.mrf.mxu0  ;;  %v547_v6 = vpop.f32.mrf.mxu1 }
  0xe7   :  { %423 = vst [vmem:[%s821_s3 + $0x38] sm:$0xff] %v391_v1  ;;  %439 = vst [vmem:[%s821_s3 + $0xb8] sm:$0xff] %v407_v2  ;;  %v389_v7 = vmax.f32 %v277_v3, 0.0  ;;  %v405_v8 = vmax.f32 %v341_v4, 0.0  ;;  %v298_v9 = vadd.f32 %v531_v5, %v688_v22  ;;  %v362_v10 = vadd.f32 %v547_v6, %v688_v22 }
  0xe8   :  { %v289_v11 = vpop.f32.mrf.mxu0  ;;  %v353_v12 = vpop.f32.mrf.mxu1 }
  0xe9   :  { %421 = vst [vmem:[%s821_s3 + $0x28] sm:$0xff] %v389_v7  ;;  %437 = vst [vmem:[%s821_s3 + $0xa8] sm:$0xff] %v405_v8  ;;  %v394_v13 = vmax.f32 %v298_v9, 0.0  ;;  %v410_v14 = vmax.f32 %v362_v10, 0.0  ;;  %v290_v15 = vadd.f32 %v688_v22, %v289_v11  ;;  %v354_v16 = vadd.f32 %v688_v22, %v353_v12 }
  0xea   :  { %v532_v17 = vpop.f32.mrf.mxu0  ;;  %v548_v18 = vpop.f32.mrf.mxu1 }
  0xeb   :  { %426 = vst [vmem:[%s821_s3 + $0x50] sm:$0xff] %v394_v13  ;;  %442 = vst [vmem:[%s821_s3 + $0xd0] sm:$0xff] %v410_v14  ;;  %v392_v19 = vmax.f32 %v290_v15, 0.0  ;;  %v408_v20 = vmax.f32 %v354_v16, 0.0  ;;  %v301_v21 = vadd.f32 %v532_v17, %v688_v22  ;;  %v365_v23 = vadd.f32 %v548_v18, %v688_v22 }
  0xec   :  { %v292_v24 = vpop.f32.mrf.mxu0  ;;  %v356_v25 = vpop.f32.mrf.mxu1 }
  0xed   :  { %424 = vst [vmem:[%s821_s3 + $0x40] sm:$0xff] %v392_v19  ;;  %440 = vst [vmem:[%s821_s3 + $0xc0] sm:$0xff] %v408_v20  ;;  %v395_v26 = vmax.f32 %v301_v21, 0.0  ;;  %v411_v27 = vmax.f32 %v365_v23, 0.0  ;;  %v293_v28 = vadd.f32 %v688_v22, %v292_v24  ;;  %v357_v29 = vadd.f32 %v688_v22, %v356_v25 }
  0xee   :  { %v535_v30 = vpop.f32.mrf.mxu0  ;;  %v551_v31 = vpop.f32.mrf.mxu1 }
  0xef   :  { %427 = vst [vmem:[%s821_s3 + $0x58] sm:$0xff] %v395_v26  ;;  %443 = vst [vmem:[%s821_s3 + $0xd8] sm:$0xff] %v411_v27  ;;  %v393_v32 = vmax.f32 %v293_v28, 0.0  ;;  %v409_v33 = vmax.f32 %v357_v29, 0.0  ;;  %v314_v34 = vadd.f32 %v535_v30, %v688_v22  ;;  %v378_v35 = vadd.f32 %v551_v31, %v688_v22 }
  0xf0   :  { %v305_v36 = vpop.f32.mrf.mxu0  ;;  %v369_v37 = vpop.f32.mrf.mxu1 }
  0xf1   :  { %425 = vst [vmem:[%s821_s3 + $0x48] sm:$0xff] %v393_v32  ;;  %441 = vst [vmem:[%s821_s3 + $0xc8] sm:$0xff] %v409_v33  ;;  %v398_v38 = vmax.f32 %v314_v34, 0.0  ;;  %v414_v39 = vmax.f32 %v378_v35, 0.0  ;;  %v306_v40 = vadd.f32 %v688_v22, %v305_v36  ;;  %v370_v41 = vadd.f32 %v688_v22, %v369_v37 }
  0xf2   :  { %v536_v42 = vpop.f32.mrf.mxu0  ;;  %v552_v43 = vpop.f32.mrf.mxu1 }
  0xf3   :  { %430 = vst [vmem:[%s821_s3 + $0x70] sm:$0xff] %v398_v38  ;;  %446 = vst [vmem:[%s821_s3 + $0xf0] sm:$0xff] %v414_v39  ;;  %v396_v44 = vmax.f32 %v306_v40, 0.0  ;;  %v412_v45 = vmax.f32 %v370_v41, 0.0  ;;  %v317_v46 = vadd.f32 %v536_v42, %v688_v22  ;;  %v381_v47 = vadd.f32 %v552_v43, %v688_v22 }
  0xf4   :  { %v308_v48 = vpop.f32.mrf.mxu0  ;;  %v372_v49 = vpop.f32.mrf.mxu1 }
  0xf5   :  { %428 = vst [vmem:[%s821_s3 + $0x60] sm:$0xff] %v396_v44  ;;  %444 = vst [vmem:[%s821_s3 + $0xe0] sm:$0xff] %v412_v45  ;;  %v399_v50 = vmax.f32 %v317_v46, 0.0  ;;  %v415_v51 = vmax.f32 %v381_v47, 0.0  ;;  %v309_v52 = vadd.f32 %v688_v22, %v308_v48  ;;  %v373_v53 = vadd.f32 %v688_v22, %v372_v49 }
  0xf7   :  { %431 = vst [vmem:[%s821_s3 + $0x78] sm:$0xff] %v399_v50  ;;  %447 = vst [vmem:[%s821_s3 + $0xf8] sm:$0xff] %v415_v51  ;;  %v397_v54 = vmax.f32 %v309_v52, 0.0  ;;  %v413_v55 = vmax.f32 %v373_v53, 0.0 }
  0xf9   :  { %429 = vst [vmem:[%s821_s3 + $0x68] sm:$0xff] %v397_v54  ;;  %445 = vst [vmem:[%s821_s3 + $0xe8] sm:$0xff] %v413_v55 }

// kernel: _lambda_.11
= control target key start
LH: loop header
LB: loop body
LE: loop exit
PB: predicated region body
PF: predicated region fallthrough
CT: control target
= control target key end

     0   :  { %v682_v0 = vmov 0   ;;  %vm270_vm0 = vcmask 130048   ;;  %s975_s1 = inlined_call_operand.vmem [shape: bf16[144,128], index: 1, kind: input, shape index: {}]   ;;  %s976_s0 = inlined_call_operand.vmem [shape: bf16[256,144], index: 0, kind: input, shape index: {}]   ;;  %s977_s2 = inlined_call_operand.vmem [shape: f32[1,128], index: 2, kind: input, shape index: {}]   ;;  %s978_s3 = inlined_call_operand.vmem [shape: f32[256,128], index: 3, kind: output, shape index: {}]  }
   0x1   :  { %319 = vmatprep.subr.bf16.mxu0 %v682_v0  ;;  %606 = vmatprep.subr.bf16.mxu1 %v682_v0  ;;  %v625_v1 = vld [vmem:[%s975_s1 + $0x38] sm:$0xff]   ;;  %v626_v2 = vld [vmem:[%s975_s1 + $0x30] sm:$0xff]   ;;  %v627_v3 = vld [vmem:[%s975_s1 + $0x28] sm:$0xff]  }
   0x2   :  { %320 = vmatpush1.bf16.msra.mxu0 %v625_v1  ;;  %615 = vmatpush1.bf16.msra.mxu1 %v625_v1  ;;  %v628_v4 = vld [vmem:[%s975_s1 + $0x20] sm:$0xff]   ;;  %v629_v7 = vld [vmem:[%s975_s1 + $0x18] sm:$0xff]   ;;  %v630_v8 = vld [vmem:[%s975_s1 + $0x10] sm:$0xff]  }
   0x3   :  { %321 = vmatprep.subr.bf16.mxu0 %v682_v0  ;;  %607 = vmatprep.subr.bf16.mxu1 %v682_v0  ;;  %v636_v5 = vld [vmem:[%s976_s0 + $0x4] ss:$8 sps:$4 sm:$0xff]   ;;  %v634_v12 = vld [vmem:[%s976_s0] ss:$8 sps:$4 sm:$0xff]   ;;  %v640_v14 = vld [vmem:[%s976_s0 + $0x14] ss:$8 sps:$4 sm:$0xff]  }
   0x4   :  { %v639_v6 = vld [vmem:[%s976_s0 + $0x84] ss:$8 sps:$4 sm:$0xff]   ;;  %590 = vmatprep.mubr.msk.bf16.mxu0 %vm270_vm0, %v636_v5  ;;  %v637_v13 = vld [vmem:[%s976_s0 + $0x80] ss:$8 sps:$4 sm:$0xff]   ;;  %v642_v15 = vld [vmem:[%s976_s0 + $0x94] ss:$8 sps:$4 sm:$0xff]  }
   0x5   :  { %598 = vmatprep.mubr.msk.bf16.mxu1 %vm270_vm0, %v639_v6  ;;  %v631_v9 = vld [vmem:[%s975_s1 + $0x8] sm:$0xff]   ;;  %v632_v10 = vld [vmem:[%s975_s1] sm:$0xff]   ;;  %v644_v16 = vld [vmem:[%s976_s0 + $0x10] ss:$8 sps:$4 sm:$0xff]  }
   0x6   :  { %322 = vmatpush1.bf16.msra.mxu0 %v626_v2  ;;  %616 = vmatpush1.bf16.msra.mxu1 %v626_v2  ;;  %v633_v11 = vld [vmem:[%s975_s1 + $0x40] sm:$0xff]   ;;  %v645_v17 = vld [vmem:[%s976_s0 + $0x90] ss:$8 sps:$4 sm:$0xff]   ;;  %v652_v22 = vld [vmem:[%s976_s0 + $0x34] ss:$8 sps:$4 sm:$0xff]  }
   0x7   :  { %323 = vmatprep.subr.bf16.mxu0 %v682_v0  ;;  %608 = vmatprep.subr.bf16.mxu1 %v682_v0  ;;  %v646_v18 = vld [vmem:[%s976_s0 + $0x24] ss:$8 sps:$4 sm:$0xff]   ;;  %v650_v20 = vld [vmem:[%s976_s0 + $0x20] ss:$8 sps:$4 sm:$0xff]   ;;  %v654_v23 = vld [vmem:[%s976_s0 + $0xb4] ss:$8 sps:$4 sm:$0xff]  }
   0x8   :  { %v648_v19 = vld [vmem:[%s976_s0 + $0xa4] ss:$8 sps:$4 sm:$0xff]   ;;  %v651_v21 = vld [vmem:[%s976_s0 + $0xa0] ss:$8 sps:$4 sm:$0xff]   ;;  %v656_v24 = vld [vmem:[%s976_s0 + $0x30] ss:$8 sps:$4 sm:$0xff]  }
   0x9   :  { %v657_v25 = vld [vmem:[%s976_s0 + $0xb0] ss:$8 sps:$4 sm:$0xff]   ;;  %v658_v26 = vld [vmem:[%s976_s0 + $0x44] ss:$8 sps:$4 sm:$0xff]   ;;  %v662_v28 = vld [vmem:[%s976_s0 + $0x40] ss:$8 sps:$4 sm:$0xff]  }
   0xa   :  { %324 = vmatpush1.bf16.msra.mxu0 %v627_v3  ;;  %617 = vmatpush1.bf16.msra.mxu1 %v627_v3  ;;  %v660_v27 = vld [vmem:[%s976_s0 + $0xc4] ss:$8 sps:$4 sm:$0xff]   ;;  %v663_v29 = vld [vmem:[%s976_s0 + $0xc0] ss:$8 sps:$4 sm:$0xff]   ;;  %v664_v30 = vld [vmem:[%s976_s0 + $0x54] ss:$8 sps:$4 sm:$0xff]  }
   0xb   :  { %325 = vmatprep.subr.bf16.mxu0 %v682_v0  ;;  %609 = vmatprep.subr.bf16.mxu1 %v682_v0  ;;  %v666_v31 = vld [vmem:[%s976_s0 + $0xd4] ss:$8 sps:$4 sm:$0xff]   ;;  %v668_v32 = vld [vmem:[%s976_s0 + $0x50] ss:$8 sps:$4 sm:$0xff]   ;;  %v670_v34 = vld [vmem:[%s976_s0 + $0x64] ss:$8 sps:$4 sm:$0xff]  }
   0xc   :  { %v669_v33 = vld [vmem:[%s976_s0 + $0xd0] ss:$8 sps:$4 sm:$0xff]   ;;  %v672_v35 = vld [vmem:[%s976_s0 + $0xe4] ss:$8 sps:$4 sm:$0xff]   ;;  %v674_v36 = vld [vmem:[%s976_s0 + $0x60] ss:$8 sps:$4 sm:$0xff]  }
   0xd   :  { %v675_v37 = vld [vmem:[%s976_s0 + $0xe0] ss:$8 sps:$4 sm:$0xff]   ;;  %v676_v38 = vld [vmem:[%s976_s0 + $0x74] ss:$8 sps:$4 sm:$0xff]   ;;  %v680_v40 = vld [vmem:[%s976_s0 + $0x70] ss:$8 sps:$4 sm:$0xff]  }
   0xe   :  { %326 = vmatpush1.bf16.msra.mxu0 %v628_v4  ;;  %618 = vmatpush1.bf16.msra.mxu1 %v628_v4  ;;  %v678_v39 = vld [vmem:[%s976_s0 + $0xf4] ss:$8 sps:$4 sm:$0xff]   ;;  %v681_v41 = vld [vmem:[%s976_s0 + $0xf0] ss:$8 sps:$4 sm:$0xff]   ;;  %v845_v42 = vld [vmem:[%s977_s2] ss:$0 sm:$0xff] }
   0xf   :  { %327 = vmatprep.subr.bf16.mxu0 %v682_v0  ;;  %610 = vmatprep.subr.bf16.mxu1 %v682_v0 }
  0x12   :  { %328 = vmatpush1.bf16.msra.mxu0 %v629_v7  ;;  %619 = vmatpush1.bf16.msra.mxu1 %v629_v7 }
  0x13   :  { %329 = vmatprep.subr.bf16.mxu0 %v682_v0  ;;  %611 = vmatprep.subr.bf16.mxu1 %v682_v0 }
  0x16   :  { %330 = vmatpush1.bf16.msra.mxu0 %v630_v8  ;;  %620 = vmatpush1.bf16.msra.mxu1 %v630_v8 }
  0x17   :  { %331 = vmatprep.subr.bf16.mxu0 %v682_v0  ;;  %612 = vmatprep.subr.bf16.mxu1 %v682_v0 }
  0x1a   :  { %332 = vmatpush1.bf16.msra.mxu0 %v631_v9  ;;  %621 = vmatpush1.bf16.msra.mxu1 %v631_v9 }
  0x1b   :  { %333 = vmatprep.subr.bf16.mxu0 %v682_v0  ;;  %613 = vmatprep.subr.bf16.mxu1 %v682_v0 }
  0x1e   :  { %334 = vmatpush1.bf16.msra.mxu0 %v632_v10  ;;  %622 = vmatpush1.bf16.msra.mxu1 %v632_v10 }
  0x1f   :  { %349 = vmatprep.subr.bf16.mxu0 %v682_v0  ;;  %614 = vmatprep.subr.bf16.mxu1 %v682_v0 }
  0x22   :  { %350 = vmatpush2.bf16.msra.mxu0 %v633_v11  ;;  %623 = vmatpush2.bf16.msra.mxu1 %v633_v11 }
  0x25   :  { %352 = vmatmul.mubr.bf16.vlgmr.msra.gmra.mxu0 %v634_v12  ;;  %416 = vmatmul.mubr.bf16.vlgmr.msra.gmra.mxu1 %v637_v13 }
  0x26   :  { %591 = vmatprep.mubr.msk.bf16.mxu0 %vm270_vm0, %v640_v14  ;;  %599 = vmatprep.mubr.msk.bf16.mxu1 %vm270_vm0, %v642_v15 }
  0x2d   :  { %360 = vmatmul.mubr.bf16.gmra.mxu0 %v644_v16  ;;  %424 = vmatmul.mubr.bf16.gmra.mxu1 %v645_v17 }
  0x2e   :  { %592 = vmatprep.mubr.msk.bf16.mxu0 %vm270_vm0, %v646_v18  ;;  %600 = vmatprep.mubr.msk.bf16.mxu1 %vm270_vm0, %v648_v19 }
  0x35   :  { %368 = vmatmul.mubr.bf16.gmra.mxu0 %v650_v20  ;;  %432 = vmatmul.mubr.bf16.gmra.mxu1 %v651_v21 }
  0x36   :  { %593 = vmatprep.mubr.msk.bf16.mxu0 %vm270_vm0, %v652_v22  ;;  %601 = vmatprep.mubr.msk.bf16.mxu1 %vm270_vm0, %v654_v23 }
  0x3d   :  { %376 = vmatmul.mubr.bf16.gmra.mxu0 %v656_v24  ;;  %440 = vmatmul.mubr.bf16.gmra.mxu1 %v657_v25 }
  0x3e   :  { %594 = vmatprep.mubr.msk.bf16.mxu0 %vm270_vm0, %v658_v26  ;;  %602 = vmatprep.mubr.msk.bf16.mxu1 %vm270_vm0, %v660_v27 }
  0x45   :  { %384 = vmatmul.mubr.bf16.gmra.mxu0 %v662_v28  ;;  %448 = vmatmul.mubr.bf16.gmra.mxu1 %v663_v29 }
  0x46   :  { %595 = vmatprep.mubr.msk.bf16.mxu0 %vm270_vm0, %v664_v30  ;;  %603 = vmatprep.mubr.msk.bf16.mxu1 %vm270_vm0, %v666_v31 }
  0x4d   :  { %392 = vmatmul.mubr.bf16.gmra.mxu0 %v668_v32  ;;  %456 = vmatmul.mubr.bf16.gmra.mxu1 %v669_v33 }
  0x4e   :  { %596 = vmatprep.mubr.msk.bf16.mxu0 %vm270_vm0, %v670_v34  ;;  %604 = vmatprep.mubr.msk.bf16.mxu1 %vm270_vm0, %v672_v35 }
  0x55   :  { %400 = vmatmul.mubr.bf16.gmra.mxu0 %v674_v36  ;;  %464 = vmatmul.mubr.bf16.gmra.mxu1 %v675_v37 }
  0x56   :  { %597 = vmatprep.mubr.msk.bf16.mxu0 %vm270_vm0, %v676_v38  ;;  %605 = vmatprep.mubr.msk.bf16.mxu1 %vm270_vm0, %v678_v39 }
  0x5d   :  { %408 = vmatmul.mubr.bf16.gmra.mxu0 %v680_v40  ;;  %472 = vmatmul.mubr.bf16.gmra.mxu1 %v681_v41 }
  0xe5   :  { %v353_v43 = vpop.f32.mrf.mxu0  ;;  %v417_v44 = vpop.f32.mrf.mxu1 }
  0xe6   :  { %v354_v45 = vadd.f32 %v845_v42, %v353_v43  ;;  %v418_v46 = vadd.f32 %v845_v42, %v417_v44 }
  0xe7   :  { %v355_v47 = vpop.f32.mrf.mxu0  ;;  %v419_v48 = vpop.f32.mrf.mxu1 }
  0xe8   :  { %v480_v49 = vmax.f32 %v354_v45, 0.0  ;;  %v496_v50 = vmax.f32 %v418_v46, 0.0 }
  0xe9   :  { %v356_v51 = vpop.f32.mrf.mxu0  ;;  %v420_v52 = vpop.f32.mrf.mxu1 }
  0xea   :  { %512 = vst [vmem:[%s978_s3] sm:$0xff] %v480_v49  ;;  %528 = vst [vmem:[%s978_s3 + $0x80] sm:$0xff] %v496_v50  ;;  %v357_v53 = vadd.f32 %v845_v42, %v356_v51  ;;  %v421_v54 = vadd.f32 %v845_v42, %v420_v52 }
  0xeb   :  { %v358_v55 = vpop.f32.mrf.mxu0  ;;  %v422_v56 = vpop.f32.mrf.mxu1 }
  0xec   :  { %v481_v57 = vmax.f32 %v357_v53, 0.0  ;;  %v497_v58 = vmax.f32 %v421_v54, 0.0 }
  0xed   :  { %v361_v59 = vpop.f32.mrf.mxu0  ;;  %v425_v60 = vpop.f32.mrf.mxu1 }
  0xee   :  { %513 = vst [vmem:[%s978_s3 + $0x8] sm:$0xff] %v481_v57  ;;  %529 = vst [vmem:[%s978_s3 + $0x88] sm:$0xff] %v497_v58  ;;  %v362_v61 = vadd.f32 %v845_v42, %v361_v59  ;;  %v426_v62 = vadd.f32 %v845_v42, %v425_v60 }
  0xef   :  { %v363_v63 = vpop.f32.mrf.mxu0  ;;  %v427_v0 = vpop.f32.mrf.mxu1 }
  0xf0   :  { %v482_v1 = vmax.f32 %v362_v61, 0.0  ;;  %v498_v2 = vmax.f32 %v426_v62, 0.0 }
  0xf1   :  { %v364_v3 = vpop.f32.mrf.mxu0  ;;  %v428_v4 = vpop.f32.mrf.mxu1 }
  0xf2   :  { %514 = vst [vmem:[%s978_s3 + $0x10] sm:$0xff] %v482_v1  ;;  %530 = vst [vmem:[%s978_s3 + $0x90] sm:$0xff] %v498_v2  ;;  %v365_v5 = vadd.f32 %v845_v42, %v364_v3  ;;  %v429_v6 = vadd.f32 %v845_v42, %v428_v4 }
  0xf3   :  { %v366_v7 = vpop.f32.mrf.mxu0  ;;  %v430_v8 = vpop.f32.mrf.mxu1 }
  0xf4   :  { %v483_v9 = vmax.f32 %v365_v5, 0.0  ;;  %v499_v10 = vmax.f32 %v429_v6, 0.0 }
  0xf5   :  { %v369_v11 = vpop.f32.mrf.mxu0  ;;  %v433_v12 = vpop.f32.mrf.mxu1 }
  0xf6   :  { %515 = vst [vmem:[%s978_s3 + $0x18] sm:$0xff] %v483_v9  ;;  %531 = vst [vmem:[%s978_s3 + $0x98] sm:$0xff] %v499_v10  ;;  %v370_v13 = vadd.f32 %v845_v42, %v369_v11  ;;  %v434_v14 = vadd.f32 %v845_v42, %v433_v12 }
  0xf7   :  { %v371_v15 = vpop.f32.mrf.mxu0  ;;  %v435_v16 = vpop.f32.mrf.mxu1 }
  0xf8   :  { %v484_v17 = vmax.f32 %v370_v13, 0.0  ;;  %v500_v18 = vmax.f32 %v434_v14, 0.0 }
  0xf9   :  { %v372_v19 = vpop.f32.mrf.mxu0  ;;  %v436_v20 = vpop.f32.mrf.mxu1 }
  0xfa   :  { %516 = vst [vmem:[%s978_s3 + $0x20] sm:$0xff] %v484_v17  ;;  %532 = vst [vmem:[%s978_s3 + $0xa0] sm:$0xff] %v500_v18  ;;  %v373_v21 = vadd.f32 %v845_v42, %v372_v19  ;;  %v437_v22 = vadd.f32 %v845_v42, %v436_v20 }
  0xfb   :  { %v374_v23 = vpop.f32.mrf.mxu0  ;;  %v438_v24 = vpop.f32.mrf.mxu1 }
  0xfc   :  { %v485_v25 = vmax.f32 %v373_v21, 0.0  ;;  %v501_v26 = vmax.f32 %v437_v22, 0.0 }
  0xfd   :  { %v377_v27 = vpop.f32.mrf.mxu0  ;;  %v441_v28 = vpop.f32.mrf.mxu1 }
  0xfe   :  { %517 = vst [vmem:[%s978_s3 + $0x28] sm:$0xff] %v485_v25  ;;  %533 = vst [vmem:[%s978_s3 + $0xa8] sm:$0xff] %v501_v26  ;;  %v378_v29 = vadd.f32 %v845_v42, %v377_v27  ;;  %v442_v30 = vadd.f32 %v845_v42, %v441_v28 }
  0xff   :  { %v379_v31 = vpop.f32.mrf.mxu0  ;;  %v443_v32 = vpop.f32.mrf.mxu1 }
 0x100   :  { %v486_v33 = vmax.f32 %v378_v29, 0.0  ;;  %v502_v34 = vmax.f32 %v442_v30, 0.0 }
 0x101   :  { %v380_v35 = vpop.f32.mrf.mxu0  ;;  %v444_v36 = vpop.f32.mrf.mxu1 }
 0x102   :  { %518 = vst [vmem:[%s978_s3 + $0x30] sm:$0xff] %v486_v33  ;;  %534 = vst [vmem:[%s978_s3 + $0xb0] sm:$0xff] %v502_v34  ;;  %v381_v37 = vadd.f32 %v845_v42, %v380_v35  ;;  %v445_v38 = vadd.f32 %v845_v42, %v444_v36 }
 0x103   :  { %v382_v39 = vpop.f32.mrf.mxu0  ;;  %v446_v40 = vpop.f32.mrf.mxu1 }
 0x104   :  { %v487_v41 = vmax.f32 %v381_v37, 0.0  ;;  %v503_v43 = vmax.f32 %v445_v38, 0.0 }
 0x105   :  { %v385_v44 = vpop.f32.mrf.mxu0  ;;  %v449_v45 = vpop.f32.mrf.mxu1 }
 0x106   :  { %519 = vst [vmem:[%s978_s3 + $0x38] sm:$0xff] %v487_v41  ;;  %535 = vst [vmem:[%s978_s3 + $0xb8] sm:$0xff] %v503_v43  ;;  %v386_v46 = vadd.f32 %v845_v42, %v385_v44  ;;  %v450_v47 = vadd.f32 %v845_v42, %v449_v45 }
 0x107   :  { %v387_v48 = vpop.f32.mrf.mxu0  ;;  %v451_v49 = vpop.f32.mrf.mxu1 }
 0x108   :  { %v488_v50 = vmax.f32 %v386_v46, 0.0  ;;  %v504_v51 = vmax.f32 %v450_v47, 0.0 }
 0x109   :  { %v388_v52 = vpop.f32.mrf.mxu0  ;;  %v452_v53 = vpop.f32.mrf.mxu1 }
 0x10a   :  { %520 = vst [vmem:[%s978_s3 + $0x40] sm:$0xff] %v488_v50  ;;  %536 = vst [vmem:[%s978_s3 + $0xc0] sm:$0xff] %v504_v51  ;;  %v389_v54 = vadd.f32 %v845_v42, %v388_v52  ;;  %v453_v55 = vadd.f32 %v845_v42, %v452_v53 }
 0x10b   :  { %v390_v56 = vpop.f32.mrf.mxu0  ;;  %v454_v57 = vpop.f32.mrf.mxu1 }
 0x10c   :  { %v489_v58 = vmax.f32 %v389_v54, 0.0  ;;  %v505_v59 = vmax.f32 %v453_v55, 0.0 }
 0x10d   :  { %v393_v60 = vpop.f32.mrf.mxu0  ;;  %v457_v61 = vpop.f32.mrf.mxu1 }
 0x10e   :  { %521 = vst [vmem:[%s978_s3 + $0x48] sm:$0xff] %v489_v58  ;;  %537 = vst [vmem:[%s978_s3 + $0xc8] sm:$0xff] %v505_v59  ;;  %v394_v62 = vadd.f32 %v845_v42, %v393_v60  ;;  %v458_v63 = vadd.f32 %v845_v42, %v457_v61 }
 0x10f   :  { %v395_v0 = vpop.f32.mrf.mxu0  ;;  %v459_v1 = vpop.f32.mrf.mxu1 }
 0x110   :  { %v490_v2 = vmax.f32 %v394_v62, 0.0  ;;  %v506_v3 = vmax.f32 %v458_v63, 0.0 }
 0x111   :  { %v396_v4 = vpop.f32.mrf.mxu0  ;;  %v460_v5 = vpop.f32.mrf.mxu1 }
 0x112   :  { %522 = vst [vmem:[%s978_s3 + $0x50] sm:$0xff] %v490_v2  ;;  %538 = vst [vmem:[%s978_s3 + $0xd0] sm:$0xff] %v506_v3  ;;  %v397_v6 = vadd.f32 %v845_v42, %v396_v4  ;;  %v461_v7 = vadd.f32 %v845_v42, %v460_v5 }
 0x113   :  { %v398_v8 = vpop.f32.mrf.mxu0  ;;  %v462_v9 = vpop.f32.mrf.mxu1 }
 0x114   :  { %v491_v10 = vmax.f32 %v397_v6, 0.0  ;;  %v507_v11 = vmax.f32 %v461_v7, 0.0 }
 0x115   :  { %v401_v12 = vpop.f32.mrf.mxu0  ;;  %v465_v13 = vpop.f32.mrf.mxu1 }
 0x116   :  { %523 = vst [vmem:[%s978_s3 + $0x58] sm:$0xff] %v491_v10  ;;  %539 = vst [vmem:[%s978_s3 + $0xd8] sm:$0xff] %v507_v11  ;;  %v402_v14 = vadd.f32 %v845_v42, %v401_v12  ;;  %v466_v15 = vadd.f32 %v845_v42, %v465_v13 }
 0x117   :  { %v403_v16 = vpop.f32.mrf.mxu0  ;;  %v467_v17 = vpop.f32.mrf.mxu1 }
 0x118   :  { %v492_v18 = vmax.f32 %v402_v14, 0.0  ;;  %v508_v19 = vmax.f32 %v466_v15, 0.0 }
 0x119   :  { %v404_v20 = vpop.f32.mrf.mxu0  ;;  %v468_v21 = vpop.f32.mrf.mxu1 }
 0x11a   :  { %524 = vst [vmem:[%s978_s3 + $0x60] sm:$0xff] %v492_v18  ;;  %540 = vst [vmem:[%s978_s3 + $0xe0] sm:$0xff] %v508_v19  ;;  %v405_v22 = vadd.f32 %v845_v42, %v404_v20  ;;  %v469_v23 = vadd.f32 %v845_v42, %v468_v21 }
 0x11b   :  { %v406_v24 = vpop.f32.mrf.mxu0  ;;  %v470_v25 = vpop.f32.mrf.mxu1 }
 0x11c   :  { %v493_v26 = vmax.f32 %v405_v22, 0.0  ;;  %v509_v27 = vmax.f32 %v469_v23, 0.0 }
 0x11d   :  { %v409_v28 = vpop.f32.mrf.mxu0  ;;  %v473_v29 = vpop.f32.mrf.mxu1 }
 0x11e   :  { %525 = vst [vmem:[%s978_s3 + $0x68] sm:$0xff] %v493_v26  ;;  %541 = vst [vmem:[%s978_s3 + $0xe8] sm:$0xff] %v509_v27  ;;  %v410_v30 = vadd.f32 %v845_v42, %v409_v28  ;;  %v474_v31 = vadd.f32 %v845_v42, %v473_v29 }
 0x11f   :  { %v411_v32 = vpop.f32.mrf.mxu0  ;;  %v475_v33 = vpop.f32.mrf.mxu1 }
 0x120   :  { %v494_v34 = vmax.f32 %v410_v30, 0.0  ;;  %v510_v35 = vmax.f32 %v474_v31, 0.0 }
 0x121   :  { %v412_v36 = vpop.f32.mrf.mxu0  ;;  %v476_v37 = vpop.f32.mrf.mxu1 }
 0x122   :  { %526 = vst [vmem:[%s978_s3 + $0x70] sm:$0xff] %v494_v34  ;;  %542 = vst [vmem:[%s978_s3 + $0xf0] sm:$0xff] %v510_v35  ;;  %v413_v38 = vadd.f32 %v845_v42, %v412_v36  ;;  %v477_v39 = vadd.f32 %v845_v42, %v476_v37 }
 0x123   :  { %v414_v40 = vpop.f32.mrf.mxu0  ;;  %v478_v41 = vpop.f32.mrf.mxu1 }
 0x124   :  { %v495_v43 = vmax.f32 %v413_v38, 0.0  ;;  %v511_v44 = vmax.f32 %v477_v39, 0.0 }
 0x126   :  { %527 = vst [vmem:[%s978_s3 + $0x78] sm:$0xff] %v495_v43  ;;  %543 = vst [vmem:[%s978_s3 + $0xf8] sm:$0xff] %v511_v44 }

// kernel: _lambda_.12
= control target key start
LH: loop header
LB: loop body
LE: loop exit
PB: predicated region body
PF: predicated region fallthrough
CT: control target
= control target key end

     0   :  { %v650_v0 = vmov 0   ;;  %vm270_vm0 = vcmask 130048   ;;  %s943_s1 = inlined_call_operand.vmem [shape: bf16[144,128], index: 1, kind: input, shape index: {}]   ;;  %s944_s0 = inlined_call_operand.vmem [shape: bf16[256,144], index: 0, kind: input, shape index: {}]   ;;  %s945_s2 = inlined_call_operand.vmem [shape: f32[1,128], index: 2, kind: input, shape index: {}]   ;;  %s946_s3 = inlined_call_operand.vmem [shape: f32[256,128], index: 3, kind: output, shape index: {}]  }
   0x1   :  { %319 = vmatprep.subr.bf16.mxu0 %v650_v0  ;;  %574 = vmatprep.subr.bf16.mxu1 %v650_v0  ;;  %v593_v1 = vld [vmem:[%s943_s1 + $0x38] sm:$0xff]   ;;  %v594_v2 = vld [vmem:[%s943_s1 + $0x30] sm:$0xff]   ;;  %v595_v3 = vld [vmem:[%s943_s1 + $0x28] sm:$0xff]  }
   0x2   :  { %320 = vmatpush1.bf16.msra.mxu0 %v593_v1  ;;  %583 = vmatpush1.bf16.msra.mxu1 %v593_v1  ;;  %v596_v4 = vld [vmem:[%s943_s1 + $0x20] sm:$0xff]   ;;  %v597_v7 = vld [vmem:[%s943_s1 + $0x18] sm:$0xff]   ;;  %v598_v8 = vld [vmem:[%s943_s1 + $0x10] sm:$0xff]  }
   0x3   :  { %321 = vmatprep.subr.bf16.mxu0 %v650_v0  ;;  %575 = vmatprep.subr.bf16.mxu1 %v650_v0  ;;  %v604_v5 = vld [vmem:[%s944_s0 + $0x4] ss:$8 sps:$4 sm:$0xff]   ;;  %v602_v12 = vld [vmem:[%s944_s0] ss:$8 sps:$4 sm:$0xff]   ;;  %v608_v14 = vld [vmem:[%s944_s0 + $0x14] ss:$8 sps:$4 sm:$0xff]  }
   0x4   :  { %v607_v6 = vld [vmem:[%s944_s0 + $0x84] ss:$8 sps:$4 sm:$0xff]   ;;  %558 = vmatprep.mubr.msk.bf16.mxu0 %vm270_vm0, %v604_v5  ;;  %v605_v13 = vld [vmem:[%s944_s0 + $0x80] ss:$8 sps:$4 sm:$0xff]   ;;  %v610_v15 = vld [vmem:[%s944_s0 + $0x94] ss:$8 sps:$4 sm:$0xff]  }
   0x5   :  { %566 = vmatprep.mubr.msk.bf16.mxu1 %vm270_vm0, %v607_v6  ;;  %v599_v9 = vld [vmem:[%s943_s1 + $0x8] sm:$0xff]   ;;  %v600_v10 = vld [vmem:[%s943_s1] sm:$0xff]   ;;  %v612_v16 = vld [vmem:[%s944_s0 + $0x10] ss:$8 sps:$4 sm:$0xff]  }
   0x6   :  { %322 = vmatpush1.bf16.msra.mxu0 %v594_v2  ;;  %584 = vmatpush1.bf16.msra.mxu1 %v594_v2  ;;  %v601_v11 = vld [vmem:[%s943_s1 + $0x40] sm:$0xff]   ;;  %v613_v17 = vld [vmem:[%s944_s0 + $0x90] ss:$8 sps:$4 sm:$0xff]   ;;  %v620_v22 = vld [vmem:[%s944_s0 + $0x34] ss:$8 sps:$4 sm:$0xff]  }
   0x7   :  { %323 = vmatprep.subr.bf16.mxu0 %v650_v0  ;;  %576 = vmatprep.subr.bf16.mxu1 %v650_v0  ;;  %v614_v18 = vld [vmem:[%s944_s0 + $0x24] ss:$8 sps:$4 sm:$0xff]   ;;  %v618_v20 = vld [vmem:[%s944_s0 + $0x20] ss:$8 sps:$4 sm:$0xff]   ;;  %v622_v23 = vld [vmem:[%s944_s0 + $0xb4] ss:$8 sps:$4 sm:$0xff]  }
   0x8   :  { %v616_v19 = vld [vmem:[%s944_s0 + $0xa4] ss:$8 sps:$4 sm:$0xff]   ;;  %v619_v21 = vld [vmem:[%s944_s0 + $0xa0] ss:$8 sps:$4 sm:$0xff]   ;;  %v624_v24 = vld [vmem:[%s944_s0 + $0x30] ss:$8 sps:$4 sm:$0xff]  }
   0x9   :  { %v625_v25 = vld [vmem:[%s944_s0 + $0xb0] ss:$8 sps:$4 sm:$0xff]   ;;  %v626_v26 = vld [vmem:[%s944_s0 + $0x44] ss:$8 sps:$4 sm:$0xff]   ;;  %v630_v28 = vld [vmem:[%s944_s0 + $0x40] ss:$8 sps:$4 sm:$0xff]  }
   0xa   :  { %324 = vmatpush1.bf16.msra.mxu0 %v595_v3  ;;  %585 = vmatpush1.bf16.msra.mxu1 %v595_v3  ;;  %v628_v27 = vld [vmem:[%s944_s0 + $0xc4] ss:$8 sps:$4 sm:$0xff]   ;;  %v631_v29 = vld [vmem:[%s944_s0 + $0xc0] ss:$8 sps:$4 sm:$0xff]   ;;  %v632_v30 = vld [vmem:[%s944_s0 + $0x54] ss:$8 sps:$4 sm:$0xff]  }
   0xb   :  { %325 = vmatprep.subr.bf16.mxu0 %v650_v0  ;;  %577 = vmatprep.subr.bf16.mxu1 %v650_v0  ;;  %v634_v31 = vld [vmem:[%s944_s0 + $0xd4] ss:$8 sps:$4 sm:$0xff]   ;;  %v636_v32 = vld [vmem:[%s944_s0 + $0x50] ss:$8 sps:$4 sm:$0xff]   ;;  %v638_v34 = vld [vmem:[%s944_s0 + $0x64] ss:$8 sps:$4 sm:$0xff]  }
   0xc   :  { %v637_v33 = vld [vmem:[%s944_s0 + $0xd0] ss:$8 sps:$4 sm:$0xff]   ;;  %v640_v35 = vld [vmem:[%s944_s0 + $0xe4] ss:$8 sps:$4 sm:$0xff]   ;;  %v642_v36 = vld [vmem:[%s944_s0 + $0x60] ss:$8 sps:$4 sm:$0xff]  }
   0xd   :  { %v643_v37 = vld [vmem:[%s944_s0 + $0xe0] ss:$8 sps:$4 sm:$0xff]   ;;  %v644_v38 = vld [vmem:[%s944_s0 + $0x74] ss:$8 sps:$4 sm:$0xff]   ;;  %v648_v40 = vld [vmem:[%s944_s0 + $0x70] ss:$8 sps:$4 sm:$0xff]  }
   0xe   :  { %326 = vmatpush1.bf16.msra.mxu0 %v596_v4  ;;  %586 = vmatpush1.bf16.msra.mxu1 %v596_v4  ;;  %v646_v39 = vld [vmem:[%s944_s0 + $0xf4] ss:$8 sps:$4 sm:$0xff]   ;;  %v649_v41 = vld [vmem:[%s944_s0 + $0xf0] ss:$8 sps:$4 sm:$0xff]   ;;  %v813_v42 = vld [vmem:[%s945_s2] ss:$0 sm:$0xff] }
   0xf   :  { %327 = vmatprep.subr.bf16.mxu0 %v650_v0  ;;  %578 = vmatprep.subr.bf16.mxu1 %v650_v0 }
  0x12   :  { %328 = vmatpush1.bf16.msra.mxu0 %v597_v7  ;;  %587 = vmatpush1.bf16.msra.mxu1 %v597_v7 }
  0x13   :  { %329 = vmatprep.subr.bf16.mxu0 %v650_v0  ;;  %579 = vmatprep.subr.bf16.mxu1 %v650_v0 }
  0x16   :  { %330 = vmatpush1.bf16.msra.mxu0 %v598_v8  ;;  %588 = vmatpush1.bf16.msra.mxu1 %v598_v8 }
  0x17   :  { %331 = vmatprep.subr.bf16.mxu0 %v650_v0  ;;  %580 = vmatprep.subr.bf16.mxu1 %v650_v0 }
  0x1a   :  { %332 = vmatpush1.bf16.msra.mxu0 %v599_v9  ;;  %589 = vmatpush1.bf16.msra.mxu1 %v599_v9 }
  0x1b   :  { %333 = vmatprep.subr.bf16.mxu0 %v650_v0  ;;  %581 = vmatprep.subr.bf16.mxu1 %v650_v0 }
  0x1e   :  { %334 = vmatpush1.bf16.msra.mxu0 %v600_v10  ;;  %590 = vmatpush1.bf16.msra.mxu1 %v600_v10 }
  0x1f   :  { %349 = vmatprep.subr.bf16.mxu0 %v650_v0  ;;  %582 = vmatprep.subr.bf16.mxu1 %v650_v0 }
  0x22   :  { %350 = vmatpush2.bf16.msra.mxu0 %v601_v11  ;;  %591 = vmatpush2.bf16.msra.mxu1 %v601_v11 }
  0x25   :  { %352 = vmatmul.mubr.bf16.vlgmr.msra.gmra.mxu0 %v602_v12  ;;  %416 = vmatmul.mubr.bf16.vlgmr.msra.gmra.mxu1 %v605_v13 }
  0x26   :  { %559 = vmatprep.mubr.msk.bf16.mxu0 %vm270_vm0, %v608_v14  ;;  %567 = vmatprep.mubr.msk.bf16.mxu1 %vm270_vm0, %v610_v15 }
  0x2d   :  { %360 = vmatmul.mubr.bf16.gmra.mxu0 %v612_v16  ;;  %424 = vmatmul.mubr.bf16.gmra.mxu1 %v613_v17 }
  0x2e   :  { %560 = vmatprep.mubr.msk.bf16.mxu0 %vm270_vm0, %v614_v18  ;;  %568 = vmatprep.mubr.msk.bf16.mxu1 %vm270_vm0, %v616_v19 }
  0x35   :  { %368 = vmatmul.mubr.bf16.gmra.mxu0 %v618_v20  ;;  %432 = vmatmul.mubr.bf16.gmra.mxu1 %v619_v21 }
  0x36   :  { %561 = vmatprep.mubr.msk.bf16.mxu0 %vm270_vm0, %v620_v22  ;;  %569 = vmatprep.mubr.msk.bf16.mxu1 %vm270_vm0, %v622_v23 }
  0x3d   :  { %376 = vmatmul.mubr.bf16.gmra.mxu0 %v624_v24  ;;  %440 = vmatmul.mubr.bf16.gmra.mxu1 %v625_v25 }
  0x3e   :  { %562 = vmatprep.mubr.msk.bf16.mxu0 %vm270_vm0, %v626_v26  ;;  %570 = vmatprep.mubr.msk.bf16.mxu1 %vm270_vm0, %v628_v27 }
  0x45   :  { %384 = vmatmul.mubr.bf16.gmra.mxu0 %v630_v28  ;;  %448 = vmatmul.mubr.bf16.gmra.mxu1 %v631_v29 }
  0x46   :  { %563 = vmatprep.mubr.msk.bf16.mxu0 %vm270_vm0, %v632_v30  ;;  %571 = vmatprep.mubr.msk.bf16.mxu1 %vm270_vm0, %v634_v31 }
  0x4d   :  { %392 = vmatmul.mubr.bf16.gmra.mxu0 %v636_v32  ;;  %456 = vmatmul.mubr.bf16.gmra.mxu1 %v637_v33 }
  0x4e   :  { %564 = vmatprep.mubr.msk.bf16.mxu0 %vm270_vm0, %v638_v34  ;;  %572 = vmatprep.mubr.msk.bf16.mxu1 %vm270_vm0, %v640_v35 }
  0x55   :  { %400 = vmatmul.mubr.bf16.gmra.mxu0 %v642_v36  ;;  %464 = vmatmul.mubr.bf16.gmra.mxu1 %v643_v37 }
  0x56   :  { %565 = vmatprep.mubr.msk.bf16.mxu0 %vm270_vm0, %v644_v38  ;;  %573 = vmatprep.mubr.msk.bf16.mxu1 %vm270_vm0, %v646_v39 }
  0x5d   :  { %408 = vmatmul.mubr.bf16.gmra.mxu0 %v648_v40  ;;  %472 = vmatmul.mubr.bf16.gmra.mxu1 %v649_v41 }
  0xe5   :  { %v353_v43 = vpop.f32.mrf.mxu0  ;;  %v417_v44 = vpop.f32.mrf.mxu1 }
  0xe6   :  { %v354_v45 = vadd.f32 %v813_v42, %v353_v43  ;;  %v418_v46 = vadd.f32 %v813_v42, %v417_v44 }
  0xe7   :  { %v355_v47 = vpop.f32.mrf.mxu0  ;;  %v419_v48 = vpop.f32.mrf.mxu1 }
  0xe8   :  { %480 = vst [vmem:[%s946_s3] sm:$0xff] %v354_v45  ;;  %496 = vst [vmem:[%s946_s3 + $0x80] sm:$0xff] %v418_v46 }
  0xe9   :  { %v356_v49 = vpop.f32.mrf.mxu0  ;;  %v420_v50 = vpop.f32.mrf.mxu1 }
  0xea   :  { %v357_v51 = vadd.f32 %v813_v42, %v356_v49  ;;  %v421_v52 = vadd.f32 %v813_v42, %v420_v50 }
  0xeb   :  { %v358_v53 = vpop.f32.mrf.mxu0  ;;  %v422_v54 = vpop.f32.mrf.mxu1 }
  0xec   :  { %481 = vst [vmem:[%s946_s3 + $0x8] sm:$0xff] %v357_v51  ;;  %497 = vst [vmem:[%s946_s3 + $0x88] sm:$0xff] %v421_v52 }
  0xed   :  { %v361_v55 = vpop.f32.mrf.mxu0  ;;  %v425_v56 = vpop.f32.mrf.mxu1 }
  0xee   :  { %v362_v57 = vadd.f32 %v813_v42, %v361_v55  ;;  %v426_v58 = vadd.f32 %v813_v42, %v425_v56 }
  0xef   :  { %v363_v59 = vpop.f32.mrf.mxu0  ;;  %v427_v60 = vpop.f32.mrf.mxu1 }
  0xf0   :  { %482 = vst [vmem:[%s946_s3 + $0x10] sm:$0xff] %v362_v57  ;;  %498 = vst [vmem:[%s946_s3 + $0x90] sm:$0xff] %v426_v58 }
  0xf1   :  { %v364_v61 = vpop.f32.mrf.mxu0  ;;  %v428_v62 = vpop.f32.mrf.mxu1 }
  0xf2   :  { %v365_v63 = vadd.f32 %v813_v42, %v364_v61  ;;  %v429_v0 = vadd.f32 %v813_v42, %v428_v62 }
  0xf3   :  { %v366_v1 = vpop.f32.mrf.mxu0  ;;  %v430_v2 = vpop.f32.mrf.mxu1 }
  0xf4   :  { %483 = vst [vmem:[%s946_s3 + $0x18] sm:$0xff] %v365_v63  ;;  %499 = vst [vmem:[%s946_s3 + $0x98] sm:$0xff] %v429_v0 }
  0xf5   :  { %v369_v3 = vpop.f32.mrf.mxu0  ;;  %v433_v4 = vpop.f32.mrf.mxu1 }
  0xf6   :  { %v370_v5 = vadd.f32 %v813_v42, %v369_v3  ;;  %v434_v6 = vadd.f32 %v813_v42, %v433_v4 }
  0xf7   :  { %v371_v7 = vpop.f32.mrf.mxu0  ;;  %v435_v8 = vpop.f32.mrf.mxu1 }
  0xf8   :  { %484 = vst [vmem:[%s946_s3 + $0x20] sm:$0xff] %v370_v5  ;;  %500 = vst [vmem:[%s946_s3 + $0xa0] sm:$0xff] %v434_v6 }
  0xf9   :  { %v372_v9 = vpop.f32.mrf.mxu0  ;;  %v436_v10 = vpop.f32.mrf.mxu1 }
  0xfa   :  { %v373_v11 = vadd.f32 %v813_v42, %v372_v9  ;;  %v437_v12 = vadd.f32 %v813_v42, %v436_v10 }
  0xfb   :  { %v374_v13 = vpop.f32.mrf.mxu0  ;;  %v438_v14 = vpop.f32.mrf.mxu1 }
  0xfc   :  { %485 = vst [vmem:[%s946_s3 + $0x28] sm:$0xff] %v373_v11  ;;  %501 = vst [vmem:[%s946_s3 + $0xa8] sm:$0xff] %v437_v12 }
  0xfd   :  { %v377_v15 = vpop.f32.mrf.mxu0  ;;  %v441_v16 = vpop.f32.mrf.mxu1 }
  0xfe   :  { %v378_v17 = vadd.f32 %v813_v42, %v377_v15  ;;  %v442_v18 = vadd.f32 %v813_v42, %v441_v16 }
  0xff   :  { %v379_v19 = vpop.f32.mrf.mxu0  ;;  %v443_v20 = vpop.f32.mrf.mxu1 }
 0x100   :  { %486 = vst [vmem:[%s946_s3 + $0x30] sm:$0xff] %v378_v17  ;;  %502 = vst [vmem:[%s946_s3 + $0xb0] sm:$0xff] %v442_v18 }
 0x101   :  { %v380_v21 = vpop.f32.mrf.mxu0  ;;  %v444_v22 = vpop.f32.mrf.mxu1 }
 0x102   :  { %v381_v23 = vadd.f32 %v813_v42, %v380_v21  ;;  %v445_v24 = vadd.f32 %v813_v42, %v444_v22 }
 0x103   :  { %v382_v25 = vpop.f32.mrf.mxu0  ;;  %v446_v26 = vpop.f32.mrf.mxu1 }
 0x104   :  { %487 = vst [vmem:[%s946_s3 + $0x38] sm:$0xff] %v381_v23  ;;  %503 = vst [vmem:[%s946_s3 + $0xb8] sm:$0xff] %v445_v24 }
 0x105   :  { %v385_v27 = vpop.f32.mrf.mxu0  ;;  %v449_v28 = vpop.f32.mrf.mxu1 }
 0x106   :  { %v386_v29 = vadd.f32 %v813_v42, %v385_v27  ;;  %v450_v30 = vadd.f32 %v813_v42, %v449_v28 }
 0x107   :  { %v387_v31 = vpop.f32.mrf.mxu0  ;;  %v451_v32 = vpop.f32.mrf.mxu1 }
 0x108   :  { %488 = vst [vmem:[%s946_s3 + $0x40] sm:$0xff] %v386_v29  ;;  %504 = vst [vmem:[%s946_s3 + $0xc0] sm:$0xff] %v450_v30 }
 0x109   :  { %v388_v33 = vpop.f32.mrf.mxu0  ;;  %v452_v34 = vpop.f32.mrf.mxu1 }
 0x10a   :  { %v389_v35 = vadd.f32 %v813_v42, %v388_v33  ;;  %v453_v36 = vadd.f32 %v813_v42, %v452_v34 }
 0x10b   :  { %v390_v37 = vpop.f32.mrf.mxu0  ;;  %v454_v38 = vpop.f32.mrf.mxu1 }
 0x10c   :  { %489 = vst [vmem:[%s946_s3 + $0x48] sm:$0xff] %v389_v35  ;;  %505 = vst [vmem:[%s946_s3 + $0xc8] sm:$0xff] %v453_v36 }
 0x10d   :  { %v393_v39 = vpop.f32.mrf.mxu0  ;;  %v457_v40 = vpop.f32.mrf.mxu1 }
 0x10e   :  { %v394_v41 = vadd.f32 %v813_v42, %v393_v39  ;;  %v458_v43 = vadd.f32 %v813_v42, %v457_v40 }
 0x10f   :  { %v395_v44 = vpop.f32.mrf.mxu0  ;;  %v459_v45 = vpop.f32.mrf.mxu1 }
 0x110   :  { %490 = vst [vmem:[%s946_s3 + $0x50] sm:$0xff] %v394_v41  ;;  %506 = vst [vmem:[%s946_s3 + $0xd0] sm:$0xff] %v458_v43 }
 0x111   :  { %v396_v46 = vpop.f32.mrf.mxu0  ;;  %v460_v47 = vpop.f32.mrf.mxu1 }
 0x112   :  { %v397_v48 = vadd.f32 %v813_v42, %v396_v46  ;;  %v461_v49 = vadd.f32 %v813_v42, %v460_v47 }
 0x113   :  { %v398_v50 = vpop.f32.mrf.mxu0  ;;  %v462_v51 = vpop.f32.mrf.mxu1 }
 0x114   :  { %491 = vst [vmem:[%s946_s3 + $0x58] sm:$0xff] %v397_v48  ;;  %507 = vst [vmem:[%s946_s3 + $0xd8] sm:$0xff] %v461_v49 }
 0x115   :  { %v401_v52 = vpop.f32.mrf.mxu0  ;;  %v465_v53 = vpop.f32.mrf.mxu1 }
 0x116   :  { %v402_v54 = vadd.f32 %v813_v42, %v401_v52  ;;  %v466_v55 = vadd.f32 %v813_v42, %v465_v53 }
 0x117   :  { %v403_v56 = vpop.f32.mrf.mxu0  ;;  %v467_v57 = vpop.f32.mrf.mxu1 }
 0x118   :  { %492 = vst [vmem:[%s946_s3 + $0x60] sm:$0xff] %v402_v54  ;;  %508 = vst [vmem:[%s946_s3 + $0xe0] sm:$0xff] %v466_v55 }
 0x119   :  { %v404_v58 = vpop.f32.mrf.mxu0  ;;  %v468_v59 = vpop.f32.mrf.mxu1 }
 0x11a   :  { %v405_v60 = vadd.f32 %v813_v42, %v404_v58  ;;  %v469_v61 = vadd.f32 %v813_v42, %v468_v59 }
 0x11b   :  { %v406_v62 = vpop.f32.mrf.mxu0  ;;  %v470_v63 = vpop.f32.mrf.mxu1 }
 0x11c   :  { %493 = vst [vmem:[%s946_s3 + $0x68] sm:$0xff] %v405_v60  ;;  %509 = vst [vmem:[%s946_s3 + $0xe8] sm:$0xff] %v469_v61 }
 0x11d   :  { %v409_v0 = vpop.f32.mrf.mxu0  ;;  %v473_v1 = vpop.f32.mrf.mxu1 }
 0x11e   :  { %v410_v2 = vadd.f32 %v813_v42, %v409_v0  ;;  %v474_v3 = vadd.f32 %v813_v42, %v473_v1 }
 0x11f   :  { %v411_v4 = vpop.f32.mrf.mxu0  ;;  %v475_v5 = vpop.f32.mrf.mxu1 }
 0x120   :  { %494 = vst [vmem:[%s946_s3 + $0x70] sm:$0xff] %v410_v2  ;;  %510 = vst [vmem:[%s946_s3 + $0xf0] sm:$0xff] %v474_v3 }
 0x121   :  { %v412_v6 = vpop.f32.mrf.mxu0  ;;  %v476_v7 = vpop.f32.mrf.mxu1 }
 0x122   :  { %v413_v8 = vadd.f32 %v813_v42, %v412_v6  ;;  %v477_v9 = vadd.f32 %v813_v42, %v476_v7 }
 0x123   :  { %v414_v10 = vpop.f32.mrf.mxu0  ;;  %v478_v11 = vpop.f32.mrf.mxu1 }
 0x124   :  { %495 = vst [vmem:[%s946_s3 + $0x78] sm:$0xff] %v413_v8  ;;  %511 = vst [vmem:[%s946_s3 + $0xf8] sm:$0xff] %v477_v9 }

// kernel: _lambda_.13
= control target key start
LH: loop header
LB: loop body
LE: loop exit
PB: predicated region body
PF: predicated region fallthrough
CT: control target
= control target key end

     0   :  { %v298_v0 = vmov 0   ;;  %vm138_vm0 = vcmask 130048   ;;  %s401_s1 = inlined_call_operand.vmem [shape: bf16[144,128], index: 1, kind: input, shape index: {}]   ;;  %s402_s0 = inlined_call_operand.vmem [shape: bf16[64,144], index: 0, kind: input, shape index: {}]   ;;  %s403_s2 = inlined_call_operand.vmem [shape: f32[1,128], index: 2, kind: input, shape index: {}]   ;;  %s404_s3 = inlined_call_operand.vmem [shape: f32[64,128], index: 3, kind: output, shape index: {}]  }
   0x1   :  { %151 = vmatprep.subr.bf16.mxu0 %v298_v0  ;;  %258 = vmatprep.subr.bf16.mxu1 %v298_v0  ;;  %v277_v1 = vld [vmem:[%s401_s1 + $0x38] sm:$0xff]   ;;  %v278_v2 = vld [vmem:[%s401_s1 + $0x30] sm:$0xff]   ;;  %v279_v3 = vld [vmem:[%s401_s1 + $0x28] sm:$0xff]  }
   0x2   :  { %152 = vmatpush1.bf16.msra.mxu0 %v277_v1  ;;  %267 = vmatpush1.bf16.msra.mxu1 %v277_v1  ;;  %v280_v4 = vld [vmem:[%s401_s1 + $0x20] sm:$0xff]   ;;  %v281_v7 = vld [vmem:[%s401_s1 + $0x18] sm:$0xff]   ;;  %v282_v8 = vld [vmem:[%s401_s1 + $0x10] sm:$0xff]  }
   0x3   :  { %153 = vmatprep.subr.bf16.mxu0 %v298_v0  ;;  %259 = vmatprep.subr.bf16.mxu1 %v298_v0  ;;  %v288_v5 = vld [vmem:[%s402_s0 + $0x4] ss:$8 sps:$4 sm:$0xff]   ;;  %v286_v12 = vld [vmem:[%s402_s0] ss:$8 sps:$4 sm:$0xff]   ;;  %v292_v14 = vld [vmem:[%s402_s0 + $0x14] ss:$8 sps:$4 sm:$0xff]  }
   0x4   :  { %v291_v6 = vld [vmem:[%s402_s0 + $0x24] ss:$8 sps:$4 sm:$0xff]   ;;  %254 = vmatprep.mubr.msk.bf16.mxu0 %vm138_vm0, %v288_v5  ;;  %v289_v13 = vld [vmem:[%s402_s0 + $0x20] ss:$8 sps:$4 sm:$0xff]   ;;  %v294_v15 = vld [vmem:[%s402_s0 + $0x34] ss:$8 sps:$4 sm:$0xff]  }
   0x5   :  { %256 = vmatprep.mubr.msk.bf16.mxu1 %vm138_vm0, %v291_v6  ;;  %v283_v9 = vld [vmem:[%s401_s1 + $0x8] sm:$0xff]   ;;  %v284_v10 = vld [vmem:[%s401_s1] sm:$0xff]   ;;  %v296_v16 = vld [vmem:[%s402_s0 + $0x10] ss:$8 sps:$4 sm:$0xff]  }
   0x6   :  { %154 = vmatpush1.bf16.msra.mxu0 %v278_v2  ;;  %268 = vmatpush1.bf16.msra.mxu1 %v278_v2  ;;  %v285_v11 = vld [vmem:[%s401_s1 + $0x40] sm:$0xff]   ;;  %v297_v17 = vld [vmem:[%s402_s0 + $0x30] ss:$8 sps:$4 sm:$0xff]  }
   0x7   :  { %155 = vmatprep.subr.bf16.mxu0 %v298_v0  ;;  %260 = vmatprep.subr.bf16.mxu1 %v298_v0  ;;  %v236_v18 = vld [vmem:[%s403_s2] ss:$0 sm:$0xff] }
   0xa   :  { %156 = vmatpush1.bf16.msra.mxu0 %v279_v3  ;;  %269 = vmatpush1.bf16.msra.mxu1 %v279_v3 }
   0xb   :  { %157 = vmatprep.subr.bf16.mxu0 %v298_v0  ;;  %261 = vmatprep.subr.bf16.mxu1 %v298_v0 }
   0xe   :  { %158 = vmatpush1.bf16.msra.mxu0 %v280_v4  ;;  %270 = vmatpush1.bf16.msra.mxu1 %v280_v4 }
   0xf   :  { %159 = vmatprep.subr.bf16.mxu0 %v298_v0  ;;  %262 = vmatprep.subr.bf16.mxu1 %v298_v0 }
  0x12   :  { %160 = vmatpush1.bf16.msra.mxu0 %v281_v7  ;;  %271 = vmatpush1.bf16.msra.mxu1 %v281_v7 }
  0x13   :  { %161 = vmatprep.subr.bf16.mxu0 %v298_v0  ;;  %263 = vmatprep.subr.bf16.mxu1 %v298_v0 }
  0x16   :  { %162 = vmatpush1.bf16.msra.mxu0 %v282_v8  ;;  %272 = vmatpush1.bf16.msra.mxu1 %v282_v8 }
  0x17   :  { %163 = vmatprep.subr.bf16.mxu0 %v298_v0  ;;  %264 = vmatprep.subr.bf16.mxu1 %v298_v0 }
  0x1a   :  { %164 = vmatpush1.bf16.msra.mxu0 %v283_v9  ;;  %273 = vmatpush1.bf16.msra.mxu1 %v283_v9 }
  0x1b   :  { %165 = vmatprep.subr.bf16.mxu0 %v298_v0  ;;  %265 = vmatprep.subr.bf16.mxu1 %v298_v0 }
  0x1e   :  { %166 = vmatpush1.bf16.msra.mxu0 %v284_v10  ;;  %274 = vmatpush1.bf16.msra.mxu1 %v284_v10 }
  0x1f   :  { %181 = vmatprep.subr.bf16.mxu0 %v298_v0  ;;  %266 = vmatprep.subr.bf16.mxu1 %v298_v0 }
  0x22   :  { %182 = vmatpush2.bf16.msra.mxu0 %v285_v11  ;;  %275 = vmatpush2.bf16.msra.mxu1 %v285_v11 }
  0x25   :  { %184 = vmatmul.mubr.bf16.vlgmr.msra.gmra.mxu0 %v286_v12  ;;  %200 = vmatmul.mubr.bf16.vlgmr.msra.gmra.mxu1 %v289_v13 }
  0x26   :  { %255 = vmatprep.mubr.msk.bf16.mxu0 %vm138_vm0, %v292_v14  ;;  %257 = vmatprep.mubr.msk.bf16.mxu1 %vm138_vm0, %v294_v15 }
  0x2d   :  { %192 = vmatmul.mubr.bf16.gmra.mxu0 %v296_v16  ;;  %208 = vmatmul.mubr.bf16.gmra.mxu1 %v297_v17 }
  0xe5   :  { %v185_v19 = vpop.f32.mrf.mxu0  ;;  %v201_v20 = vpop.f32.mrf.mxu1 }
  0xe6   :  { %v186_v21 = vadd.f32 %v236_v18, %v185_v19  ;;  %v202_v22 = vadd.f32 %v236_v18, %v201_v20 }
  0xe7   :  { %v187_v23 = vpop.f32.mrf.mxu0  ;;  %v203_v24 = vpop.f32.mrf.mxu1 }
  0xe8   :  { %v216_v25 = vmax.f32 %v186_v21, 0.0  ;;  %v220_v26 = vmax.f32 %v202_v22, 0.0 }
  0xe9   :  { %v188_v27 = vpop.f32.mrf.mxu0  ;;  %v204_v28 = vpop.f32.mrf.mxu1 }
  0xea   :  { %224 = vst [vmem:[%s404_s3] sm:$0xff] %v216_v25  ;;  %228 = vst [vmem:[%s404_s3 + $0x20] sm:$0xff] %v220_v26  ;;  %v189_v29 = vadd.f32 %v236_v18, %v188_v27  ;;  %v205_v30 = vadd.f32 %v236_v18, %v204_v28 }
  0xeb   :  { %v190_v31 = vpop.f32.mrf.mxu0  ;;  %v206_v32 = vpop.f32.mrf.mxu1 }
  0xec   :  { %v217_v33 = vmax.f32 %v189_v29, 0.0  ;;  %v221_v34 = vmax.f32 %v205_v30, 0.0 }
  0xed   :  { %v193_v35 = vpop.f32.mrf.mxu0  ;;  %v209_v36 = vpop.f32.mrf.mxu1 }
  0xee   :  { %225 = vst [vmem:[%s404_s3 + $0x8] sm:$0xff] %v217_v33  ;;  %229 = vst [vmem:[%s404_s3 + $0x28] sm:$0xff] %v221_v34  ;;  %v194_v37 = vadd.f32 %v236_v18, %v193_v35  ;;  %v210_v38 = vadd.f32 %v236_v18, %v209_v36 }
  0xef   :  { %v195_v39 = vpop.f32.mrf.mxu0  ;;  %v211_v40 = vpop.f32.mrf.mxu1 }
  0xf0   :  { %v218_v41 = vmax.f32 %v194_v37, 0.0  ;;  %v222_v42 = vmax.f32 %v210_v38, 0.0 }
  0xf1   :  { %v196_v43 = vpop.f32.mrf.mxu0  ;;  %v212_v44 = vpop.f32.mrf.mxu1 }
  0xf2   :  { %226 = vst [vmem:[%s404_s3 + $0x10] sm:$0xff] %v218_v41  ;;  %230 = vst [vmem:[%s404_s3 + $0x30] sm:$0xff] %v222_v42  ;;  %v197_v45 = vadd.f32 %v236_v18, %v196_v43  ;;  %v213_v46 = vadd.f32 %v236_v18, %v212_v44 }
  0xf3   :  { %v198_v47 = vpop.f32.mrf.mxu0  ;;  %v214_v48 = vpop.f32.mrf.mxu1 }
  0xf4   :  { %v219_v49 = vmax.f32 %v197_v45, 0.0  ;;  %v223_v50 = vmax.f32 %v213_v46, 0.0 }
  0xf6   :  { %227 = vst [vmem:[%s404_s3 + $0x18] sm:$0xff] %v219_v49  ;;  %231 = vst [vmem:[%s404_s3 + $0x38] sm:$0xff] %v223_v50 }

// kernel: _lambda_.17
= control target key start
LH: loop header
LB: loop body
LE: loop exit
PB: predicated region body
PF: predicated region fallthrough
CT: control target
= control target key end

     0   :  { %v117_v0 = vmov 0.0   ;;  %vm118_vm0 = vmmov 0   ;;  %vm45_vm1 = vcmask 261120   ;;  %s157_s1 = inlined_call_operand.vmem [shape: bf16[32,128], index: 1, kind: input, shape index: {}]   ;;  %s158_s0 = inlined_call_operand.vmem [shape: bf16[16,32], index: 0, kind: input, shape index: {}]   ;;  %s159_s2 = inlined_call_operand.vmem [shape: f32[1,128], index: 2, kind: input, shape index: {}]   ;;  %s160_s3 = inlined_call_operand.vmem [shape: f32[16,128], index: 3, kind: output, shape index: {}]  }
   0x1   :  { %104 = vmatprep.subr.bf16.mxu0 %v117_v0  ;;  %v114_v1 = vld [vmem:[%s157_s1 + $0x8] sm:$0xff]   ;;  %108 = vmatprep.mubr.msk.bf16.mxu0 %vm118_vm0, %v117_v0  ;;  %v115_v2 = vld [vmem:[%s157_s1] sm:$0xff]  }
   0x2   :  { %105 = vmatpush3.bf16.msra.mxu0 %v114_v1  ;;  %v116_v3 = vld [vmem:[%s158_s0] sm:$0xff]  }
   0x3   :  { %106 = vmatprep.subr.bf16.mxu0 %v117_v0  ;;  %v96_v4 = vld [vmem:[%s159_s2] ss:$0 sm:$0xff] }
   0x6   :  { %107 = vmatpush3.bf16.msra.mxu0 %v115_v2 }
   0x9   :  { %109 = vmatmul.mubr.msk.bf16.vlgmr.msra.gmra.mxu0 %vm45_vm1, %v116_v3 }
  0xc9   :  { %v83_v5 = vpop.f32.mrf.mxu0 }
  0xca   :  { %v84_v6 = vadd.f32 %v96_v4, %v83_v5 }
  0xcb   :  { %v110_v7 = vpop.f32.mrf.mxu0 }
  0xcc   :  { %90 = vst [vmem:[%s160_s3] sm:$0xff] %v84_v6 }
  0xcd   :  { %v86_v8 = vpop.f32.mrf.mxu0 }
  0xce   :  { %v87_v9 = vadd.f32 %v96_v4, %v86_v8 }
  0xcf   :  { %v111_v10 = vpop.f32.mrf.mxu0 }
  0xd0   :  { %91 = vst [vmem:[%s160_s3 + $0x8] sm:$0xff] %v87_v9 }

// kernel: _lambda_.14
= control target key start
LH: loop header
LB: loop body
LE: loop exit
PB: predicated region body
PF: predicated region fallthrough
CT: control target
= control target key end

     0   :  { %s3820_s0 = inlined_call_operand.vmem [shape: f32[16,32], index: 0, kind: input, shape index: {}]   ;;  %s3821_s1 = inlined_call_operand.vmem [shape: f32[5,32], index: 1, kind: input, shape index: {}]   ;;  %s3822_s2 = inlined_call_operand.vmem [shape: f32[5,32], index: 2, kind: input, shape index: {}]   ;;  %s3823_s3 = inlined_call_operand.vmem [shape: bf16[32,128], index: 3, kind: input, shape index: {}]   ;;  %s3824_s4 = inlined_call_operand.vmem [shape: f32[1,128], index: 4, kind: input, shape index: {}]   ;;  %s3825_s5 = inlined_call_operand.vmem [shape: bf16[128,32], index: 5, kind: input, shape index: {}]   ;;  %s3826_s6 = inlined_call_operand.vmem [shape: f32[1,32], index: 6, kind: input, shape index: {}]   ;;  %s3827_s7 = inlined_call_operand.vmem [shape: bf16[4,32,8], index: 7, kind: input, shape index: {}]   ;;  %s3828_s8 = inlined_call_operand.vmem [shape: f32[4,1,8], index: 8, kind: input, shape index: {}]   ;;  %s3829_s9 = inlined_call_operand.vmem [shape: bf16[4,32,8], index: 9, kind: input, shape index: {}]   ;;  %s3830_s10 = inlined_call_operand.vmem [shape: f32[4,1,8], index: 10, kind: input, shape index: {}]   ;;  %s3831_s11 = inlined_call_operand.vmem [shape: bf16[4,32,32], index: 11, kind: input, shape index: {}]   ;;  %s3832_s12 = inlined_call_operand.vmem [shape: f32[1,32], index: 12, kind: input, shape index: {}]   ;;  %s3833_s13 = inlined_call_operand.vmem [shape: bf16[32,64], index: 13, kind: input, shape index: {}]   ;;  %s3834_s14 = inlined_call_operand.vmem [shape: f32[1,64], index: 14, kind: input, shape index: {}]   ;;  %s3835_s15 = inlined_call_operand.vmem [shape: f32[7,32], index: 15, kind: input, shape index: {}]   ;;  %s3836_s16 = inlined_call_operand.vmem [shape: f32[1,32], index: 16, kind: input, shape index: {}]   ;;  %s3837_s17 = inlined_call_operand.vmem [shape: bf16[32,32], index: 17, kind: input, shape index: {}]   ;;  %s3838_s18 = inlined_call_operand.vmem [shape: f32[1,32], index: 18, kind: input, shape index: {}]   ;;  %s3839_s19 = inlined_call_operand.vmem [shape: bf16[32,128], index: 19, kind: input, shape index: {}]   ;;  %s3840_s20 = inlined_call_operand.vmem [shape: f32[1,128], index: 20, kind: input, shape index: {}]   ;;  %s3841_s21 = inlined_call_operand.vmem [shape: bf16[128,32], index: 21, kind: input, shape index: {}]   ;;  %s3842_s22 = inlined_call_operand.vmem [shape: f32[1,32], index: 22, kind: input, shape index: {}]   ;;  %s3843_s23 = inlined_call_operand.vmem [shape: f32[16,32], index: 23, kind: output, shape index: {}]  }
   0x1   :  { %3850 = sst [smem:[#allocation2_spill]] %s3820_s0 }
   0x2   :  { %3851 = sst [smem:[#allocation3_spill]] %s3821_s1 }
   0x3   :  { %3852 = sst [smem:[#allocation4_spill]] %s3822_s2 }
   0x4   :  { %3853 = sst [smem:[#allocation5_spill]] %s3823_s3 }
   0x5   :  { %3854 = sst [smem:[#allocation6_spill]] %s3824_s4  ;;  %s3347_s4 = smov 0  }
   0x6   :  { %3855 = sst [smem:[#allocation7_spill]] %s3825_s5 }
   0x7   :  { %3856 = sst [smem:[#allocation8_spill]] %s3826_s6 }
   0x8   :  { %3857 = sst [smem:[#allocation9_spill]] %s3827_s7 }
   0x9 LB: > { %s2699_s30 = sadd.s32 4294967295, %s3222_s4   ;;  %p2703_p0 = scmp.ge.s32.totalorder %s3222_s4, 1  ;;  %s3222_s4 = sphi %s3347_s4, %s33_s4  }
   0xa   : > { %p636_p1 = scmp.lt.s32.totalorder %s3222_s4, 3 }
   0xc   : > { %p637_p2 = pnand %p2703_p0, %p636_p1 }
   0xd   : > { %p698_p3 = scmp.lt.s32.totalorder (!%p637_p2), %s2699_s30, 1  ;;  %s3858_s1 = sld [smem:[#allocation2_spill]] (!%p637_p2) }
   0xe   : > { %640 = sbr.rel (%p637_p2) target bundleno = 3974 (0xf86), region = 112  ;;  %s3859_s27 = sld [smem:[#allocation5_spill]] (!%p637_p2) }
   0xf   : > { %s3860_s0 = sld [smem:[#allocation3_spill]] (!%p637_p2) }
  0x10   : > { %s3862_s6 = sld [smem:[#allocation7_spill]] (!%p637_p2) }
  0x11   : > { %s3863_s7 = sld [smem:[#allocation6_spill]] (!%p637_p2) }
  0x12   : > { %s3864_s3 = sld [smem:[#allocation8_spill]] (!%p637_p2) }
  0x13   : > { %s3868_s30 = smov (!%p698_p3, %s2699_s30), 1  ;;  %vm708_vm0 = vcmask 261120   ;;  %v3224_v8 = vmov 0.0   ;;  %vm3225_vm1 = vmmov 0   ;;  %vm1688_vm2 = vcmask 64512  }
  0x14   : > { %s3849_s24 = sshll.u32 %s3868_s30, 3  ;;  %v3126_v7 = vld [vmem:[%s3859_s27 + $0x8] sm:$0xff]   ;;  %2899 = vmatprep.subr.bf16.mxu1 %v3224_v8  ;;  %2903 = vmatprep.mubr.msk.bf16.mxu1 %vm3225_vm1, %v3224_v8  ;;  %v3127_v9 = vld [vmem:[%s3859_s27] sm:$0xff]   ;;  %vm1932_vm3 = vcmask 1043456  }
  0x15   : > { %s701_s26 = scalar_lea.vmem %s3858_s1, %s3849_s24  ;;  %2900 = vmatpush3.bf16.msra.mxu1 %v3126_v7  ;;  %2935 = vmatprep.subr.bf16.mxu0 %v3224_v8  ;;  %v2706_v14 = vld [vmem:[%s3860_s0] ss:$0 sm:$0xff]  ;;  %s3861_s1 = sld [smem:[#allocation4_spill]]  ;;  %v2722_v62 = vld [vmem:[%s3860_s0 + $0x1] ss:$0 sm:$0xff] }
  0x16   : > { %v3363_v0 = vld [vmem:[%s701_s26] sm:$0xff]  ;;  %2901 = vmatprep.subr.bf16.mxu1 %v3224_v8  ;;  %2939 = vmatprep.mubr.msk.bf16.mxu0 %vm3225_vm1, %v3224_v8  ;;  %v3128_v20 = vld [vmem:[%s3862_s6 + $0x38] sm:$0xff]   ;;  %v3129_v21 = vld [vmem:[%s3862_s6 + $0x30] sm:$0xff]   ;;  %s3865_s26 = sld [smem:[#allocation9_spill]]  ;;  %s3226_s24 = smov 96  }
  0x17   : > { %v709_v1 = vsel %vm708_vm0, %v3363_v0, 0.0  ;;  %v3130_v22 = vld [vmem:[%s3862_s6 + $0x28] sm:$0xff]   ;;  %v3131_v23 = vld [vmem:[%s3862_s6 + $0x20] sm:$0xff]   ;;  %v3132_v24 = vld [vmem:[%s3862_s6 + $0x18] sm:$0xff]  }
  0x18   : > { %710 = vadd.xlane.f32.xlu0 %v709_v1  ;;  %v3133_v25 = vld [vmem:[%s3862_s6 + $0x10] sm:$0xff]   ;;  %v3134_v26 = vld [vmem:[%s3862_s6 + $0x8] sm:$0xff]   ;;  %v3135_v27 = vld [vmem:[%s3862_s6] sm:$0xff]  }
  0x19   : > { %2902 = vmatpush3.bf16.msra.mxu1 %v3127_v9  ;;  %v2708_v28 = vld [vmem:[%s3863_s7] ss:$0 sm:$0xff] }
  0x1a   : > { %2907 = vmatprep.subr.bf16.mxu1 %v3224_v8  ;;  %v2713_v40 = vld [vmem:[%s3864_s3] ss:$0 sm:$0xff]  ;;  %s3866_s3 = sshll.u32 %s3868_s30, 3 }
  0x1b   : > { %v2707_v16 = vld [vmem:[%s3861_s1] ss:$0 sm:$0xff]  ;;  %s705_s2 = scalar_lea.vmem %s3843_s23, %s3866_s3 }
  0x1c   : > { %v3136_v54 = vld [vmem:[%s3865_s26 + $0x8] sm:$0xff]   ;;  %v3137_v55 = vld [vmem:[%s3865_s26 + $0x18] sm:$0xff]   ;;  %v3138_v56 = vld [vmem:[%s3865_s26] sm:$0xff]  }
  0x1d   : > { %2936 = vmatpush3.bf16.msra.mxu0 %v3137_v55  ;;  %v3139_v57 = vld [vmem:[%s3865_s26 + $0x10] sm:$0xff]   ;;  %v3143_v7 = vld [vmem:[%s3829_s9] sm:$0xff]   ;;  %v3144_v9 = vld [vmem:[%s3865_s26 + $0x38] sm:$0xff]  }
  0x1e   : > { %2937 = vmatprep.subr.bf16.mxu0 %v3224_v8 }
  0x21   : > { %2938 = vmatpush3.bf16.msra.mxu0 %v3139_v57 }
  0x22   : > { %2943 = vmatprep.subr.bf16.mxu0 %v3224_v8 }
  0xa1   : > { %v711_v2 = vpop.xlane.xlu0 %710 }
  0xa2   : > { %v713_v3 = vmul.f32 0.03125, %v711_v2 }
  0xa4   : > { %v714_v4 = vsub.f32 %v3363_v0, %v713_v3  ;;  %v3140_v3 = vld [vmem:[%s3865_s26 + $0x28] sm:$0xff]  }
  0xa6   : > { %v715_v5 = vmul.f32 %v714_v4, %v714_v4 }
  0xa8   : > { %v716_v6 = vsel %vm708_vm0, %v715_v5, 0.0 }
  0xa9   : > { %717 = vadd.xlane.f32.xlu0 %v716_v6  ;;  %v3142_v6 = vld [vmem:[%s3865_s26 + $0x20] sm:$0xff]  }
 0x132   : > { %v718_v10 = vpop.xlane.xlu0 %717 }
 0x133   : > { %v719_v11 = vmul.f32 0.03125, %v718_v10  ;;  %v3145_v10 = vld [vmem:[%s3829_s9 + $0x28] sm:$0xff]  }
 0x135   : > { %v720_v12 = vadd.f32 1e-05, %v719_v11  ;;  %v3146_v11 = vld [vmem:[%s3865_s26 + $0x30] sm:$0xff]  }
 0x137   : > { %3174 = vrsqrt.f32 %v720_v12  ;;  %v3147_v12 = vld [vmem:[%s3829_s9 + $0x20] sm:$0xff]  }
 0x144   : > { %v3175_v13 = vpop.eup %3174 }
 0x145   : > { %v722_v15 = vmul.f32 %v3175_v13, %v714_v4  ;;  %v3141_v4 = vld [vmem:[%s3829_s9 + $0x8] sm:$0xff]   ;;  %v3148_v13 = vld [vmem:[%s3829_s9 + $0x18] sm:$0xff]  }
 0x147   : > { %v728_v17 = vmul.f32 %v2706_v14, %v722_v15  ;;  %v3149_v14 = vld [vmem:[%s3831_s11 + $0x8] sm:$0xff]   ;;  %v3150_v15 = vld [vmem:[%s3829_s9 + $0x10] sm:$0xff]  }
 0x149   : > { %v734_v18 = vadd.f32 %v2707_v16, %v728_v17  ;;  %v3151_v16 = vld [vmem:[%s3831_s11] sm:$0xff]   ;;  %v3152_v17 = vld [vmem:[%s3829_s9 + $0x38] sm:$0xff]  }
 0x14b   : > { %v739_v19 = vpack.c.bf16 %v734_v18, %v734_v18  ;;  %v3153_v18 = vld [vmem:[%s3831_s11 + $0x28] sm:$0xff]  }
 0x14d   : > { %2904 = vmatmul.mubr.msk.bf16.vlgmr.msra.gmra.mxu1 %vm708_vm0, %v739_v19  ;;  %v3154_v19 = vld [vmem:[%s3829_s9 + $0x30] sm:$0xff]  }
 0x14e   : > { %2923 = vmatprep.mubr.msk.bf16.mxu1 %vm3225_vm1, %v3224_v8  ;;  %2908 = vmatpush3.bf16.msra.mxu1 %v3128_v20  ;;  %v3155_v20 = vld [vmem:[%s3831_s11 + $0x20] sm:$0xff]  }
 0x14f   : > { %2909 = vmatprep.subr.bf16.mxu1 %v3224_v8 }
 0x152   : > { %2910 = vmatpush3.bf16.msra.mxu1 %v3129_v21  ;;  %v3156_v21 = vld [vmem:[%s3831_s11 + $0x18] sm:$0xff]  }
 0x153   : > { %2911 = vmatprep.subr.bf16.mxu1 %v3224_v8 }
 0x156   : > { %2912 = vmatpush3.bf16.msra.mxu1 %v3130_v22  ;;  %v3157_v22 = vld [vmem:[%s3831_s11 + $0x10] sm:$0xff]  }
 0x157   : > { %2913 = vmatprep.subr.bf16.mxu1 %v3224_v8 }
 0x15a   : > { %2914 = vmatpush3.bf16.msra.mxu1 %v3131_v23  ;;  %v3158_v23 = vld [vmem:[%s3831_s11 + $0x38] sm:$0xff]  }
 0x15b   : > { %2915 = vmatprep.subr.bf16.mxu1 %v3224_v8 }
 0x15e   : > { %2916 = vmatpush3.bf16.msra.mxu1 %v3132_v24  ;;  %v3159_v24 = vld [vmem:[%s3831_s11 + $0x30] sm:$0xff]  }
 0x15f   : > { %2917 = vmatprep.subr.bf16.mxu1 %v3224_v8 }
 0x162   : > { %2918 = vmatpush3.bf16.msra.mxu1 %v3133_v25 }
 0x163   : > { %2919 = vmatprep.subr.bf16.mxu1 %v3224_v8 }
 0x166   : > { %2920 = vmatpush3.bf16.msra.mxu1 %v3134_v26 }
 0x167   : > { %2921 = vmatprep.subr.bf16.mxu1 %v3224_v8 }
 0x16a   : > { %2922 = vmatpush3.bf16.msra.mxu1 %v3135_v27 }
 0x16b   : > { %2927 = vmatprep.subr.bf16.mxu1 %v3224_v8 }
 0x20d   : > { %v796_v29 = vpop.f32.mrf.mxu1 }
 0x20e   : > { %v797_v30 = vadd.f32 %v2708_v28, %v796_v29 }
 0x20f   : > { %v2905_v31 = vpop.f32.mrf.mxu1 }
 0x210   : > { %v2712_v32 = vmul.f32 -1.442695, %v797_v30 }
 0x211   : > { %v799_v33 = vpop.f32.mrf.mxu1 }
 0x212   : > { %3176 = vpow2.f32 %v2712_v32  ;;  %v2740_v33 = vld [vmem:[%s3830_s10] ss:$0 sm:$0xff] }
 0x213   : > { %v2906_v34 = vpop.f32.mrf.mxu1 }
 0x21f   : > { %v3177_v35 = vpop.eup %3176 }
 0x220   : > { %v805_v36 = vadd.f32 1.0, %v3177_v35 }
 0x222   : > { %3178 = vrcp.f32 %v805_v36 }
 0x22f   : > { %v3179_v37 = vpop.eup %3178 }
 0x230   : > { %v808_v38 = vmul.f32 %v3179_v37, %v797_v30 }
 0x232   : > { %v825_v39 = vpack.c.bf16 %v808_v38, %v808_v38 }
 0x234   : > { %2924 = vmatmul.mubr.bf16.vlgmr.msra.gmra.mxu1 %v825_v39 }
 0x235   : > { %2931 = vmatprep.mubr.msk.bf16.mxu1 %vm3225_vm1, %v3224_v8  ;;  %2928 = vmatpush3.bf16.msra.mxu1 %v3136_v54 }
 0x236   : > { %2929 = vmatprep.subr.bf16.mxu1 %v3224_v8 }
 0x239   : > { %2930 = vmatpush3.bf16.msra.mxu1 %v3138_v56  ;;  %v2726_v56 = vld [vmem:[%s3828_s8 + $0x2] ss:$0 sm:$0xff] }
 0x23a   : > { %2959 = vmatprep.subr.bf16.mxu1 %v3224_v8 }
 0x2f4   : > { %v915_v41 = vpop.f32.mrf.mxu1 }
 0x2f5   : > { %v916_v42 = vadd.f32 %v2713_v40, %v915_v41  ;;  %v2724_v40 = vld [vmem:[%s3828_s8] ss:$0 sm:$0xff] }
 0x2f6   : > { %v2925_v43 = vpop.f32.mrf.mxu1 }
 0x2f7   : > { %v921_v44 = vmul.f32 0.5, %v916_v42 }
 0x2f8   : > { %v918_v45 = vpop.f32.mrf.mxu1 }
 0x2f9   : > { %v3433_v46 = vadd.f32 %v921_v44, %v3363_v0  ;;  %v2723_v0 = vld [vmem:[%s3861_s1 + $0x1] ss:$0 sm:$0xff] }
 0x2fa   : > { %v2926_v47 = vpop.f32.mrf.mxu1 }
 0x2fb   : > { %v923_v48 = vsel %vm708_vm0, %v3433_v46, 0.0  ;;  %v2742_v47 = vld [vmem:[%s3830_s10 + $0x2] ss:$0 sm:$0xff] }
 0x2fc   : > { %924 = vadd.xlane.f32.xlu1 %v923_v48 }
 0x385   : > { %v925_v49 = vpop.xlane.xlu1 %924 }
 0x386   : > { %v926_v50 = vmul.f32 0.03125, %v925_v49 }
 0x388   : > { %v927_v51 = vsub.f32 %v3433_v46, %v926_v50 }
 0x38a   : > { %v928_v52 = vmul.f32 %v927_v51, %v927_v51 }
 0x38c   : > { %v929_v53 = vsel %vm708_vm0, %v928_v52, 0.0 }
 0x38d   : > { %930 = vadd.xlane.f32.xlu1 %v929_v53 }
 0x416   : > { %v931_v58 = vpop.xlane.xlu1 %930 }
 0x417   : > { %v932_v59 = vmul.f32 0.03125, %v931_v58 }
 0x419   : > { %v933_v60 = vadd.f32 1e-05, %v932_v59 }
 0x41b   : > { %3180 = vrsqrt.f32 %v933_v60 }
 0x428   : > { %v3181_v61 = vpop.eup %3180 }
 0x429   : > { %v935_v63 = vmul.f32 %v3181_v61, %v927_v51 }
 0x42b   : > { %v941_v1 = vmul.f32 %v2722_v62, %v935_v63  ;;  %v2741_v62 = vld [vmem:[%s3830_s10 + $0x1] ss:$0 sm:$0xff] }
 0x42d   : > { %v947_v2 = vadd.f32 %v2723_v0, %v941_v1 }
 0x42f   : > { %v3467_v5 = vpack.c.bf16 %v947_v2, %v947_v2 }
 0x431   : > { %2932 = vmatmul.mubr.msk.bf16.vlgmr.msra.gmra.mxu1 %vm708_vm0, %v3467_v5  ;;  %2940 = vmatmul.mubr.msk.bf16.vlgmr.msra.gmra.mxu0 %vm708_vm0, %v3467_v5 }
 0x432   : > { %2944 = vmatpush3.bf16.msra.mxu0 %v3140_v3  ;;  %2960 = vmatpush3.bf16.msra.mxu1 %v3141_v4 }
 0x433   : > { %2945 = vmatprep.subr.bf16.mxu0 %v3224_v8  ;;  %2961 = vmatprep.subr.bf16.mxu1 %v3224_v8 }
 0x434   : > { %2947 = vmatprep.mubr.msk.bf16.mxu0 %vm3225_vm1, %v3224_v8  ;;  %2963 = vmatprep.mubr.msk.bf16.mxu1 %vm3225_vm1, %v3224_v8 }
 0x436   : > { %2946 = vmatpush3.bf16.msra.mxu0 %v3142_v6  ;;  %2962 = vmatpush3.bf16.msra.mxu1 %v3143_v7 }
 0x437   : > { %2951 = vmatprep.subr.bf16.mxu0 %v3224_v8  ;;  %2975 = vmatprep.subr.bf16.mxu1 %v3224_v8 }
 0x439   : > { %2948 = vmatmul.mubr.msk.bf16.vlgmr.msra.gmra.mxu0 %vm708_vm0, %v3467_v5  ;;  %2964 = vmatmul.mubr.msk.bf16.vlgmr.msra.gmra.mxu1 %vm708_vm0, %v3467_v5 }
 0x43a   : > { %2952 = vmatpush3.bf16.msra.mxu0 %v3144_v9  ;;  %2976 = vmatpush3.bf16.msra.mxu1 %v3145_v10  ;;  %v2725_v9 = vld [vmem:[%s3828_s8 + $0x1] ss:$0 sm:$0xff] }
 0x43b   : > { %2953 = vmatprep.subr.bf16.mxu0 %v3224_v8  ;;  %2977 = vmatprep.subr.bf16.mxu1 %v3224_v8 }
 0x43c   : > { %2955 = vmatprep.mubr.msk.bf16.mxu0 %vm3225_vm1, %v3224_v8  ;;  %2979 = vmatprep.mubr.msk.bf16.mxu1 %vm3225_vm1, %v3224_v8 }
 0x43e   : > { %2954 = vmatpush3.bf16.msra.mxu0 %v3146_v11  ;;  %2978 = vmatpush3.bf16.msra.mxu1 %v3147_v12 }
 0x43f   : > { %2967 = vmatprep.subr.bf16.mxu0 %v3224_v8  ;;  %2991 = vmatprep.subr.bf16.mxu1 %v3224_v8 }
 0x441   : > { %2956 = vmatmul.mubr.msk.bf16.vlgmr.msra.gmra.mxu0 %vm708_vm0, %v3467_v5  ;;  %2980 = vmatmul.mubr.msk.bf16.vlgmr.msra.gmra.mxu1 %vm708_vm0, %v3467_v5 }
 0x442   : > { %2968 = vmatpush3.bf16.msra.mxu0 %v3148_v13  ;;  %2992 = vmatpush3.bf16.msra.mxu1 %v3149_v14 }
 0x443   : > { %2969 = vmatprep.subr.bf16.mxu0 %v3224_v8  ;;  %2993 = vmatprep.subr.bf16.mxu1 %v3224_v8 }
 0x444   : > { %2971 = vmatprep.mubr.msk.bf16.mxu0 %vm3225_vm1, %v3224_v8  ;;  %2995 = vmatprep.mubr.msk.bf16.mxu1 %vm3225_vm1, %v3224_v8 }
 0x446   : > { %2970 = vmatpush3.bf16.msra.mxu0 %v3150_v15  ;;  %2994 = vmatpush3.bf16.msra.mxu1 %v3151_v16  ;;  %v2743_v16 = vld [vmem:[%s3830_s10 + $0x3] ss:$0 sm:$0xff] }
 0x447   : > { %2983 = vmatprep.subr.bf16.mxu0 %v3224_v8  ;;  %3007 = vmatprep.subr.bf16.mxu1 %v3224_v8 }
 0x449   : > { %2972 = vmatmul.mubr.msk.bf16.vlgmr.msra.gmra.mxu0 %vm708_vm0, %v3467_v5  ;;  %2996 = vmatmul.mubr.msk.bf16.vlgmr.msra.gmra.mxu1 %vm708_vm0, %v3467_v5 }
 0x44a   : > { %2984 = vmatpush3.bf16.msra.mxu0 %v3152_v17  ;;  %3008 = vmatpush3.bf16.msra.mxu1 %v3153_v18 }
 0x44b   : > { %2985 = vmatprep.subr.bf16.mxu0 %v3224_v8  ;;  %3009 = vmatprep.subr.bf16.mxu1 %v3224_v8 }
 0x44c   : > { %2987 = vmatprep.mubr.msk.bf16.mxu0 %vm3225_vm1, %v3224_v8  ;;  %3011 = vmatprep.mubr.msk.bf16.mxu1 %vm3225_vm1, %v3224_v8 }
 0x44e   : > { %2986 = vmatpush3.bf16.msra.mxu0 %v3154_v19  ;;  %3010 = vmatpush3.bf16.msra.mxu1 %v3155_v20 }
 0x44f   : > { %2999 = vmatprep.subr.bf16.mxu0 %v3224_v8  ;;  %3023 = vmatprep.subr.bf16.mxu1 %v3224_v8 }
 0x451   : > { %2988 = vmatmul.mubr.msk.bf16.vlgmr.msra.gmra.mxu0 %vm708_vm0, %v3467_v5  ;;  %3012 = vmatmul.mubr.msk.bf16.vlgmr.msra.gmra.mxu1 %vm708_vm0, %v3467_v5 }
 0x452   : > { %3000 = vmatpush3.bf16.msra.mxu0 %v3156_v21  ;;  %3003 = vmatprep.mubr.msk.bf16.mxu0 %vm3225_vm1, %v3224_v8 }
 0x453   : > { %3001 = vmatprep.subr.bf16.mxu0 %v3224_v8  ;;  %3025 = vmatprep.mubr.msk.bf16.mxu1 %vm3225_vm1, %v3224_v8 }
 0x456   : > { %3002 = vmatpush3.bf16.msra.mxu0 %v3157_v22 }
 0x457   : > { %3015 = vmatprep.subr.bf16.mxu0 %v3224_v8 }
 0x459   : > { %3004 = vmatmul.mubr.msk.bf16.vlgmr.msra.gmra.mxu0 %vm708_vm0, %v3467_v5 }
 0x45a   : > { %3016 = vmatpush3.bf16.msra.mxu0 %v3158_v23  ;;  %3019 = vmatprep.mubr.msk.bf16.mxu0 %vm3225_vm1, %v3224_v8 }
 0x45b   : > { %3017 = vmatprep.subr.bf16.mxu0 %v3224_v8 }
 0x45e   : > { %3018 = vmatpush3.bf16.msra.mxu0 %v3159_v24 }
 0x45f   : > { %3029 = vmatprep.subr.bf16.mxu0 %v3224_v8 }
 0x461   : > { %3020 = vmatmul.mubr.msk.bf16.vlgmr.msra.gmra.mxu0 %vm708_vm0, %v3467_v5 }
 0x462   : > { %3031 = vmatprep.mubr.msk.bf16.mxu0 %vm3225_vm1, %v3224_v8 }
 0x4f1   : > { %v1042_v25 = vpop.f32.mrf.mxu1  ;;  %v3591_v26 = vpop.f32.mrf.mxu0 }
 0x4f2   : > { %v1043_v48 = vadd.f32 %v2724_v40, %v1042_v25  ;;  %v1095_v17 = vadd.f32 %v2725_v9, %v3591_v26  ;;  %v2727_v26 = vld [vmem:[%s3828_s8 + $0x3] ss:$0 sm:$0xff] }
 0x4f3   : > { %v2933_v27 = vpop.f32.mrf.mxu1  ;;  %v2941_v28 = vpop.f32.mrf.mxu0 }
 0x4f4   : > { %v1680_v54 = vpack.c.bf16 %v1043_v48, %v1043_v48  ;;  %v1681_v24 = vpack.c.bf16 %v1095_v17, %v1095_v17 }
 0x4f5   : > { %v1045_v29 = vpop.f32.mrf.mxu1  ;;  %v1097_v30 = vpop.f32.mrf.mxu0 }
 0x4f7   : > { %v2934_v31 = vpop.f32.mrf.mxu1  ;;  %v2942_v32 = vpop.f32.mrf.mxu0 }
 0x4f9   : > { %v1146_v34 = vpop.f32.mrf.mxu0  ;;  %v1294_v35 = vpop.f32.mrf.mxu1 }
 0x4fa   : > { %v1295_v36 = vadd.f32 %v2740_v33, %v1294_v35  ;;  %v1147_v63 = vadd.f32 %v2726_v56, %v1146_v34 }
 0x4fb   : > { %v2949_v37 = vpop.f32.mrf.mxu0  ;;  %v2965_v38 = vpop.f32.mrf.mxu1 }
 0x4fc   : > { %v1684_v39 = vpack.c.bf16 %v1295_v36, %v1295_v36  ;;  %v1682_v6 = vpack.c.bf16 %v1147_v63, %v1147_v63 }
 0x4fd   : > { %v1149_v41 = vpop.f32.mrf.mxu0  ;;  %v1297_v42 = vpop.f32.mrf.mxu1 }
 0x4fe   : > { %v1693_v43 = vsel %vm1688_vm2, %v1684_v39, 0 }
 0x4ff   : > { %v2950_v44 = vpop.f32.mrf.mxu0  ;;  %v2966_v45 = vpop.f32.mrf.mxu1  ;;  %3024 = vmatpush3.bf16.xpose.msra.mxu1 %v1693_v43 }
 0x500   : > { %3035 = vmatprep.subr.bf16.mxu1 %v3224_v8 }
 0x501   : > { %v1198_v49 = vpop.f32.mrf.mxu0  ;;  %v1398_v50 = vpop.f32.mrf.mxu1 }
 0x502   : > { %v1399_v51 = vadd.f32 %v2742_v47, %v1398_v50  ;;  %v1199_v33 = vadd.f32 %v2727_v26, %v1198_v49 }
 0x503   : > { %v2957_v52 = vpop.f32.mrf.mxu0  ;;  %v2981_v53 = vpop.f32.mrf.mxu1 }
 0x504   : > { %v1686_v55 = vpack.c.bf16 %v1399_v51, %v1399_v51  ;;  %v1683_v37 = vpack.c.bf16 %v1199_v33, %v1199_v33 }
 0x505   : > { %v1201_v57 = vpop.f32.mrf.mxu0  ;;  %v1401_v58 = vpop.f32.mrf.mxu1 }
 0x506   : > { %v1785_v59 = vsel %vm1688_vm2, %v1686_v55, 0  ;;  %3026 = vmatmul.mubr.msk.bf16.vlgmr.msra.gmra.mxu1 %vm1688_vm2, %v1680_v54 }
 0x507   : > { %v2958_v60 = vpop.f32.mrf.mxu0  ;;  %v2982_v61 = vpop.f32.mrf.mxu1  ;;  %3036 = vmatpush3.bf16.xpose.msra.mxu1 %v1785_v59  ;;  %3037 = vmatprep.mubr.msk.bf16.mxu1 %vm3225_vm1, %v3224_v8 }
 0x508   : > { %3047 = vmatprep.subr.bf16.mxu1 %v3224_v8 }
 0x509   : > { %v1346_v0 = vpop.f32.mrf.mxu0  ;;  %v1518_v1 = vpop.f32.mrf.mxu1 }
 0x50a   : > { %v1347_v2 = vadd.f32 %v2741_v62, %v1346_v0  ;;  %v1925_v3 = vpack.c.bf16 %v1518_v1, %v1518_v1 }
 0x50b   : > { %v2973_v4 = vpop.f32.mrf.mxu0  ;;  %v2997_v5 = vpop.f32.mrf.mxu1 }
 0x50c   : > { %v1685_v7 = vpack.c.bf16 %v1347_v2, %v1347_v2  ;;  %v1934_v13 = vsel %vm1932_vm3, %v1925_v3, 0 }
 0x50d   : > { %v1349_v10 = vpop.f32.mrf.mxu0  ;;  %v1521_v11 = vpop.f32.mrf.mxu1 }
 0x50e   : > { %v1739_v12 = vsel %vm1688_vm2, %v1685_v7, 0  ;;  %3038 = vmatmul.mubr.msk.bf16.vlgmr.msra.gmra.mxu1 %vm1688_vm2, %v1682_v6 }
 0x50f   : > { %v2974_v14 = vpop.f32.mrf.mxu0  ;;  %v2998_v15 = vpop.f32.mrf.mxu1  ;;  %3030 = vmatpush3.bf16.xpose.msra.mxu0 %v1739_v12  ;;  %3048 = vmatpush3.bf16.msra.mxu1 %v1934_v13 }
 0x510   : > { %3041 = vmatprep.subr.bf16.mxu0 %v3224_v8  ;;  %3049 = vmatprep.mubr.msk.bf16.mxu1 %vm3225_vm1, %v3224_v8 }
 0x511   : > { %v1450_v18 = vpop.f32.mrf.mxu0  ;;  %v1622_v19 = vpop.f32.mrf.mxu1  ;;  %3059 = vmatprep.subr.bf16.mxu1 %v3224_v8 }
 0x512   : > { %v1451_v20 = vadd.f32 %v2743_v16, %v1450_v18  ;;  %v1927_v21 = vpack.c.bf16 %v1622_v19, %v1622_v19 }
 0x513   : > { %v2989_v22 = vpop.f32.mrf.mxu0  ;;  %v3013_v23 = vpop.f32.mrf.mxu1 }
 0x514   : > { %v1687_v25 = vpack.c.bf16 %v1451_v20, %v1451_v20  ;;  %v3630_v27 = vsel %vm1932_vm3, %v1927_v21, 0 }
 0x515   : > { %v1453_v28 = vpop.f32.mrf.mxu0  ;;  %v1625_v29 = vpop.f32.mrf.mxu1 }
 0x516   : > { %v1831_v30 = vsel %vm1688_vm2, %v1687_v25, 0  ;;  %3032 = vmatmul.mubr.msk.bf16.vlgmr.msra.gmra.mxu0 %vm1688_vm2, %v1681_v24 }
 0x517   : > { %v2990_v31 = vpop.f32.mrf.mxu0  ;;  %v3014_v32 = vpop.f32.mrf.mxu1  ;;  %3042 = vmatpush3.bf16.xpose.msra.mxu0 %v1831_v30  ;;  %3043 = vmatprep.mubr.msk.bf16.mxu0 %vm3225_vm1, %v3224_v8 }
 0x518   : > { %3053 = vmatprep.subr.bf16.mxu0 %v3224_v8 }
 0x519   : > { %v1570_v34 = vpop.f32.mrf.mxu0 }
 0x51a   : > { %v1926_v35 = vpack.c.bf16 %v1570_v34, %v1570_v34 }
 0x51b   : > { %v3005_v36 = vpop.f32.mrf.mxu0 }
 0x51c   : > { %v1980_v39 = vsel %vm1932_vm3, %v1926_v35, 0 }
 0x51d   : > { %v1573_v38 = vpop.f32.mrf.mxu0 }
 0x51e   : > { %3044 = vmatmul.mubr.msk.bf16.vlgmr.msra.gmra.mxu0 %vm1688_vm2, %v1683_v37 }
 0x51f   : > { %v3006_v40 = vpop.f32.mrf.mxu0  ;;  %3054 = vmatpush3.bf16.msra.mxu0 %v1980_v39  ;;  %3055 = vmatprep.mubr.msk.bf16.mxu0 %vm3225_vm1, %v3224_v8 }
 0x520   : > { %3065 = vmatprep.subr.bf16.mxu0 %v3224_v8 }
 0x521   : > { %v1674_v41 = vpop.f32.mrf.mxu0 }
 0x522   : > { %v1928_v42 = vpack.c.bf16 %v1674_v41, %v1674_v41 }
 0x523   : > { %v3021_v43 = vpop.f32.mrf.mxu0 }
 0x524   : > { %v3646_v44 = vsel %vm1932_vm3, %v1928_v42, 0 }
 0x525   : > { %v1677_v45 = vpop.f32.mrf.mxu0 }
 0x527   : > { %v3022_v47 = vpop.f32.mrf.mxu0 }
 0x5c6   : > { %v1729_v48 = vpop.f32.mrf.mxu1 }
 0x5c7   : > { %v1873_v49 = vmul.f32 0.35355338, %v1729_v48 }
 0x5c8   : > { %v3027_v50 = vpop.f32.mrf.mxu1 }
 0x5c9   : > { %v1877_v51 = vsel %vm1688_vm2, %v1873_v49, -inf }
 0x5ca   : > { %1878 = vmax.xlane.f32.xlu0 %v1877_v51  ;;  %v1732_v52 = vpop.f32.mrf.mxu1 }
 0x5cc   : > { %v3028_v53 = vpop.f32.mrf.mxu1 }
 0x5ce   : > { %v1821_v54 = vpop.f32.mrf.mxu1 }
 0x5cf   : > { %v1875_v55 = vmul.f32 0.35355338, %v1821_v54 }
 0x5d0   : > { %v3039_v56 = vpop.f32.mrf.mxu1 }
 0x5d1   : > { %v1883_v57 = vsel %vm1688_vm2, %v1875_v55, -inf }
 0x5d2   : > { %1884 = vmax.xlane.f32.xlu0 %v1883_v57  ;;  %v1824_v58 = vpop.f32.mrf.mxu1 }
 0x5d4   : > { %v3040_v59 = vpop.f32.mrf.mxu1 }
 0x5d6   : > { %v1775_v60 = vpop.f32.mrf.mxu0 }
 0x5d7   : > { %v1874_v61 = vmul.f32 0.35355338, %v1775_v60 }
 0x5d8   : > { %v3033_v62 = vpop.f32.mrf.mxu0 }
 0x5d9   : > { %v1880_v63 = vsel %vm1688_vm2, %v1874_v61, -inf }
 0x5da   : > { %1881 = vmax.xlane.f32.xlu1 %v1880_v63  ;;  %v1778_v0 = vpop.f32.mrf.mxu0 }
 0x5dc   : > { %v3034_v1 = vpop.f32.mrf.mxu0 }
 0x5dd   : > { %v2776_v1 = vld [vmem:[%s3832_s12] ss:$0 sm:$0xff] }
 0x5de   : > { %v1867_v2 = vpop.f32.mrf.mxu0 }
 0x5df   : > { %v1876_v3 = vmul.f32 0.35355338, %v1867_v2 }
 0x5e0   : > { %v3045_v4 = vpop.f32.mrf.mxu0 }
 0x5e1   : > { %v1886_v5 = vsel %vm1688_vm2, %v1876_v3, -inf }
 0x5e2   : > { %1887 = vmax.xlane.f32.xlu1 %v1886_v5  ;;  %v1870_v6 = vpop.f32.mrf.mxu0 }
 0x5e4   : > { %v3046_v7 = vpop.f32.mrf.mxu0 }
 0x653   : > { %v1879_v9 = vpop.xlane.xlu0 %1878 }
 0x654   : > { %v1889_v10 = vsub.f32 %v1873_v49, %v1879_v9 }
 0x656   : > { %v1893_v11 = vmul.f32 1.442695, %v1889_v10 }
 0x658   : > { %3182 = vpow2.f32 %v1893_v11 }
 0x65b   : > { %v1885_v12 = vpop.xlane.xlu0 %1884 }
 0x65c   : > { %v1891_v13 = vsub.f32 %v1875_v55, %v1885_v12 }
 0x65e   : > { %v1897_v14 = vmul.f32 1.442695, %v1891_v13 }
 0x660   : > { %3184 = vpow2.f32 %v1897_v14 }
 0x663   : > { %v1882_v15 = vpop.xlane.xlu1 %1881 }
 0x664   : > { %v1890_v16 = vsub.f32 %v1874_v61, %v1882_v15  ;;  %v3160_v15 = vld [vmem:[%s3833_s13 + $0x8] sm:$0xff]  }
 0x665   : > { %v3183_v17 = vpop.eup %3182 }
 0x666   : > { %v1895_v18 = vmul.f32 1.442695, %v1890_v16  ;;  %v1901_v19 = vsel %vm1688_vm2, %v3183_v17, 0.0 }
 0x667   : > { %1902 = vadd.xlane.f32.xlu0 %v1901_v19 }
 0x668   : > { %3186 = vpow2.f32 %v1895_v18 }
 0x66b   : > { %v1888_v20 = vpop.xlane.xlu1 %1887 }
 0x66c   : > { %v1892_v21 = vsub.f32 %v1876_v3, %v1888_v20  ;;  %v2777_v20 = vld [vmem:[%s3860_s0 + $0x2] ss:$0 sm:$0xff] }
 0x66d   : > { %v3185_v22 = vpop.eup %3184 }
 0x66e   : > { %v1899_v23 = vmul.f32 1.442695, %v1892_v21  ;;  %v1907_v24 = vsel %vm1688_vm2, %v3185_v22, 0.0 }
 0x66f   : > { %1908 = vadd.xlane.f32.xlu0 %v1907_v24 }
 0x670   : > { %3188 = vpow2.f32 %v1899_v23 }
 0x675   : > { %v3187_v25 = vpop.eup %3186 }
 0x676   : > { %v1904_v26 = vsel %vm1688_vm2, %v3187_v25, 0.0 }
 0x677   : > { %1905 = vadd.xlane.f32.xlu1 %v1904_v26  ;;  %v2779_v26 = vld [vmem:[%s3834_s14] ss:$0 sm:$0xff] }
 0x67d   : > { %v3189_v28 = vpop.eup %3188 }
 0x67e   : > { %v1910_v29 = vsel %vm1688_vm2, %v3189_v28, 0.0 }
 0x67f   : > { %1911 = vadd.xlane.f32.xlu1 %v1910_v29 }
 0x6f0   : > { %v1903_v30 = vpop.xlane.xlu0 %1902 }
 0x6f1   : > { %3190 = vrcp.f32 %v1903_v30 }
 0x6f8   : > { %v1909_v31 = vpop.xlane.xlu0 %1908 }
 0x6f9   : > { %3192 = vrcp.f32 %v1909_v31 }
 0x6fe   : > { %v3191_v32 = vpop.eup %3190 }
 0x6ff   : > { %v1917_v33 = vmul.f32 %v3191_v32, %v3183_v17 }
 0x700   : > { %v1906_v34 = vpop.xlane.xlu1 %1905 }
 0x701   : > { %3194 = vrcp.f32 %v1906_v34  ;;  %v1921_v35 = vpack.c.bf16 %v1917_v33, %v1917_v33 }
 0x703   : > { %3050 = vmatmul.mubr.msk.bf16.vlgmr.msra.gmra.mxu1 %vm1688_vm2, %v1921_v35 }
 0x704   : > { %3060 = vmatpush3.bf16.msra.mxu1 %v3630_v27  ;;  %3061 = vmatprep.mubr.msk.bf16.mxu1 %vm3225_vm1, %v3224_v8 }
 0x705   : > { %3071 = vmatprep.subr.bf16.mxu1 %v3224_v8 }
 0x706   : > { %v3193_v36 = vpop.eup %3192 }
 0x707   : > { %v1919_v37 = vmul.f32 %v3193_v36, %v3185_v22  ;;  %v2778_v22 = vld [vmem:[%s3861_s1 + $0x2] ss:$0 sm:$0xff]  ;;  %v3162_v36 = vld [vmem:[%s3837_s17 + $0x8] sm:$0xff]  }
 0x708   : > { %v1912_v38 = vpop.xlane.xlu1 %1911 }
 0x709   : > { %3196 = vrcp.f32 %v1912_v38  ;;  %v1923_v39 = vpack.c.bf16 %v1919_v37, %v1919_v37  ;;  %v3163_v37 = vld [vmem:[%s3837_s17] sm:$0xff]  }
 0x70b   : > { %3062 = vmatmul.mubr.msk.bf16.vlgmr.msra.gmra.mxu1 %vm1688_vm2, %v1923_v39  ;;  %v2233_v39 = vlaneseq }
 0x70c   : > { %3075 = vmatprep.mubr.msk.bf16.mxu1 %vm3225_vm1, %v3224_v8  ;;  %3072 = vmatpush3.bf16.msra.mxu1 %v3160_v15 }
 0x70d   : > { %3073 = vmatprep.subr.bf16.mxu1 %v3224_v8 }
 0x70e   : > { %v3195_v40 = vpop.eup %3194 }
 0x70f   : > { %v1918_v41 = vmul.f32 %v3195_v40, %v3187_v25  ;;  %v2234_v40 = vshrl.u32 %v2233_v39, 7 }
 0x711   : > { %v1922_v42 = vpack.c.bf16 %v1918_v41, %v1918_v41  ;;  %v2236_v41 = vadd.s32 4294967293, %v2234_v40 }
 0x713   : > { %3056 = vmatmul.mubr.msk.bf16.vlgmr.msra.gmra.mxu0 %vm1688_vm2, %v1922_v42  ;;  %v2249_v42 = vadd.s32 4294967294, %v2234_v40  ;;  %vm2237_vm4 = vcmp.ge.s32.totalorder %v2236_v41, 0 }
 0x714   : > { %3066 = vmatpush3.bf16.msra.mxu0 %v3646_v44  ;;  %3067 = vmatprep.mubr.msk.bf16.mxu0 %vm3225_vm1, %v3224_v8 }
 0x715   : > { %3079 = vmatprep.subr.bf16.mxu0 %v3224_v8  ;;  %vm2250_vm5 = vcmp.ge.s32.totalorder %v2249_v42, 0 }
 0x716   : > { %v3197_v27 = vpop.eup %3196 }
 0x717   : > { %v1920_v43 = vmul.f32 %v3197_v27, %v3189_v28  ;;  %v2262_v27 = vadd.s32 4294967295, %v2234_v40 }
 0x719   : > { %v1924_v45 = vpack.c.bf16 %v1920_v43, %v1920_v43  ;;  %vm2263_vm6 = vcmp.ge.s32.totalorder %v2262_v27, 0 }
 0x71b   : > { %3068 = vmatmul.mubr.msk.bf16.vlgmr.msra.gmra.mxu0 %vm1688_vm2, %v1924_v45 }
 0x71c   : > { %3083 = vmatprep.mubr.msk.bf16.mxu0 %vm3225_vm1, %v3224_v8  ;;  %3080 = vmatpush3.bf16.msra.mxu0 %v3162_v36 }
 0x71d   : > { %3081 = vmatprep.subr.bf16.mxu0 %v3224_v8 }
 0x720   : > { %3082 = vmatpush3.bf16.msra.mxu0 %v3163_v37 }
 0x721   : > { %3095 = vmatprep.subr.bf16.mxu0 %v3224_v8 }
 0x7c3   : > { %v1970_v47 = vpop.f32.mrf.mxu1 }
 0x7c4   : > { %v2114_v57 = vsel %vm708_vm0, %v1970_v47, 0.0  ;;  %v2784_v47 = vld [vmem:[%s3835_s15] ss:$0 sm:$0xff] }
 0x7c5   : > { %v3051_v48 = vpop.f32.mrf.mxu1 }
 0x7c6   : > { %v2286_v48 = vadd.s32 1, %v2234_v40 }
 0x7c7   : > { %v1973_v49 = vpop.f32.mrf.mxu1 }
 0x7c8   : > { %v2785_v49 = vld [vmem:[%s3835_s15 + $0x1] ss:$0 sm:$0xff]  ;;  %vm2288_vm7 = vcmp.lt.s32.totalorder %v2286_v48, 8  ;;  %v2798_v48 = vld [vmem:[%s3861_s1 + $0x3] ss:$0 sm:$0xff] }
 0x7c9   : > { %v3052_v50 = vpop.f32.mrf.mxu1 }
 0x7cb   : > { %v2062_v51 = vpop.f32.mrf.mxu1 }
 0x7cc   : > { %v2117_v61 = vsel %vm708_vm0, %v2062_v51, 0.0 }
 0x7cd   : > { %v3063_v52 = vpop.f32.mrf.mxu1 }
 0x7cf   : > { %v2065_v44 = vpop.f32.mrf.mxu1 }
 0x7d0   : > { %v2299_v44 = vadd.s32 2, %v2234_v40 }
 0x7d1   : > { %v3064_v53 = vpop.f32.mrf.mxu1 }
 0x7d2   : > { %vm2301_vm8 = vcmp.lt.s32.totalorder %v2299_v44, 8  ;;  %v3167_v44 = vld [vmem:[%s3841_s21 + $0x30] sm:$0xff]  }
 0x7d3   : > { %v2016_v54 = vpop.f32.mrf.mxu0 }
 0x7d4   : > { %v2115_v55 = vsel %vm708_vm0, %v2016_v54, 0.0 }
 0x7d5   : > { %v3057_v56 = vpop.f32.mrf.mxu0  ;;  %v2116_v58 = vadd.f32 %v2115_v55, %v2114_v57  ;;  %v2786_v57 = vld [vmem:[%s3835_s15 + $0x2] ss:$0 sm:$0xff] }
 0x7d7   : > { %v2019_v59 = vpop.f32.mrf.mxu0  ;;  %v2118_v63 = vadd.f32 %v2117_v61, %v2116_v58  ;;  %v2787_v61 = vld [vmem:[%s3835_s15 + $0x3] ss:$0 sm:$0xff] }
 0x7d9   : > { %v3058_v60 = vpop.f32.mrf.mxu0 }
 0x7da   : > { %v2312_v60 = vadd.s32 3, %v2234_v40  ;;  %v3164_v40 = vld [vmem:[%s3839_s19 + $0x8] sm:$0xff]  }
 0x7db   : > { %v2108_v62 = vpop.f32.mrf.mxu0 }
 0x7dc   : > { %v2119_v0 = vsel %vm708_vm0, %v2108_v62, 0.0  ;;  %vm2314_vm9 = vcmp.lt.s32.totalorder %v2312_v60, 8 }
 0x7dd   : > { %v2120_v2 = vadd.f32 %v2119_v0, %v2118_v63  ;;  %v3069_v3 = vpop.f32.mrf.mxu0 }
 0x7df   : > { %v2128_v4 = vadd.f32 %v2776_v1, %v2120_v2  ;;  %v2111_v5 = vpop.f32.mrf.mxu0  ;;  %v2788_v2 = vld [vmem:[%s3835_s15 + $0x4] ss:$0 sm:$0xff] }
 0x7e1   : > { %v3070_v6 = vpop.f32.mrf.mxu0  ;;  %v3680_v7 = vadd.f32 %v2128_v4, %v3433_v46  ;;  %v3161_v46 = vld [vmem:[%s3833_s13] sm:$0xff]  }
 0x7e2   : > { %3074 = vmatpush3.bf16.msra.mxu1 %v3161_v46 }
 0x7e3   : > { %v2130_v9 = vsel %vm708_vm0, %v3680_v7, 0.0  ;;  %3087 = vmatprep.subr.bf16.mxu1 %v3224_v8 }
 0x7e4   : > { %2131 = vadd.xlane.f32.xlu0 %v2130_v9  ;;  %v2789_v9 = vld [vmem:[%s3835_s15 + $0x5] ss:$0 sm:$0xff] }
 0x86d   : > { %v2132_v10 = vpop.xlane.xlu0 %2131 }
 0x86e   : > { %v2133_v11 = vmul.f32 0.03125, %v2132_v10 }
 0x870   : > { %v2134_v12 = vsub.f32 %v3680_v7, %v2133_v11 }
 0x872   : > { %v2135_v13 = vmul.f32 %v2134_v12, %v2134_v12 }
 0x874   : > { %v2136_v14 = vsel %vm708_vm0, %v2135_v13, 0.0  ;;  %v2790_v13 = vld [vmem:[%s3835_s15 + $0x6] ss:$0 sm:$0xff] }
 0x875   : > { %2137 = vadd.xlane.f32.xlu1 %v2136_v14 }
 0x8fe   : > { %v2138_v16 = vpop.xlane.xlu1 %2137 }
 0x8ff   : > { %v2139_v17 = vmul.f32 0.03125, %v2138_v16 }
 0x901   : > { %v2140_v18 = vadd.f32 1e-05, %v2139_v17  ;;  %v2791_v17 = vld [vmem:[%s3836_s16] ss:$0 sm:$0xff] }
 0x903   : > { %3198 = vrsqrt.f32 %v2140_v18 }
 0x910   : > { %v3199_v19 = vpop.eup %3198 }
 0x911   : > { %v2142_v21 = vmul.f32 %v3199_v19, %v2134_v12 }
 0x913   : > { %v2148_v23 = vmul.f32 %v2777_v20, %v2142_v21 }
 0x915   : > { %v2154_v24 = vadd.f32 %v2778_v22, %v2148_v23 }
 0x917   : > { %v2159_v25 = vpack.c.bf16 %v2154_v24, %v2154_v24 }
 0x919   : > { %3076 = vmatmul.mubr.msk.bf16.vlgmr.msra.gmra.mxu1 %vm708_vm0, %v2159_v25 }
 0x91a   : > { %3091 = vmatprep.mubr.msk.bf16.mxu1 %vm3225_vm1, %v3224_v8  ;;  %3088 = vmatpush3.bf16.msra.mxu1 %v3164_v40 }
 0x91b   : > { %3089 = vmatprep.subr.bf16.mxu1 %v3224_v8 }
 0x9d9   : > { %v2216_v28 = vpop.f32.mrf.mxu1 }
 0x9da   : > { %v2217_v29 = vadd.f32 %v2779_v26, %v2216_v28  ;;  %v2793_v26 = vld [vmem:[%s3838_s18] ss:$0 sm:$0xff] }
 0x9db   : > { %v3077_v30 = vpop.f32.mrf.mxu1 }
 0x9dc   : > { %v2783_v31 = vmul.f32 -1.442695, %v2217_v29 }
 0x9dd   : > { %v2219_v32 = vpop.f32.mrf.mxu1 }
 0x9de   : > { %3200 = vpow2.f32 %v2783_v31 }
 0x9df   : > { %v3078_v33 = vpop.f32.mrf.mxu1 }
 0x9eb   : > { %v3201_v34 = vpop.eup %3200 }
 0x9ec   : > { %v2225_v35 = vadd.f32 1.0, %v3201_v34 }
 0x9ee   : > { %3202 = vrcp.f32 %v2225_v35 }
 0x9fb   : > { %v3203_v38 = vpop.eup %3202 }
 0x9fc   : > { %2229 = vrot.lane.b32.xlu0 %v3203_v38, %s3226_s24 }
 0xa6e   : > { %v2230_v43 = vpop.permute.xlu0 %2229 }
 0xa6f   : > { %v2232_v45 = vmul.f32 %v2230_v43, %v2217_v29 }
 0xa71   : > { %v2235_v50 = vrot.slane %v2232_v45, 5  ;;  %v2248_v51 = vrot.slane %v2232_v45, 6  ;;  %v2261_v52 = vrot.slane %v2232_v45, 7  ;;  %v2285_v56 = vrot.slane %v2232_v45, 1 }
 0xa72   : > { %v2298_v62 = vrot.slane %v2232_v45, 2  ;;  %v2311_v3 = vrot.slane %v2232_v45, 3  ;;  %v2283_v5 = vmul.f32 %v2787_v61, %v2232_v45  ;;  %v2797_v45 = vld [vmem:[%s3860_s0 + $0x3] ss:$0 sm:$0xff] }
 0xa73   : > { %v2240_v53 = vsel %vm2237_vm4, %v2235_v50, 0.0  ;;  %v2253_v54 = vsel %vm2250_vm5, %v2248_v51, 0.0  ;;  %v2266_v55 = vsel %vm2263_vm6, %v2261_v52, 0.0  ;;  %v2290_v1 = vsel %vm2288_vm7, %v2285_v56, 0.0  ;;  %v3166_v52 = vld [vmem:[%s3841_s21 + $0x38] sm:$0xff]   ;;  %v3171_v56 = vld [vmem:[%s3841_s21 + $0x10] sm:$0xff]  }
 0xa74   : > { %v2246_v58 = vmul.f32 %v2784_v47, %v2240_v53  ;;  %v2259_v59 = vmul.f32 %v2785_v49, %v2253_v54  ;;  %v2272_v0 = vmul.f32 %v2786_v57, %v2266_v55  ;;  %v2303_v6 = vsel %vm2301_vm8, %v2298_v62, 0.0  ;;  %v3168_v53 = vld [vmem:[%s3841_s21 + $0x28] sm:$0xff]   ;;  %v3169_v54 = vld [vmem:[%s3841_s21 + $0x20] sm:$0xff]   ;;  %v3170_v55 = vld [vmem:[%s3841_s21 + $0x18] sm:$0xff]  }
 0xa75   : > { %v2296_v11 = vmul.f32 %v2788_v2, %v2290_v1  ;;  %v2316_v12 = vsel %vm2314_vm9, %v2311_v3, 0.0  ;;  %v2309_v15 = vmul.f32 %v2789_v9, %v2303_v6  ;;  %v3172_v57 = vld [vmem:[%s3841_s21 + $0x8] sm:$0xff]   ;;  %v2804_v6 = vld [vmem:[%s3842_s22] ss:$0 sm:$0xff] }
 0xa76   : > { %v2260_v63 = vadd.f32 %v2259_v59, %v2246_v58  ;;  %v2322_v16 = vmul.f32 %v2790_v13, %v2316_v12  ;;  %v3173_v58 = vld [vmem:[%s3841_s21] sm:$0xff]  }
 0xa77   : > { %v2799_v59 = vld [vmem:[%s3840_s20] ss:$0 sm:$0xff] }
 0xa78   : > { %v2273_v4 = vadd.f32 %v2272_v0, %v2260_v63 }
 0xa7a   : > { %v2284_v10 = vadd.f32 %v2283_v5, %v2273_v4 }
 0xa7c   : > { %v2297_v14 = vadd.f32 %v2296_v11, %v2284_v10 }
 0xa7e   : > { %v2310_v46 = vadd.f32 %v2309_v15, %v2297_v14 }
 0xa80   : > { %v2323_v18 = vadd.f32 %v2322_v16, %v2310_v46 }
 0xa82   : > { %v2331_v19 = vadd.f32 %v2791_v17, %v2323_v18 }
 0xa84   : > { %v2792_v20 = vmul.f32 -1.442695, %v2331_v19 }
 0xa86   : > { %3204 = vpow2.f32 %v2792_v20 }
 0xa93   : > { %v3205_v21 = vpop.eup %3204 }
 0xa94   : > { %v2335_v22 = vadd.f32 1.0, %v3205_v21 }
 0xa96   : > { %3206 = vrcp.f32 %v2335_v22 }
 0xaa3   : > { %v3207_v23 = vpop.eup %3206 }
 0xaa4   : > { %v2338_v24 = vmul.f32 %v3207_v23, %v2331_v19 }
 0xaa6   : > { %v2343_v25 = vpack.c.bf16 %v2338_v24, %v2338_v24 }
 0xaa8   : > { %3084 = vmatmul.mubr.msk.bf16.vlgmr.msra.gmra.mxu0 %vm708_vm0, %v2343_v25  ;;  %v2813_v25 = vld [vmem:[%s3860_s0 + $0x4] ss:$0 sm:$0xff] }
 0xaa9   : > { %3111 = vmatprep.mubr.msk.bf16.mxu0 %vm3225_vm1, %v3224_v8  ;;  %3096 = vmatpush3.bf16.msra.mxu0 %v3166_v52 }
 0xaaa   : > { %3097 = vmatprep.subr.bf16.mxu0 %v3224_v8 }
 0xaad   : > { %3098 = vmatpush3.bf16.msra.mxu0 %v3167_v44 }
 0xaae   : > { %3099 = vmatprep.subr.bf16.mxu0 %v3224_v8 }
 0xab1   : > { %3100 = vmatpush3.bf16.msra.mxu0 %v3168_v53 }
 0xab2   : > { %3101 = vmatprep.subr.bf16.mxu0 %v3224_v8 }
 0xab5   : > { %3102 = vmatpush3.bf16.msra.mxu0 %v3169_v54 }
 0xab6   : > { %3103 = vmatprep.subr.bf16.mxu0 %v3224_v8 }
 0xab9   : > { %3104 = vmatpush3.bf16.msra.mxu0 %v3170_v55 }
 0xaba   : > { %3105 = vmatprep.subr.bf16.mxu0 %v3224_v8 }
 0xabd   : > { %3106 = vmatpush3.bf16.msra.mxu0 %v3171_v56 }
 0xabe   : > { %3107 = vmatprep.subr.bf16.mxu0 %v3224_v8 }
 0xac1   : > { %3108 = vmatpush3.bf16.msra.mxu0 %v3172_v57 }
 0xac2   : > { %3109 = vmatprep.subr.bf16.mxu0 %v3224_v8 }
 0xac5   : > { %3110 = vmatpush3.bf16.msra.mxu0 %v3173_v58 }
 0xb68   : > { %v2400_v28 = vpop.f32.mrf.mxu0 }
 0xb69   : > { %v2401_v29 = vadd.f32 %v2793_v26, %v2400_v28  ;;  %v2814_v28 = vld [vmem:[%s3861_s1 + $0x4] ss:$0 sm:$0xff] }
 0xb6a   : > { %v3085_v30 = vpop.f32.mrf.mxu0 }
 0xb6b   : > { %v3745_v31 = vadd.f32 %v2401_v29, %v3680_v7  ;;  %v3165_v7 = vld [vmem:[%s3839_s19] sm:$0xff]  }
 0xb6c   : > { %v2403_v32 = vpop.f32.mrf.mxu0  ;;  %3090 = vmatpush3.bf16.msra.mxu1 %v3165_v7 }
 0xb6d   : > { %v2407_v33 = vsel %vm708_vm0, %v3745_v31, 0.0 }
 0xb6e   : > { %2408 = vadd.xlane.f32.xlu1 %v2407_v33  ;;  %v3086_v34 = vpop.f32.mrf.mxu0 }
 0xbf7   : > { %v2409_v35 = vpop.xlane.xlu1 %2408 }
 0xbf8   : > { %v2410_v36 = vmul.f32 0.03125, %v2409_v35 }
 0xbfa   : > { %v2411_v37 = vsub.f32 %v3745_v31, %v2410_v36 }
 0xbfc   : > { %v2412_v38 = vmul.f32 %v2411_v37, %v2411_v37 }
 0xbfe   : > { %v2413_v39 = vsel %vm708_vm0, %v2412_v38, 0.0 }
 0xbff   : > { %2414 = vadd.xlane.f32.xlu1 %v2413_v39 }
 0xc88   : > { %v2415_v41 = vpop.xlane.xlu1 %2414 }
 0xc89   : > { %v2416_v42 = vmul.f32 0.03125, %v2415_v41 }
 0xc8b   : > { %v2417_v27 = vadd.f32 1e-05, %v2416_v42 }
 0xc8d   : > { %3208 = vrsqrt.f32 %v2417_v27 }
 0xc9a   : > { %v3209_v43 = vpop.eup %3208 }
 0xc9b   : > { %v2419_v47 = vmul.f32 %v3209_v43, %v2411_v37 }
 0xc9d   : > { %v2425_v49 = vmul.f32 %v2797_v45, %v2419_v47 }
 0xc9f   : > { %v2431_v50 = vadd.f32 %v2798_v48, %v2425_v49 }
 0xca1   : > { %v2436_v51 = vpack.c.bf16 %v2431_v50, %v2431_v50 }
 0xca3   : > { %3092 = vmatmul.mubr.msk.bf16.vlgmr.msra.gmra.mxu1 %vm708_vm0, %v2436_v51 }
 0xd63   : > { %v2493_v60 = vpop.f32.mrf.mxu1 }
 0xd64   : > { %v2494_v61 = vadd.f32 %v2799_v59, %v2493_v60 }
 0xd65   : > { %v3093_v62 = vpop.f32.mrf.mxu1 }
 0xd66   : > { %v2803_v63 = vmul.f32 -1.442695, %v2494_v61 }
 0xd67   : > { %v2496_v0 = vpop.f32.mrf.mxu1 }
 0xd68   : > { %3210 = vpow2.f32 %v2803_v63 }
 0xd69   : > { %v3094_v1 = vpop.f32.mrf.mxu1 }
 0xd75   : > { %v3211_v2 = vpop.eup %3210 }
 0xd76   : > { %v2502_v3 = vadd.f32 1.0, %v3211_v2 }
 0xd78   : > { %3212 = vrcp.f32 %v2502_v3 }
 0xd85   : > { %v3213_v8 = vpop.eup %3212 }
 0xd86   : > { %v2505_v4 = vmul.f32 %v3213_v8, %v2494_v61 }
 0xd88   : > { %v2522_v5 = vpack.c.bf16 %v2505_v4, %v2505_v4 }
 0xd8a   : > { %3112 = vmatmul.mubr.bf16.vlgmr.msra.gmra.mxu0 %v2522_v5 }
 0xe4a   : > { %v2612_v9 = vpop.f32.mrf.mxu0 }
 0xe4b   : > { %v2613_v10 = vadd.f32 %v2804_v6, %v2612_v9 }
 0xe4c   : > { %v3113_v11 = vpop.f32.mrf.mxu0 }
 0xe4d   : > { %v2618_v12 = vmul.f32 0.5, %v2613_v10 }
 0xe4e   : > { %v2615_v13 = vpop.f32.mrf.mxu0 }
 0xe4f   : > { %v2619_v14 = vadd.f32 %v2618_v12, %v3745_v31 }
 0xe50   : > { %v3114_v15 = vpop.f32.mrf.mxu0 }
 0xe51   : > { %v2620_v46 = vsel %vm708_vm0, %v2619_v14, 0.0 }
 0xe52   : > { %2621 = vadd.xlane.f32.xlu1 %v2620_v46 }
 0xedb   : > { %v2622_v16 = vpop.xlane.xlu1 %2621 }
 0xedc   : > { %v2623_v17 = vmul.f32 0.03125, %v2622_v16 }
 0xede   : > { %v2624_v18 = vsub.f32 %v2619_v14, %v2623_v17 }
 0xee0   : > { %v2625_v19 = vmul.f32 %v2624_v18, %v2624_v18 }
 0xee2   : > { %v2626_v20 = vsel %vm708_vm0, %v2625_v19, 0.0 }
 0xee3   : > { %2627 = vadd.xlane.f32.xlu1 %v2626_v20 }
 0xf6c   : > { %v2628_v21 = vpop.xlane.xlu1 %2627 }
 0xf6d   : > { %v2629_v22 = vmul.f32 0.03125, %v2628_v21 }
 0xf6f   : > { %v2630_v23 = vadd.f32 1e-05, %v2629_v22 }
 0xf71   : > { %3214 = vrsqrt.f32 %v2630_v23 }
 0xf7e   : > { %v3215_v24 = vpop.eup %3214 }
 0xf7f   : > { %v2632_v26 = vmul.f32 %v3215_v24, %v2624_v18 }
 0xf81   : > { %v2638_v29 = vmul.f32 %v2813_v25, %v2632_v26 }
 0xf83   : > { %v2644_v30 = vadd.f32 %v2814_v28, %v2638_v29 }
 0xf85   : > { %2645 = vst.msk [vmem:[%s705_s2] sm:$0xff] %vm708_vm0, %v2644_v30 }
 0xf86 PF: > { %s33_s4 = sadd.s32 1, %s3222_s4  }
 0xf87   : > { %p30_p4 = scmp.ge.s32.totalorder %s33_s4, 4  }
 0xf89   :  { %32 = sbr.rel (!%p30_p4) target bundleno = 9 (0x9), region = 142 }

</bundles_post_ra>
